<compile_context>
chip_gen: v7x
topology: tpu7x:2x2x1
jax: 0.10.0
libtpu: 0.0.40
codegen_flags: <defaults>
</compile_context>

<pallas_src>
import functools
import numpy as np

import jax
import jax.numpy as jnp
from jax.experimental import pallas as pl
from jax.experimental.pallas import tpu as pltpu


# ----------------------------------------------------------------------------
# Dtypes and hardware-gated tiling constants
# ----------------------------------------------------------------------------
WEIGHT_DTYPE = jnp.bfloat16          # weight storage in HBM
MATMUL_COMPUTE_DTYPE = jnp.bfloat16  # MXU input dtype (accumulation stays f32)


def _tpu_vmem_capacity():
    try:
        return int(pltpu.get_tpu_info().vmem_capacity_bytes)
    except Exception:
        return 64 * 1024 * 1024      # conservative (v7x-sized) fallback


_VMEM_CAP = _tpu_vmem_capacity()
_BIG_VMEM = _VMEM_CAP >= 96 * 1024 * 1024        # v5e / v6e: 128 MiB, v7x: 64 MiB
_VMEM_LIMIT = (64 if _BIG_VMEM else 32) * 1024 * 1024

_MM_TM = 512 if _BIG_VMEM else 256
_MM_TN = 512 if _BIG_VMEM else 256
_MM_TK = 256            # divides all Whisper contraction dims -> no K padding
_LN_TM = 256
_ATTN_TQ = 256
_ATTN_TK = 256


# ----------------------------------------------------------------------------
# Small shape helpers
# ----------------------------------------------------------------------------
def _round_up(x, m):
    return ((x + m - 1) // m) * m


def _pick_tile(dim, target, mult):
    """Full-dim block if it fits `target`, otherwise the largest divisor of the
    mult-rounded dim that is <= target (avoids padding beyond `mult`)."""
    if dim <= target:
        return dim                       # full-dim blocks are always layout-legal
    dim_r = _round_up(dim, mult)
    for t in range(target, mult - 1, -mult):
        if dim_r % t == 0:
            return t
    return mult


def _pad_to_shape(a, shape):
    pads = [(0, s - d) for d, s in zip(a.shape, shape)]
    if all(p == (0, 0) for p in pads):
        return a
    return jnp.pad(a, pads)


def _pad_time(x):
    """Pad the time axis once (hoisted); returns (padded x, true length)."""
    T = x.shape[1]
    Tp = _round_up(T, 8)
    if Tp > 256 and _pick_tile(Tp, _ATTN_TQ, 8) < 128:
        Tp = _round_up(T, 128)           # e.g. 1500 -> 1536 so tq/tk can be 256
    if Tp != T:
        x = _pad_to_shape(x, (x.shape[0], Tp) + x.shape[2:])
    return x, T


def _pick_head_group(n_head, d_head):
    """Smallest #heads per attention block whose width is a 128-lane multiple."""
    for hg in range(1, n_head + 1):
        if n_head % hg == 0 and (hg * d_head) % 128 == 0:
            return hg
    return n_head


# ----------------------------------------------------------------------------
# In-kernel exact GELU (erf via A&S 7.1.26 polynomial; only uses exp -> safe to
# lower in Mosaic; |erf err| < 1.5e-7, i.e. f32-level exact)
# ----------------------------------------------------------------------------
def _erf_f32(x):
    a1, a2, a3, a4, a5 = 0.254829592, -0.284496736, 1.421413741, -1.453152027, 1.061405429
    p = 0.3275911
    sgn = jnp.where(x >= 0.0, 1.0, -1.0)
    ax = jnp.abs(x)
    t = 1.0 / (1.0 + p * ax)
    poly = ((((a5 * t + a4) * t + a3) * t + a2) * t + a1) * t
    return sgn * (1.0 - poly * jnp.exp(-ax * ax))


def _gelu_f32(x):
    return x * 0.5 * (1.0 + _erf_f32(x * 0.7071067811865476))


# ----------------------------------------------------------------------------
# Tiled matmul: accumulate into the resident f32 output block; epilogue fuses
# bias + GELU + residual add.
# ----------------------------------------------------------------------------
def _matmul_kernel(x_ref, w_ref, *refs, has_bias, has_residual, activation,
                   compute_dtype):
    refs = list(refs)
    b_ref = refs.pop(0) if has_bias else None
    r_ref = refs.pop(0) if has_residual else None
    o_ref = refs.pop(0)

    @pl.when(pl.program_id(2) == 0)
    def _init():
        o_ref[...] = jnp.zeros_like(o_ref)

    o_ref[...] += jnp.dot(x_ref[...].astype(compute_dtype),
                          w_ref[...].astype(compute_dtype),
                          preferred_element_type=jnp.float32)

    @pl.when(pl.program_id(2) == pl.num_programs(2) - 1)
    def _finalize():
        y = o_ref[...]
        if has_bias:
            y = y + b_ref[...].astype(jnp.float32)
        if activation == "gelu":
            y = _gelu_f32(y)
        if has_residual:
            y = y + r_ref[...].astype(jnp.float32)
        o_ref[...] = y.astype(o_ref.dtype)


def linear_pallas(x, w, b=None, *, residual=None, activation=None):
    """y = act(x @ w + b) + residual.  w stored (K, N) (PyTorch weight.T), bf16."""
    orig_shape = x.shape
    K = orig_shape[-1]
    M = int(np.prod(orig_shape[:-1]))
    N = w.shape[1]
    x2 = x.reshape(M, K)

    tm = _pick_tile(M, _MM_TM, 8)
    tn = _pick_tile(N, _MM_TN, 128)
    tk = _pick_tile(K, _MM_TK, 128)
    Mp, Np, Kp = _round_up(M, tm), _round_up(N, tn), _round_up(K, tk)

    x2 = _pad_to_shape(x2, (Mp, Kp))        # no-op on the hoist-padded hot path
    wp = _pad_to_shape(w, (Kp, Np))

    in_specs = [pl.BlockSpec((tm, tk), lambda i, j, k: (i, k)),
                pl.BlockSpec((tk, tn), lambda i, j, k: (k, j))]
    args = [x2, wp]
    if b is not None:
        bp = _pad_to_shape(b.reshape(1, N), (1, Np))
        in_specs.append(pl.BlockSpec((1, tn), lambda i, j, k: (0, j)))
        args.append(bp)
    if residual is not None:
        r2 = _pad_to_shape(residual.reshape(M, N), (Mp, Np))
        in_specs.append(pl.BlockSpec((tm, tn), lambda i, j, k: (i, j)))
        args.append(r2)

    kernel = functools.partial(
        _matmul_kernel, has_bias=b is not None, has_residual=residual is not None,
        activation=activation, compute_dtype=MATMUL_COMPUTE_DTYPE)

    out = pl.pallas_call(
        kernel,
        out_shape=jax.ShapeDtypeStruct((Mp, Np), jnp.float32),
        grid=(Mp // tm, Np // tn, Kp // tk),
        in_specs=in_specs,
        out_specs=pl.BlockSpec((tm, tn), lambda i, j, k: (i, j)),
        compiler_params=pltpu.CompilerParams(
            dimension_semantics=("parallel", "parallel", "arbitrary"),
            vmem_limit_bytes=_VMEM_LIMIT),
    )(*args)
    if (Mp, Np) != (M, N):
        out = out[:M, :N]
    return out.reshape(*orig_shape[:-1], N)


# ----------------------------------------------------------------------------
# Row-tiled LayerNorm (PyTorch LayerNorm.forward computes in f32)
# ----------------------------------------------------------------------------
def _layernorm_kernel(x_ref, g_ref, b_ref, o_ref):
    x = x_ref[...].astype(jnp.float32)
    mu = jnp.mean(x, axis=-1, keepdims=True)
    xc = x - mu
    var = jnp.mean(xc * xc, axis=-1, keepdims=True)
    y = xc * jax.lax.rsqrt(var + 1e-5)
    y = y * g_ref[...].astype(jnp.float32) + b_ref[...].astype(jnp.float32)
    o_ref[...] = y.astype(o_ref.dtype)


def layernorm_pallas(x, g, b):
    orig_shape = x.shape
    D = orig_shape[-1]
    M = int(np.prod(orig_shape[:-1]))
    x2 = x.reshape(M, D)
    tm = _pick_tile(M, _LN_TM, 8)
    Mp = _round_up(M, tm)
    x2 = _pad_to_shape(x2, (Mp, D))

    out = pl.pallas_call(
        _layernorm_kernel,
        out_shape=jax.ShapeDtypeStruct((Mp, D), jnp.float32),
        grid=(Mp // tm,),
        in_specs=[pl.BlockSpec((tm, D), lambda i: (i, 0)),
                  pl.BlockSpec((1, D), lambda i: (0, 0)),
                  pl.BlockSpec((1, D), lambda i: (0, 0))],
        out_specs=pl.BlockSpec((tm, D), lambda i: (i, 0)),
        compiler_params=pltpu.CompilerParams(
            dimension_semantics=("parallel",),
            vmem_limit_bytes=_VMEM_LIMIT),
    )(x2, g.reshape(1, D), b.reshape(1, D))
    return out[:M].reshape(orig_shape)


# ----------------------------------------------------------------------------
# Flash-style multi-head attention.
#   * head group of width hg*dh (=128 for Whisper's dh=64)
#   * online softmax; full-width (tq, hg*dh) accumulator -> lane-dense rescale
#     and a single lane-dense output store in the finalize step
#   * dh**-0.5 already folded into the query projection weights
# ----------------------------------------------------------------------------
def _attention_kernel(q_ref, k_ref, v_ref, o_ref, m_sc, l_sc, acc_sc,
                      *, hg, dh, causal, kv_len, mask_keys, compute_dtype):
    qi = pl.program_id(2)
    ki = pl.program_id(3)
    nk = pl.num_programs(3)
    tq = q_ref.shape[1]
    tk = k_ref.shape[1]

    @pl.when(ki == 0)
    def _init():
        m_sc[...] = jnp.full_like(m_sc, -jnp.inf)
        l_sc[...] = jnp.zeros_like(l_sc)
        acc_sc[...] = jnp.zeros_like(acc_sc)

    k_start = ki * tk
    run = k_start < kv_len
    if causal:
        run = jnp.logical_and(run, k_start <= qi * tq + (tq - 1))

    @pl.when(run)
    def _compute():
        q = q_ref[0].astype(compute_dtype)              # (tq, hg*dh)
        k = k_ref[0].astype(compute_dtype)              # (tk, hg*dh)
        v = v_ref[0].astype(compute_dtype)              # (tk, hg*dh)

        valid = None
        if causal or mask_keys:                         # masks built in-kernel
            k_idx = k_start + jax.lax.broadcasted_iota(jnp.int32, (tq, tk), 1)
            if mask_keys:
                valid = k_idx < kv_len
            if causal:
                q_idx = qi * tq + jax.lax.broadcasted_iota(jnp.int32, (tq, tk), 0)
                c = k_idx <= q_idx
                valid = c if valid is None else jnp.logical_and(valid, c)

        alpha_cols, pv_cols = [], []
        for h in range(hg):                             # static unroll over heads
            sl = slice(h * dh, (h + 1) * dh)
            s = jax.lax.dot_general(q[:, sl], k[:, sl], (((1,), (1,)), ((), ())),
                                    preferred_element_type=jnp.float32)  # (tq, tk)
            if valid is not None:
                s = jnp.where(valid, s, -1e30)
            m_prev = m_sc[h]                            # (tq, 1)
            m_new = jnp.maximum(m_prev, jnp.max(s, axis=-1, keepdims=True))
            alpha = jnp.exp(m_prev - m_new)
            p = jnp.exp(s - m_new)
            l_sc[h] = alpha * l_sc[h] + jnp.sum(p, axis=-1, keepdims=True)
            m_sc[h] = m_new
            alpha_cols.append(jnp.broadcast_to(alpha, (alpha.shape[0], dh)))
            pv_cols.append(jnp.dot(p.astype(compute_dtype), v[:, sl],
                                   preferred_element_type=jnp.float32))
        alpha_full = alpha_cols[0] if hg == 1 else jnp.concatenate(alpha_cols, -1)
        pv_full = pv_cols[0] if hg == 1 else jnp.concatenate(pv_cols, -1)
        acc_sc[...] = alpha_full * acc_sc[...] + pv_full   # full 128-lane rescale

    @pl.when(ki == nk - 1)
    def _finalize():
        rows = acc_sc.shape[0]
        inv_cols = [jnp.broadcast_to(pl.reciprocal(l_sc[h], approx=True), (rows, dh))
                    for h in range(hg)]
        inv = inv_cols[0] if hg == 1 else jnp.concatenate(inv_cols, -1)
        o_ref[0] = (acc_sc[...] * inv).astype(o_ref.dtype)  # one lane-dense store


def attention_pallas(q_src, kv_src, *, n_head, d_model, causal, kv_len,
                     k_off, v_off):
    """q lives at channel offset 0 of q_src; k/v at k_off/v_off of kv_src.
    Self-attn: q_src = kv_src = fused QKV (B,T,3D).  Cross: q (B,Tq,D), KV (B,Tk,2D).
    Time axes are pre-padded at encoder/decoder entry -> no pads here."""
    dh = d_model // n_head
    hg = _pick_head_group(n_head, dh)
    gw = hg * dh
    if gw % 128 != 0:
        # Small-model fallback (never hit for real Whisper, dh == 64): slice so
        # the block's last dim equals the full array dim (layout rule).
        q_src = q_src[..., :d_model]
        k_src = kv_src[..., k_off:k_off + d_model]
        v_src = kv_src[..., v_off:v_off + d_model]
        hg, gw, k_off, v_off = n_head, d_model, 0, 0
    else:
        k_src = v_src = kv_src
    G = n_head // hg
    kb = k_off // gw
    vb = v_off // gw

    B, Tq_p, _ = q_src.shape
    Tk_p = k_src.shape[1]
    tq = _pick_tile(Tq_p, _ATTN_TQ, 8)
    tk = _pick_tile(Tk_p, _ATTN_TK, 8)
    assert Tq_p % tq == 0 and Tk_p % tk == 0
    mask_keys = (Tk_p != kv_len)

    kernel = functools.partial(
        _attention_kernel, hg=hg, dh=dh, causal=causal, kv_len=kv_len,
        mask_keys=mask_keys, compute_dtype=MATMUL_COMPUTE_DTYPE)

    return pl.pallas_call(
        kernel,
        out_shape=jax.ShapeDtypeStruct((B, Tq_p, d_model), jnp.float32),
        grid=(B, G, Tq_p // tq, Tk_p // tk),
        in_specs=[
            pl.BlockSpec((1, tq, gw), lambda b, g, i, j: (b, i, g)),
            pl.BlockSpec((1, tk, gw), lambda b, g, i, j, kb=kb: (b, j, kb + g)),
            pl.BlockSpec((1, tk, gw), lambda b, g, i, j, vb=vb: (b, j, vb + g)),
        ],
        out_specs=pl.BlockSpec((1, tq, gw), lambda b, g, i, j: (b, i, g)),
        scratch_shapes=[
            pltpu.VMEM((hg, tq, 1), jnp.float32),    # running max
            pltpu.VMEM((hg, tq, 1), jnp.float32),    # running sum
            pltpu.VMEM((tq, gw), jnp.float32),       # full-width accumulator
        ],
        compiler_params=pltpu.CompilerParams(
            dimension_semantics=("parallel", "parallel", "parallel", "arbitrary"),
            vmem_limit_bytes=_VMEM_LIMIT),
    )(q_src, k_src, v_src)


# ----------------------------------------------------------------------------
# Model building blocks
# ----------------------------------------------------------------------------
def conv1d_btc(x, w2, b, stride):
    """PyTorch Conv1d(kernel=3, padding=1) on time-major input via im2col + the
    Pallas matmul (GELU fused into the epilogue).  x: (B, L, Cin), w2: (3*Cin, Cout)."""
    B, L, Cin = x.shape
    K = 3
    Lout = (L + 2 - K) // stride + 1
    xp = jnp.pad(x, ((0, 0), (1, 1), (0, 0)))
    cols = [xp[:, k:k + stride * Lout:stride, :] for k in range(K)]   # (B,Lout,Cin)
    patches = jnp.concatenate(cols, axis=-1)                          # (B,Lout,3*Cin)
    return linear_pallas(patches, w2, b, activation="gelu")           # (B,Lout,Cout)


def residual_block(x, bp, n_head, causal, self_kv_len, xa=None, xa_kv_len=None):
    D = x.shape[-1]
    h = layernorm_pallas(x, bp["attn_ln_g"], bp["attn_ln_b"])
    qkv = linear_pallas(h, bp["attn"]["qkv_w"], bp["attn"]["qkv_b"])  # fused QKV
    a = attention_pallas(qkv, qkv, n_head=n_head, d_model=D, causal=causal,
                         kv_len=self_kv_len, k_off=D, v_off=2 * D)
    x = linear_pallas(a, bp["attn"]["o_w"], bp["attn"]["o_b"], residual=x)
    if xa is not None:
        h = layernorm_pallas(x, bp["xattn_ln_g"], bp["xattn_ln_b"])
        q = linear_pallas(h, bp["xattn"]["q_w"], bp["xattn"]["q_b"])
        kv = linear_pallas(xa, bp["xattn"]["kv_w"], bp["xattn"]["kv_b"])  # fused KV
        a = attention_pallas(q, kv, n_head=n_head, d_model=D, causal=False,
                             kv_len=xa_kv_len, k_off=0, v_off=D)
        x = linear_pallas(a, bp["xattn"]["o_w"], bp["xattn"]["o_b"], residual=x)
    h = layernorm_pallas(x, bp["mlp_ln_g"], bp["mlp_ln_b"])
    h = linear_pallas(h, bp["mlp1_w"], bp["mlp1_b"], activation="gelu")
    x = linear_pallas(h, bp["mlp2_w"], bp["mlp2_b"], residual=x)
    return x


def encoder_forward(p, mel):
    # mel: (B, n_mels, L) -> time-major once (tiny transpose of the raw input)
    x = mel.transpose(0, 2, 1)
    x = conv1d_btc(x, p["conv1_w"], p["conv1_b"], stride=1)    # GELU fused
    x = conv1d_btc(x, p["conv2_w"], p["conv2_b"], stride=2)    # GELU fused
    assert x.shape[1:] == tuple(p["pos_emb"].shape), "incorrect audio shape"
    x = x + p["pos_emb"][None]
    x, T = _pad_time(x)                    # hoisted: stays padded through layers
    for bp in p["blocks"]:
        x = residual_block(x, bp, p["n_head"], causal=False, self_kv_len=T)
    x = layernorm_pallas(x, p["ln_post_g"], p["ln_post_b"])
    return x, T                            # padded features + true audio length


def decoder_forward(p, tokens, xa, xa_len):
    Tt = tokens.shape[-1]
    x = p["tok_emb"][tokens].astype(jnp.float32) + p["pos_emb"][:Tt]   # offset = 0
    x, _ = _pad_time(x)
    for bp in p["blocks"]:
        x = residual_block(x, bp, p["n_head"], causal=True, self_kv_len=Tt,
                           xa=xa, xa_kv_len=xa_len)
    x = layernorm_pallas(x, p["ln_g"], p["ln_b"])
    # logits = x @ tok_emb.T; a pre-transposed, 128-padded bf16 copy avoids any
    # per-tile transpose / runtime weight pad.
    logits = linear_pallas(x, p["tok_emb_t"], None)
    return logits[:, :Tt, :p["n_vocab"]]


def whisper_forward(params, mel, tokens):
    audio_features, audio_len = encoder_forward(params["encoder"], mel)
    return decoder_forward(params["decoder"], tokens, audio_features, audio_len)


# ----------------------------------------------------------------------------
# Deterministic synthetic parameters (shapes/semantics follow the PyTorch module)
# ----------------------------------------------------------------------------
def sinusoids(length, channels, max_timescale=10000):
    assert channels % 2 == 0
    log_inc = np.log(max_timescale) / (channels // 2 - 1)
    inv = np.exp(-log_inc * np.arange(channels // 2))
    scaled = np.arange(length)[:, None] * inv[None, :]
    return jnp.asarray(np.concatenate([np.sin(scaled), np.cos(scaled)], axis=1),
                       dtype=jnp.float32)


class _Rng:
    def __init__(self, key):
        self._key = key

    def normal(self, shape, scale=0.02):
        self._key, sub = jax.random.split(self._key)
        return scale * jax.random.normal(sub, shape, jnp.float32)


def _prep_conv_w(w_pt):
    # PyTorch Conv1d weight (Cout, Cin, K) -> im2col weight (K*Cin, Cout) in bf16,
    # matching the [k*Cin + cin] patch layout of conv1d_btc.
    Cout, Cin, K = w_pt.shape
    return jnp.transpose(w_pt, (2, 1, 0)).reshape(K * Cin, Cout).astype(WEIGHT_DTYPE)


def _init_block(rng, n_state, n_head, cross_attention):
    n_mlp = 4 * n_state
    # PyTorch scales q and k by dh**-0.25 each inside qkv_attention; folding the
    # combined dh**-0.5 into the query weight/bias is identical and removes a
    # per-kv-block multiply from the attention kernel.
    qscale = float(n_state // n_head) ** (-0.5)

    def lin(n_in, n_out):            # stored as (in, out) == PyTorch weight.T
        return rng.normal((n_in, n_out))

    q_w, q_b = lin(n_state, n_state) * qscale, rng.normal((n_state,)) * qscale
    k_w = lin(n_state, n_state)                        # key Linear has no bias
    v_w, v_b = lin(n_state, n_state), rng.normal((n_state,))
    o_w, o_b = lin(n_state, n_state), rng.normal((n_state,))
    bp = {
        "attn_ln_g": jnp.ones((n_state,), jnp.float32),
        "attn_ln_b": jnp.zeros((n_state,), jnp.float32),
        "attn": {
            "qkv_w": jnp.concatenate([q_w, k_w, v_w], axis=1).astype(WEIGHT_DTYPE),
            "qkv_b": jnp.concatenate([q_b, jnp.zeros((n_state,), jnp.float32), v_b]),
            "o_w": o_w.astype(WEIGHT_DTYPE),
            "o_b": o_b,
        },
        "mlp_ln_g": jnp.ones((n_state,), jnp.float32),
        "mlp_ln_b": jnp.zeros((n_state,), jnp.float32),
        "mlp1_w": lin(n_state, n_mlp).astype(WEIGHT_DTYPE),
        "mlp1_b": rng.normal((n_mlp,)),
        "mlp2_w": lin(n_mlp, n_state).astype(WEIGHT_DTYPE),
        "mlp2_b": rng.normal((n_state,)),
    }
    if cross_attention:
        xq_w, xq_b = lin(n_state, n_state) * qscale, rng.normal((n_state,)) * qscale
        xk_w = lin(n_state, n_state)
        xv_w, xv_b = lin(n_state, n_state), rng.normal((n_state,))
        xo_w, xo_b = lin(n_state, n_state), rng.normal((n_state,))
        bp["xattn_ln_g"] = jnp.ones((n_state,), jnp.float32)
        bp["xattn_ln_b"] = jnp.zeros((n_state,), jnp.float32)
        bp["xattn"] = {
            "q_w": xq_w.astype(WEIGHT_DTYPE),
            "q_b": xq_b,
            "kv_w": jnp.concatenate([xk_w, xv_w], axis=1).astype(WEIGHT_DTYPE),
            "kv_b": jnp.concatenate([jnp.zeros((n_state,), jnp.float32), xv_b]),
            "o_w": xo_w.astype(WEIGHT_DTYPE),
            "o_b": xo_b,
        }
    return bp


def init_whisper_params(key, dims):
    rng = _Rng(key)
    enc = {
        "n_head": dims["n_audio_head"],
        "conv1_w": _prep_conv_w(rng.normal((dims["n_audio_state"], dims["n_mels"], 3))),
        "conv1_b": rng.normal((dims["n_audio_state"],)),
        "conv2_w": _prep_conv_w(rng.normal((dims["n_audio_state"], dims["n_audio_state"], 3))),
        "conv2_b": rng.normal((dims["n_audio_state"],)),
        "pos_emb": sinusoids(dims["n_audio_ctx"], dims["n_audio_state"]),
        "blocks": [_init_block(rng, dims["n_audio_state"], dims["n_audio_head"], False)
                   for _ in range(dims["n_audio_layer"])],
        "ln_post_g": jnp.ones((dims["n_audio_state"],), jnp.float32),
        "ln_post_b": jnp.zeros((dims["n_audio_state"],), jnp.float32),
    }
    tok_emb = rng.normal((dims["n_vocab"], dims["n_text_state"])).astype(WEIGHT_DTYPE)
    v_pad = _round_up(dims["n_vocab"], 128)
    dec = {
        "n_head": dims["n_text_head"],
        "n_vocab": dims["n_vocab"],
        "tok_emb": tok_emb,
        "tok_emb_t": _pad_to_shape(tok_emb.T, (dims["n_text_state"], v_pad)),
        "pos_emb": rng.normal((dims["n_text_ctx"], dims["n_text_state"])),
        "blocks": [_init_block(rng, dims["n_text_state"], dims["n_text_head"], True)
                   for _ in range(dims["n_text_layer"])],
        "ln_g": jnp.ones((dims["n_text_state"],), jnp.float32),
        "ln_b": jnp.zeros((dims["n_text_state"],), jnp.float32),
        # causal mask is generated inside the attention kernel (no buffer).
    }
    return {"encoder": enc, "decoder": dec}


# ----------------------------------------------------------------------------
if __name__ == "__main__":
    dims = dict(
        n_mels=8,
        n_audio_ctx=8,        # audio length 16 -> conv2 stride 2 -> 8
        n_audio_state=128,    # head_dim 64, same as every real Whisper size
        n_audio_head=2,
        n_audio_layer=2,
        n_vocab=64,
        n_text_ctx=8,
        n_text_head=2,
        n_text_layer=2,
        n_text_state=128,
    )
    key = jax.random.PRNGKey(0)
    k_param, k_mel, k_tok = jax.random.split(key, 3)

    params = init_whisper_params(k_param, dims)

    batch = 2
    audio_len = 2 * dims["n_audio_ctx"]          # 16
    text_len = 6                                 # <= n_text_ctx
    mel = jax.random.normal(k_mel, (batch, dims["n_mels"], audio_len), jnp.float32)
    tokens = jax.random.randint(k_tok, (batch, text_len), 0, dims["n_vocab"])

    fwd = jax.jit(functools.partial(whisper_forward, params))
    logits = jax.block_until_ready(fwd(mel, tokens))

    assert logits.shape == (batch, text_len, dims["n_vocab"]), logits.shape
    assert logits.dtype == jnp.float32
    assert bool(jnp.all(jnp.isfinite(logits)))
    print("KERNEL_OK")
</pallas_src>

<mosaic_0001>
module attributes {stable_mosaic.version = 11 : i64} {
  func.func @_matmul_kernel(%arg0: i32, %arg1: i32, %arg2: i32, %arg3: memref<32x24xf32, #tpu.memory_space<vmem>>, %arg4: memref<24x128xbf16, #tpu.memory_space<vmem>>, %arg5: memref<1x128xf32, #tpu.memory_space<vmem>>, %arg6: memref<32x128xf32, #tpu.memory_space<vmem>>) attributes {dimension_semantics = [#tpu.dimension_semantics<parallel>, #tpu.dimension_semantics<parallel>, #tpu.dimension_semantics<arbitrary>], iteration_bounds = array<i64: 1, 1, 1>, scalar_prefetch = 0 : i64, scratch_operands = 0 : i64, tpu.core_type = #tpu.core_type<tc>, window_params = [{transform_indices = @transform_0, window_bounds = array<i64: 32, 24>}, {transform_indices = @transform_1, window_bounds = array<i64: 24, 128>}, {transform_indices = @transform_2, window_bounds = array<i64: 1, 128>}, {transform_indices = @transform_3, window_bounds = array<i64: 32, 128>}]} {
    %c0_i32 = arith.constant 0 : i32
    %0 = arith.cmpi eq, %arg2, %c0_i32 : i32
    %1 = arith.extui %0 : i1 to i32
    %c0_i32_0 = arith.constant 0 : i32
    %2 = arith.cmpi ne, %1, %c0_i32_0 : i32
    scf.if %2 {
      %cst_10 = arith.constant 0.000000e+00 : f32
      %13 = vector.broadcast %cst_10 : f32 to vector<32x128xf32>
      %c0_11 = arith.constant 0 : index
      %c0_12 = arith.constant 0 : index
      %14 = vector.load %arg6[%c0_11, %c0_12] : memref<32x128xf32, #tpu.memory_space<vmem>>, vector<32x128xf32>
      tpu.vector_store %arg6[%c0_11, %c0_12], %13 {strides = array<i32>} : memref<32x128xf32, #tpu.memory_space<vmem>>, vector<32x128xf32>,
    } else {
    }
    %c0 = arith.constant 0 : index
    %c0_1 = arith.constant 0 : index
    %3 = vector.load %arg6[%c0, %c0_1] : memref<32x128xf32, #tpu.memory_space<vmem>>, vector<32x128xf32>
    %c0_2 = arith.constant 0 : index
    %c0_3 = arith.constant 0 : index
    %4 = vector.load %arg3[%c0_2, %c0_3] : memref<32x24xf32, #tpu.memory_space<vmem>>, vector<32x24xf32>
    %5 = arith.truncf %4 : vector<32x24xf32> to vector<32x24xbf16>
    %c0_4 = arith.constant 0 : index
    %c0_5 = arith.constant 0 : index
    %6 = vector.load %arg4[%c0_4, %c0_5] : memref<24x128xbf16, #tpu.memory_space<vmem>>, vector<24x128xbf16>
    %cst = arith.constant dense<0.000000e+00> : vector<32x128xf32>
    %7 = tpu.matmul %5, %6, %cst {dimension_numbers = #tpu.dot_dimension_numbers<[1], [0], [0], [1], [0, 0, 1, 1], [], []>} : vector<32x24xbf16>, vector<24x128xbf16>, vector<32x128xf32> -> vector<32x128xf32>
    %8 = arith.addf %3, %7 : vector<32x128xf32>
    %c0_6 = arith.constant 0 : index
    %c0_7 = arith.constant 0 : index
    %9 = vector.load %arg6[%c0_6, %c0_7] : memref<32x128xf32, #tpu.memory_space<vmem>>, vector<32x128xf32>
    tpu.vector_store %arg6[%c0_6, %c0_7], %8 {strides = array<i32>} : memref<32x128xf32, #tpu.memory_space<vmem>>, vector<32x128xf32>,
    %c0_i32_8 = arith.constant 0 : i32
    %10 = arith.cmpi eq, %arg2, %c0_i32_8 : i32
    %11 = arith.extui %10 : i1 to i32
    %c0_i32_9 = arith.constant 0 : i32
    %12 = arith.cmpi ne, %11, %c0_i32_9 : i32
    scf.if %12 {
      %c0_10 = arith.constant 0 : index
      %c0_11 = arith.constant 0 : index
      %13 = vector.load %arg6[%c0_10, %c0_11] : memref<32x128xf32, #tpu.memory_space<vmem>>, vector<32x128xf32>
      %c0_12 = arith.constant 0 : index
      %c0_13 = arith.constant 0 : index
      %14 = vector.load %arg5[%c0_12, %c0_13] : memref<1x128xf32, #tpu.memory_space<vmem>>, vector<1x128xf32>
      %15 = vector.broadcast %14 : vector<1x128xf32> to vector<32x128xf32>
      %16 = arith.addf %13, %15 : vector<32x128xf32>
      %cst_14 = arith.constant 5.000000e-01 : f32
      %17 = vector.broadcast %cst_14 : f32 to vector<32x128xf32>
      %18 = arith.mulf %16, %17 : vector<32x128xf32>
      %cst_15 = arith.constant 0.707106769 : f32
      %19 = vector.broadcast %cst_15 : f32 to vector<32x128xf32>
      %20 = arith.mulf %16, %19 : vector<32x128xf32>
      %cst_16 = arith.constant 0.000000e+00 : f32
      %21 = vector.broadcast %cst_16 : f32 to vector<32x128xf32>
      %22 = arith.cmpf oge, %20, %21 : vector<32x128xf32>
      %cst_17 = arith.constant 1.000000e+00 : f32
      %cst_18 = arith.constant -1.000000e+00 : f32
      %23 = vector.broadcast %cst_17 : f32 to vector<32x128xf32>
      %24 = vector.broadcast %cst_18 : f32 to vector<32x128xf32>
      %25 = arith.select %22, %23, %24 : vector<32x128xi1>, vector<32x128xf32>
      %26 = math.absf %20 : vector<32x128xf32>
      %cst_19 = arith.constant 0.327591091 : f32
      %27 = vector.broadcast %cst_19 : f32 to vector<32x128xf32>
      %28 = arith.mulf %27, %26 : vector<32x128xf32>
      %cst_20 = arith.constant 1.000000e+00 : f32
      %29 = vector.broadcast %cst_20 : f32 to vector<32x128xf32>
      %30 = arith.addf %29, %28 : vector<32x128xf32>
      %cst_21 = arith.constant 1.000000e+00 : f32
      %31 = vector.broadcast %cst_21 : f32 to vector<32x128xf32>
      %32 = arith.divf %31, %30 : vector<32x128xf32>
      %cst_22 = arith.constant 1.06140542 : f32
      %33 = vector.broadcast %cst_22 : f32 to vector<32x128xf32>
      %34 = arith.mulf %33, %32 : vector<32x128xf32>
      %cst_23 = arith.constant -1.45315206 : f32
      %35 = vector.broadcast %cst_23 : f32 to vector<32x128xf32>
      %36 = arith.addf %34, %35 : vector<32x128xf32>
      %37 = arith.mulf %36, %32 : vector<32x128xf32>
      %cst_24 = arith.constant 1.42141378 : f32
      %38 = vector.broadcast %cst_24 : f32 to vector<32x128xf32>
      %39 = arith.addf %37, %38 : vector<32x128xf32>
      %40 = arith.mulf %39, %32 : vector<32x128xf32>
      %cst_25 = arith.constant -0.284496725 : f32
      %41 = vector.broadcast %cst_25 : f32 to vector<32x128xf32>
      %42 = arith.addf %40, %41 : vector<32x128xf32>
      %43 = arith.mulf %42, %32 : vector<32x128xf32>
      %cst_26 = arith.constant 0.254829586 : f32
      %44 = vector.broadcast %cst_26 : f32 to vector<32x128xf32>
      %45 = arith.addf %43, %44 : vector<32x128xf32>
      %46 = arith.mulf %45, %32 : vector<32x128xf32>
      %cst_27 = arith.constant 0.000000e+00 : f32
      %47 = vector.broadcast %cst_27 : f32 to vector<32x128xf32>
      %48 = arith.subf %47, %26 : vector<32x128xf32>
      %49 = arith.mulf %48, %26 : vector<32x128xf32>
      %50 = math.exp %49 : vector<32x128xf32>
      %51 = arith.mulf %46, %50 : vector<32x128xf32>
      %cst_28 = arith.constant 1.000000e+00 : f32
      %52 = vector.broadcast %cst_28 : f32 to vector<32x128xf32>
      %53 = arith.subf %52, %51 : vector<32x128xf32>
      %54 = arith.mulf %25, %53 : vector<32x128xf32>
      %cst_29 = arith.constant 1.000000e+00 : f32
      %55 = vector.broadcast %cst_29 : f32 to vector<32x128xf32>
      %56 = arith.addf %55, %54 : vector<32x128xf32>
      %57 = arith.mulf %18, %56 : vector<32x128xf32>
      %c0_30 = arith.constant 0 : index
      %c0_31 = arith.constant 0 : index
      %58 = vector.load %arg6[%c0_30, %c0_31] : memref<32x128xf32, #tpu.memory_space<vmem>>, vector<32x128xf32>
      tpu.vector_store %arg6[%c0_30, %c0_31], %57 {strides = array<i32>} : memref<32x128xf32, #tpu.memory_space<vmem>>, vector<32x128xf32>,
    } else {
    }
    return
  }
  func.func @transform_0(%arg0: i32, %arg1: i32, %arg2: i32) -> (i32, i32) {
    %c0_i32 = arith.constant 0 : i32
    return %arg0, %arg2 : i32, i32
  }
  func.func @transform_1(%arg0: i32, %arg1: i32, %arg2: i32) -> (i32, i32) {
    %c0_i32 = arith.constant 0 : i32
    return %arg2, %arg1 : i32, i32
  }
  func.func @transform_2(%arg0: i32, %arg1: i32, %arg2: i32) -> (i32, i32) {
    %c0_i32 = arith.constant 0 : i32
    %c0_i32_0 = arith.constant 0 : i32
    return %c0_i32, %arg1 : i32, i32
  }
  func.func @transform_3(%arg0: i32, %arg1: i32, %arg2: i32) -> (i32, i32) {
    %c0_i32 = arith.constant 0 : i32
    return %arg0, %arg1 : i32, i32
  }
}

module attributes {stable_mosaic.version = 11 : i64} {
  func.func @_matmul_kernel(%arg0: i32, %arg1: i32, %arg2: i32, %arg3: memref<16x128xf32, #tpu.memory_space<vmem>>, %arg4: memref<128x128xbf16, #tpu.memory_space<vmem>>, %arg5: memref<1x128xf32, #tpu.memory_space<vmem>>, %arg6: memref<16x128xf32, #tpu.memory_space<vmem>>) attributes {dimension_semantics = [#tpu.dimension_semantics<parallel>, #tpu.dimension_semantics<parallel>, #tpu.dimension_semantics<arbitrary>], iteration_bounds = array<i64: 1, 1, 3>, scalar_prefetch = 0 : i64, scratch_operands = 0 : i64, tpu.core_type = #tpu.core_type<tc>, window_params = [{transform_indices = @transform_0, window_bounds = array<i64: 16, 128>}, {transform_indices = @transform_1, window_bounds = array<i64: 128, 128>}, {transform_indices = @transform_2, window_bounds = array<i64: 1, 128>}, {transform_indices = @transform_3, window_bounds = array<i64: 16, 128>}]} {
    %c0_i32 = arith.constant 0 : i32
    %0 = arith.cmpi eq, %arg2, %c0_i32 : i32
    %1 = arith.extui %0 : i1 to i32
    %c0_i32_0 = arith.constant 0 : i32
    %2 = arith.cmpi ne, %1, %c0_i32_0 : i32
    scf.if %2 {
      %cst_9 = arith.constant 0.000000e+00 : f32
      %13 = vector.broadcast %cst_9 : f32 to vector<16x128xf32>
      %c0_10 = arith.constant 0 : index
      %c0_11 = arith.constant 0 : index
      %14 = vector.load %arg6[%c0_10, %c0_11] : memref<16x128xf32, #tpu.memory_space<vmem>>, vector<16x128xf32>
      tpu.vector_store %arg6[%c0_10, %c0_11], %13 {strides = array<i32>} : memref<16x128xf32, #tpu.memory_space<vmem>>, vector<16x128xf32>,
    } else {
    }
    %c0 = arith.constant 0 : index
    %c0_1 = arith.constant 0 : index
    %3 = vector.load %arg6[%c0, %c0_1] : memref<16x128xf32, #tpu.memory_space<vmem>>, vector<16x128xf32>
    %c0_2 = arith.constant 0 : index
    %c0_3 = arith.constant 0 : index
    %4 = vector.load %arg3[%c0_2, %c0_3] : memref<16x128xf32, #tpu.memory_space<vmem>>, vector<16x128xf32>
    %5 = arith.truncf %4 : vector<16x128xf32> to vector<16x128xbf16>
    %c0_4 = arith.constant 0 : index
    %c0_5 = arith.constant 0 : index
    %6 = vector.load %arg4[%c0_4, %c0_5] : memref<128x128xbf16, #tpu.memory_space<vmem>>, vector<128x128xbf16>
    %cst = arith.constant dense<0.000000e+00> : vector<16x128xf32>
    %7 = tpu.matmul %5, %6, %cst {dimension_numbers = #tpu.dot_dimension_numbers<[1], [0], [0], [1], [0, 0, 1, 1], [], []>} : vector<16x128xbf16>, vector<128x128xbf16>, vector<16x128xf32> -> vector<16x128xf32>
    %8 = arith.addf %3, %7 : vector<16x128xf32>
    %c0_6 = arith.constant 0 : index
    %c0_7 = arith.constant 0 : index
    %9 = vector.load %arg6[%c0_6, %c0_7] : memref<16x128xf32, #tpu.memory_space<vmem>>, vector<16x128xf32>
    tpu.vector_store %arg6[%c0_6, %c0_7], %8 {strides = array<i32>} : memref<16x128xf32, #tpu.memory_space<vmem>>, vector<16x128xf32>,
    %c2_i32 = arith.constant 2 : i32
    %10 = arith.cmpi eq, %arg2, %c2_i32 : i32
    %11 = arith.extui %10 : i1 to i32
    %c0_i32_8 = arith.constant 0 : i32
    %12 = arith.cmpi ne, %11, %c0_i32_8 : i32
    scf.if %12 {
      %c0_9 = arith.constant 0 : index
      %c0_10 = arith.constant 0 : index
      %13 = vector.load %arg6[%c0_9, %c0_10] : memref<16x128xf32, #tpu.memory_space<vmem>>, vector<16x128xf32>
      %c0_11 = arith.constant 0 : index
      %c0_12 = arith.constant 0 : index
      %14 = vector.load %arg5[%c0_11, %c0_12] : memref<1x128xf32, #tpu.memory_space<vmem>>, vector<1x128xf32>
      %15 = vector.broadcast %14 : vector<1x128xf32> to vector<16x128xf32>
      %16 = arith.addf %13, %15 : vector<16x128xf32>
      %cst_13 = arith.constant 5.000000e-01 : f32
      %17 = vector.broadcast %cst_13 : f32 to vector<16x128xf32>
      %18 = arith.mulf %16, %17 : vector<16x128xf32>
      %cst_14 = arith.constant 0.707106769 : f32
      %19 = vector.broadcast %cst_14 : f32 to vector<16x128xf32>
      %20 = arith.mulf %16, %19 : vector<16x128xf32>
      %cst_15 = arith.constant 0.000000e+00 : f32
      %21 = vector.broadcast %cst_15 : f32 to vector<16x128xf32>
      %22 = arith.cmpf oge, %20, %21 : vector<16x128xf32>
      %cst_16 = arith.constant 1.000000e+00 : f32
      %cst_17 = arith.constant -1.000000e+00 : f32
      %23 = vector.broadcast %cst_16 : f32 to vector<16x128xf32>
      %24 = vector.broadcast %cst_17 : f32 to vector<16x128xf32>
      %25 = arith.select %22, %23, %24 : vector<16x128xi1>, vector<16x128xf32>
      %26 = math.absf %20 : vector<16x128xf32>
      %cst_18 = arith.constant 0.327591091 : f32
      %27 = vector.broadcast %cst_18 : f32 to vector<16x128xf32>
      %28 = arith.mulf %27, %26 : vector<16x128xf32>
      %cst_19 = arith.constant 1.000000e+00 : f32
      %29 = vector.broadcast %cst_19 : f32 to vector<16x128xf32>
      %30 = arith.addf %29, %28 : vector<16x128xf32>
      %cst_20 = arith.constant 1.000000e+00 : f32
      %31 = vector.broadcast %cst_20 : f32 to vector<16x128xf32>
      %32 = arith.divf %31, %30 : vector<16x128xf32>
      %cst_21 = arith.constant 1.06140542 : f32
      %33 = vector.broadcast %cst_21 : f32 to vector<16x128xf32>
      %34 = arith.mulf %33, %32 : vector<16x128xf32>
      %cst_22 = arith.constant -1.45315206 : f32
      %35 = vector.broadcast %cst_22 : f32 to vector<16x128xf32>
      %36 = arith.addf %34, %35 : vector<16x128xf32>
      %37 = arith.mulf %36, %32 : vector<16x128xf32>
      %cst_23 = arith.constant 1.42141378 : f32
      %38 = vector.broadcast %cst_23 : f32 to vector<16x128xf32>
      %39 = arith.addf %37, %38 : vector<16x128xf32>
      %40 = arith.mulf %39, %32 : vector<16x128xf32>
      %cst_24 = arith.constant -0.284496725 : f32
      %41 = vector.broadcast %cst_24 : f32 to vector<16x128xf32>
      %42 = arith.addf %40, %41 : vector<16x128xf32>
      %43 = arith.mulf %42, %32 : vector<16x128xf32>
      %cst_25 = arith.constant 0.254829586 : f32
      %44 = vector.broadcast %cst_25 : f32 to vector<16x128xf32>
      %45 = arith.addf %43, %44 : vector<16x128xf32>
      %46 = arith.mulf %45, %32 : vector<16x128xf32>
      %cst_26 = arith.constant 0.000000e+00 : f32
      %47 = vector.broadcast %cst_26 : f32 to vector<16x128xf32>
      %48 = arith.subf %47, %26 : vector<16x128xf32>
      %49 = arith.mulf %48, %26 : vector<16x128xf32>
      %50 = math.exp %49 : vector<16x128xf32>
      %51 = arith.mulf %46, %50 : vector<16x128xf32>
      %cst_27 = arith.constant 1.000000e+00 : f32
      %52 = vector.broadcast %cst_27 : f32 to vector<16x128xf32>
      %53 = arith.subf %52, %51 : vector<16x128xf32>
      %54 = arith.mulf %25, %53 : vector<16x128xf32>
      %cst_28 = arith.constant 1.000000e+00 : f32
      %55 = vector.broadcast %cst_28 : f32 to vector<16x128xf32>
      %56 = arith.addf %55, %54 : vector<16x128xf32>
      %57 = arith.mulf %18, %56 : vector<16x128xf32>
      %c0_29 = arith.constant 0 : index
      %c0_30 = arith.constant 0 : index
      %58 = vector.load %arg6[%c0_29, %c0_30] : memref<16x128xf32, #tpu.memory_space<vmem>>, vector<16x128xf32>
      tpu.vector_store %arg6[%c0_29, %c0_30], %57 {strides = array<i32>} : memref<16x128xf32, #tpu.memory_space<vmem>>, vector<16x128xf32>,
    } else {
    }
    return
  }
  func.func @transform_0(%arg0: i32, %arg1: i32, %arg2: i32) -> (i32, i32) {
    %c0_i32 = arith.constant 0 : i32
    return %arg0, %arg2 : i32, i32
  }
  func.func @transform_1(%arg0: i32, %arg1: i32, %arg2: i32) -> (i32, i32) {
    %c0_i32 = arith.constant 0 : i32
    return %arg2, %arg1 : i32, i32
  }
  func.func @transform_2(%arg0: i32, %arg1: i32, %arg2: i32) -> (i32, i32) {
    %c0_i32 = arith.constant 0 : i32
    %c0_i32_0 = arith.constant 0 : i32
    return %c0_i32, %arg1 : i32, i32
  }
  func.func @transform_3(%arg0: i32, %arg1: i32, %arg2: i32) -> (i32, i32) {
    %c0_i32 = arith.constant 0 : i32
    return %arg0, %arg1 : i32, i32
  }
}

module attributes {stable_mosaic.version = 11 : i64} {
  func.func @_layernorm_kernel(%arg0: i32, %arg1: memref<16x128xf32, #tpu.memory_space<vmem>>, %arg2: memref<1x128xf32, #tpu.memory_space<vmem>>, %arg3: memref<1x128xf32, #tpu.memory_space<vmem>>, %arg4: memref<16x128xf32, #tpu.memory_space<vmem>>) attributes {dimension_semantics = [#tpu.dimension_semantics<parallel>], iteration_bounds = array<i64: 1>, scalar_prefetch = 0 : i64, scratch_operands = 0 : i64, tpu.core_type = #tpu.core_type<tc>, window_params = [{transform_indices = @transform_0, window_bounds = array<i64: 16, 128>}, {pipeline_mode = #tpu.pipeline_mode<synchronous>, transform_indices = @transform_1, window_bounds = array<i64: 1, 128>}, {pipeline_mode = #tpu.pipeline_mode<synchronous>, transform_indices = @transform_2, window_bounds = array<i64: 1, 128>}, {transform_indices = @transform_3, window_bounds = array<i64: 16, 128>}]} {
    %c0 = arith.constant 0 : index
    %c0_0 = arith.constant 0 : index
    %0 = vector.load %arg1[%c0, %c0_0] : memref<16x128xf32, #tpu.memory_space<vmem>>, vector<16x128xf32>
    %cst = arith.constant dense<0.000000e+00> : vector<16xf32>
    %1 = vector.multi_reduction <add>, %0, %cst [1] : vector<16x128xf32> to vector<16xf32>
    %2 = vector.shape_cast %1 : vector<16xf32> to vector<16x1xf32>
    %cst_1 = arith.constant 1.280000e+02 : f32
    %3 = vector.broadcast %cst_1 : f32 to vector<16x1xf32>
    %4 = arith.divf %2, %3 : vector<16x1xf32>
    %5 = vector.broadcast %4 : vector<16x1xf32> to vector<16x128xf32>
    %6 = arith.subf %0, %5 : vector<16x128xf32>
    %7 = arith.mulf %6, %6 : vector<16x128xf32>
    %cst_2 = arith.constant dense<0.000000e+00> : vector<16xf32>
    %8 = vector.multi_reduction <add>, %7, %cst_2 [1] : vector<16x128xf32> to vector<16xf32>
    %9 = vector.shape_cast %8 : vector<16xf32> to vector<16x1xf32>
    %cst_3 = arith.constant 1.280000e+02 : f32
    %10 = vector.broadcast %cst_3 : f32 to vector<16x1xf32>
    %11 = arith.divf %9, %10 : vector<16x1xf32>
    %cst_4 = arith.constant 9.99999974E-6 : f32
    %12 = vector.broadcast %cst_4 : f32 to vector<16x1xf32>
    %13 = arith.addf %11, %12 : vector<16x1xf32>
    %14 = math.rsqrt %13 : vector<16x1xf32>
    %15 = vector.broadcast %14 : vector<16x1xf32> to vector<16x128xf32>
    %16 = arith.mulf %6, %15 : vector<16x128xf32>
    %c0_5 = arith.constant 0 : index
    %c0_6 = arith.constant 0 : index
    %17 = vector.load %arg2[%c0_5, %c0_6] : memref<1x128xf32, #tpu.memory_space<vmem>>, vector<1x128xf32>
    %18 = vector.broadcast %17 : vector<1x128xf32> to vector<16x128xf32>
    %19 = arith.mulf %16, %18 : vector<16x128xf32>
    %c0_7 = arith.constant 0 : index
    %c0_8 = arith.constant 0 : index
    %20 = vector.load %arg3[%c0_7, %c0_8] : memref<1x128xf32, #tpu.memory_space<vmem>>, vector<1x128xf32>
    %21 = vector.broadcast %20 : vector<1x128xf32> to vector<16x128xf32>
    %22 = arith.addf %19, %21 : vector<16x128xf32>
    %c0_9 = arith.constant 0 : index
    %c0_10 = arith.constant 0 : index
    %23 = vector.load %arg4[%c0_9, %c0_10] : memref<16x128xf32, #tpu.memory_space<vmem>>, vector<16x128xf32>
    tpu.vector_store %arg4[%c0_9, %c0_10], %22 {strides = array<i32>} : memref<16x128xf32, #tpu.memory_space<vmem>>, vector<16x128xf32>,
    return
  }
  func.func @transform_0(%arg0: i32) -> (i32, i32) {
    %c0_i32 = arith.constant 0 : i32
    %c0_i32_0 = arith.constant 0 : i32
    return %arg0, %c0_i32 : i32, i32
  }
  func.func @transform_1(%arg0: i32) -> (i32, i32) {
    %c0_i32 = arith.constant 0 : i32
    %c0_i32_0 = arith.constant 0 : i32
    %c0_i32_1 = arith.constant 0 : i32
    return %c0_i32, %c0_i32_0 : i32, i32
  }
  func.func @transform_2(%arg0: i32) -> (i32, i32) {
    %c0_i32 = arith.constant 0 : i32
    %c0_i32_0 = arith.constant 0 : i32
    %c0_i32_1 = arith.constant 0 : i32
    return %c0_i32, %c0_i32_0 : i32, i32
  }
  func.func @transform_3(%arg0: i32) -> (i32, i32) {
    %c0_i32 = arith.constant 0 : i32
    %c0_i32_0 = arith.constant 0 : i32
    return %arg0, %c0_i32 : i32, i32
  }
}

module attributes {stable_mosaic.version = 11 : i64} {
  func.func @_matmul_kernel(%arg0: i32, %arg1: i32, %arg2: i32, %arg3: memref<16x128xf32, #tpu.memory_space<vmem>>, %arg4: memref<128x128xbf16, #tpu.memory_space<vmem>>, %arg5: memref<1x128xf32, #tpu.memory_space<vmem>>, %arg6: memref<16x128xf32, #tpu.memory_space<vmem>>) attributes {dimension_semantics = [#tpu.dimension_semantics<parallel>, #tpu.dimension_semantics<parallel>, #tpu.dimension_semantics<arbitrary>], iteration_bounds = array<i64: 1, 3, 1>, scalar_prefetch = 0 : i64, scratch_operands = 0 : i64, tpu.core_type = #tpu.core_type<tc>, window_params = [{transform_indices = @transform_0, window_bounds = array<i64: 16, 128>}, {transform_indices = @transform_1, window_bounds = array<i64: 128, 128>}, {transform_indices = @transform_2, window_bounds = array<i64: 1, 128>}, {transform_indices = @transform_3, window_bounds = array<i64: 16, 128>}]} {
    %c0_i32 = arith.constant 0 : i32
    %0 = arith.cmpi eq, %arg2, %c0_i32 : i32
    %1 = arith.extui %0 : i1 to i32
    %c0_i32_0 = arith.constant 0 : i32
    %2 = arith.cmpi ne, %1, %c0_i32_0 : i32
    scf.if %2 {
      %cst_10 = arith.constant 0.000000e+00 : f32
      %13 = vector.broadcast %cst_10 : f32 to vector<16x128xf32>
      %c0_11 = arith.constant 0 : index
      %c0_12 = arith.constant 0 : index
      %14 = vector.load %arg6[%c0_11, %c0_12] : memref<16x128xf32, #tpu.memory_space<vmem>>, vector<16x128xf32>
      tpu.vector_store %arg6[%c0_11, %c0_12], %13 {strides = array<i32>} : memref<16x128xf32, #tpu.memory_space<vmem>>, vector<16x128xf32>,
    } else {
    }
    %c0 = arith.constant 0 : index
    %c0_1 = arith.constant 0 : index
    %3 = vector.load %arg6[%c0, %c0_1] : memref<16x128xf32, #tpu.memory_space<vmem>>, vector<16x128xf32>
    %c0_2 = arith.constant 0 : index
    %c0_3 = arith.constant 0 : index
    %4 = vector.load %arg3[%c0_2, %c0_3] : memref<16x128xf32, #tpu.memory_space<vmem>>, vector<16x128xf32>
    %5 = arith.truncf %4 : vector<16x128xf32> to vector<16x128xbf16>
    %c0_4 = arith.constant 0 : index
    %c0_5 = arith.constant 0 : index
    %6 = vector.load %arg4[%c0_4, %c0_5] : memref<128x128xbf16, #tpu.memory_space<vmem>>, vector<128x128xbf16>
    %cst = arith.constant dense<0.000000e+00> : vector<16x128xf32>
    %7 = tpu.matmul %5, %6, %cst {dimension_numbers = #tpu.dot_dimension_numbers<[1], [0], [0], [1], [0, 0, 1, 1], [], []>} : vector<16x128xbf16>, vector<128x128xbf16>, vector<16x128xf32> -> vector<16x128xf32>
    %8 = arith.addf %3, %7 : vector<16x128xf32>
    %c0_6 = arith.constant 0 : index
    %c0_7 = arith.constant 0 : index
    %9 = vector.load %arg6[%c0_6, %c0_7] : memref<16x128xf32, #tpu.memory_space<vmem>>, vector<16x128xf32>
    tpu.vector_store %arg6[%c0_6, %c0_7], %8 {strides = array<i32>} : memref<16x128xf32, #tpu.memory_space<vmem>>, vector<16x128xf32>,
    %c0_i32_8 = arith.constant 0 : i32
    %10 = arith.cmpi eq, %arg2, %c0_i32_8 : i32
    %11 = arith.extui %10 : i1 to i32
    %c0_i32_9 = arith.constant 0 : i32
    %12 = arith.cmpi ne, %11, %c0_i32_9 : i32
    scf.if %12 {
      %c0_10 = arith.constant 0 : index
      %c0_11 = arith.constant 0 : index
      %13 = vector.load %arg6[%c0_10, %c0_11] : memref<16x128xf32, #tpu.memory_space<vmem>>, vector<16x128xf32>
      %c0_12 = arith.constant 0 : index
      %c0_13 = arith.constant 0 : index
      %14 = vector.load %arg5[%c0_12, %c0_13] : memref<1x128xf32, #tpu.memory_space<vmem>>, vector<1x128xf32>
      %15 = vector.broadcast %14 : vector<1x128xf32> to vector<16x128xf32>
      %16 = arith.addf %13, %15 : vector<16x128xf32>
      %c0_14 = arith.constant 0 : index
      %c0_15 = arith.constant 0 : index
      %17 = vector.load %arg6[%c0_14, %c0_15] : memref<16x128xf32, #tpu.memory_space<vmem>>, vector<16x128xf32>
      tpu.vector_store %arg6[%c0_14, %c0_15], %16 {strides = array<i32>} : memref<16x128xf32, #tpu.memory_space<vmem>>, vector<16x128xf32>,
    } else {
    }
    return
  }
  func.func @transform_0(%arg0: i32, %arg1: i32, %arg2: i32) -> (i32, i32) {
    %c0_i32 = arith.constant 0 : i32
    return %arg0, %arg2 : i32, i32
  }
  func.func @transform_1(%arg0: i32, %arg1: i32, %arg2: i32) -> (i32, i32) {
    %c0_i32 = arith.constant 0 : i32
    return %arg2, %arg1 : i32, i32
  }
  func.func @transform_2(%arg0: i32, %arg1: i32, %arg2: i32) -> (i32, i32) {
    %c0_i32 = arith.constant 0 : i32
    %c0_i32_0 = arith.constant 0 : i32
    return %c0_i32, %arg1 : i32, i32
  }
  func.func @transform_3(%arg0: i32, %arg1: i32, %arg2: i32) -> (i32, i32) {
    %c0_i32 = arith.constant 0 : i32
    return %arg0, %arg1 : i32, i32
  }
}

module attributes {stable_mosaic.version = 11 : i64} {
  func.func @_attention_kernel(%arg0: i32, %arg1: i32, %arg2: i32, %arg3: i32, %arg4: memref<1x8x128xf32, #tpu.memory_space<vmem>>, %arg5: memref<1x8x128xf32, #tpu.memory_space<vmem>>, %arg6: memref<1x8x128xf32, #tpu.memory_space<vmem>>, %arg7: memref<1x8x128xf32, #tpu.memory_space<vmem>>, %arg8: memref<2x8x1xf32, #tpu.memory_space<vmem>>, %arg9: memref<2x8x1xf32, #tpu.memory_space<vmem>>, %arg10: memref<8x128xf32, #tpu.memory_space<vmem>>) attributes {dimension_semantics = [#tpu.dimension_semantics<parallel>, #tpu.dimension_semantics<parallel>, #tpu.dimension_semantics<parallel>, #tpu.dimension_semantics<arbitrary>], iteration_bounds = array<i64: 2, 1, 1, 1>, scalar_prefetch = 0 : i64, scratch_operands = 3 : i64, tpu.core_type = #tpu.core_type<tc>, window_params = [{transform_indices = @transform_0, window_bounds = array<i64: 1, 8, 128>}, {transform_indices = @transform_1, window_bounds = array<i64: 1, 8, 128>}, {transform_indices = @transform_2, window_bounds = array<i64: 1, 8, 128>}, {transform_indices = @transform_3, window_bounds = array<i64: 1, 8, 128>}]} {
    %c0_i32 = arith.constant 0 : i32
    %0 = arith.cmpi eq, %arg3, %c0_i32 : i32
    %1 = arith.extui %0 : i1 to i32
    %c0_i32_0 = arith.constant 0 : i32
    %2 = arith.cmpi ne, %1, %c0_i32_0 : i32
    scf.if %2 {
      %cst = arith.constant 0xFF800000 : f32
      %10 = vector.broadcast %cst : f32 to vector<2x8x1xf32>
      %c0 = arith.constant 0 : index
      %c0_5 = arith.constant 0 : index
      %c0_6 = arith.constant 0 : index
      %11 = vector.load %arg8[%c0, %c0_5, %c0_6] : memref<2x8x1xf32, #tpu.memory_space<vmem>>, vector<2x8x1xf32>
      tpu.vector_store %arg8[%c0, %c0_5, %c0_6], %10 {strides = array<i32>} : memref<2x8x1xf32, #tpu.memory_space<vmem>>, vector<2x8x1xf32>,
      %cst_7 = arith.constant 0.000000e+00 : f32
      %12 = vector.broadcast %cst_7 : f32 to vector<2x8x1xf32>
      %c0_8 = arith.constant 0 : index
      %c0_9 = arith.constant 0 : index
      %c0_10 = arith.constant 0 : index
      %13 = vector.load %arg9[%c0_8, %c0_9, %c0_10] : memref<2x8x1xf32, #tpu.memory_space<vmem>>, vector<2x8x1xf32>
      tpu.vector_store %arg9[%c0_8, %c0_9, %c0_10], %12 {strides = array<i32>} : memref<2x8x1xf32, #tpu.memory_space<vmem>>, vector<2x8x1xf32>,
      %cst_11 = arith.constant 0.000000e+00 : f32
      %14 = vector.broadcast %cst_11 : f32 to vector<8x128xf32>
      %c0_12 = arith.constant 0 : index
      %c0_13 = arith.constant 0 : index
      %15 = vector.load %arg10[%c0_12, %c0_13] : memref<8x128xf32, #tpu.memory_space<vmem>>, vector<8x128xf32>
      tpu.vector_store %arg10[%c0_12, %c0_13], %14 {strides = array<i32>} : memref<8x128xf32, #tpu.memory_space<vmem>>, vector<8x128xf32>,
    } else {
    }
    %c8_i32 = arith.constant 8 : i32
    %3 = arith.muli %arg3, %c8_i32 : i32
    %c8_i32_1 = arith.constant 8 : i32
    %4 = arith.cmpi slt, %3, %c8_i32_1 : i32
    %5 = arith.extui %4 : i1 to i32
    %c0_i32_2 = arith.constant 0 : i32
    %6 = arith.cmpi ne, %5, %c0_i32_2 : i32
    scf.if %6 {
      %c0 = arith.constant 0 : index
      %c0_5 = arith.constant 0 : index
      %c0_6 = arith.constant 0 : index
      %10 = vector.load %arg4[%c0, %c0_5, %c0_6] : memref<1x8x128xf32, #tpu.memory_space<vmem>>, vector<1x8x128xf32>
      %11 = vector.shape_cast %10 : vector<1x8x128xf32> to vector<8x128xf32>
      %12 = arith.truncf %11 : vector<8x128xf32> to vector<8x128xbf16>
      %c0_7 = arith.constant 0 : index
      %c0_8 = arith.constant 0 : index
      %c0_9 = arith.constant 0 : index
      %13 = vector.load %arg5[%c0_7, %c0_8, %c0_9] : memref<1x8x128xf32, #tpu.memory_space<vmem>>, vector<1x8x128xf32>
      %14 = vector.shape_cast %13 : vector<1x8x128xf32> to vector<8x128xf32>
      %15 = arith.truncf %14 : vector<8x128xf32> to vector<8x128xbf16>
      %c0_10 = arith.constant 0 : index
      %c0_11 = arith.constant 0 : index
      %c0_12 = arith.constant 0 : index
      %16 = vector.load %arg6[%c0_10, %c0_11, %c0_12] : memref<1x8x128xf32, #tpu.memory_space<vmem>>, vector<1x8x128xf32>
      %17 = vector.shape_cast %16 : vector<1x8x128xf32> to vector<8x128xf32>
      %18 = arith.truncf %17 : vector<8x128xf32> to vector<8x128xbf16>
      %19 = vector.extract_strided_slice %12 {offsets = [0, 0], sizes = [8, 64], strides = [1, 1]} : vector<8x128xbf16> to vector<8x64xbf16>
      %20 = vector.extract_strided_slice %15 {offsets = [0, 0], sizes = [8, 64], strides = [1, 1]} : vector<8x128xbf16> to vector<8x64xbf16>
      %cst = arith.constant dense<0.000000e+00> : vector<8x8xf32>
      %21 = tpu.matmul %19, %20, %cst {dimension_numbers = #tpu.dot_dimension_numbers<[1], [1], [0], [0], [0, 0, 1, 0], [], []>} : vector<8x64xbf16>, vector<8x64xbf16>, vector<8x8xf32> -> vector<8x8xf32>
      %c0_13 = arith.constant 0 : index
      %c0_14 = arith.constant 0 : index
      %c0_15 = arith.constant 0 : index
      %22 = vector.load %arg8[%c0_13, %c0_14, %c0_15] : memref<2x8x1xf32, #tpu.memory_space<vmem>>, vector<1x8x1xf32>
      %23 = vector.shape_cast %22 : vector<1x8x1xf32> to vector<8x1xf32>
      %cst_16 = arith.constant dense<0xFF800000> : vector<8xf32>
      %24 = vector.multi_reduction <maximumf>, %21, %cst_16 [1] : vector<8x8xf32> to vector<8xf32>
      %25 = vector.shape_cast %24 : vector<8xf32> to vector<8x1xf32>
      %26 = arith.maximumf %23, %25 : vector<8x1xf32>
      %27 = arith.subf %23, %26 : vector<8x1xf32>
      %28 = math.exp %27 : vector<8x1xf32>
      %29 = vector.broadcast %26 : vector<8x1xf32> to vector<8x8xf32>
      %30 = arith.subf %21, %29 : vector<8x8xf32>
      %31 = math.exp %30 : vector<8x8xf32>
      %c0_17 = arith.constant 0 : index
      %c0_18 = arith.constant 0 : index
      %c0_19 = arith.constant 0 : index
      %32 = vector.load %arg9[%c0_17, %c0_18, %c0_19] : memref<2x8x1xf32, #tpu.memory_space<vmem>>, vector<1x8x1xf32>
      %33 = vector.shape_cast %32 : vector<1x8x1xf32> to vector<8x1xf32>
      %34 = arith.mulf %28, %33 : vector<8x1xf32>
      %cst_20 = arith.constant dense<0.000000e+00> : vector<8xf32>
      %35 = vector.multi_reduction <add>, %31, %cst_20 [1] : vector<8x8xf32> to vector<8xf32>
      %36 = vector.shape_cast %35 : vector<8xf32> to vector<8x1xf32>
      %37 = arith.addf %34, %36 : vector<8x1xf32>
      %c0_21 = arith.constant 0 : index
      %c0_22 = arith.constant 0 : index
      %c0_23 = arith.constant 0 : index
      %38 = vector.load %arg9[%c0_21, %c0_22, %c0_23] : memref<2x8x1xf32, #tpu.memory_space<vmem>>, vector<1x8x1xf32>
      %39 = vector.shape_cast %38 : vector<1x8x1xf32> to vector<8x1xf32>
      %40 = vector.shape_cast %37 : vector<8x1xf32> to vector<1x8x1xf32>
      tpu.vector_store %arg9[%c0_21, %c0_22, %c0_23], %40 {strides = array<i32>} : memref<2x8x1xf32, #tpu.memory_space<vmem>>, vector<1x8x1xf32>,
      %c0_24 = arith.constant 0 : index
      %c0_25 = arith.constant 0 : index
      %c0_26 = arith.constant 0 : index
      %41 = vector.load %arg8[%c0_24, %c0_25, %c0_26] : memref<2x8x1xf32, #tpu.memory_space<vmem>>, vector<1x8x1xf32>
      %42 = vector.shape_cast %41 : vector<1x8x1xf32> to vector<8x1xf32>
      %43 = vector.shape_cast %26 : vector<8x1xf32> to vector<1x8x1xf32>
      tpu.vector_store %arg8[%c0_24, %c0_25, %c0_26], %43 {strides = array<i32>} : memref<2x8x1xf32, #tpu.memory_space<vmem>>, vector<1x8x1xf32>,
      %44 = vector.shape_cast %28 : vector<8x1xf32> to vector<8x1xf32>
      %45 = vector.broadcast %44 : vector<8x1xf32> to vector<8x64xf32>
      %46 = arith.truncf %31 : vector<8x8xf32> to vector<8x8xbf16>
      %47 = vector.extract_strided_slice %18 {offsets = [0, 0], sizes = [8, 64], strides = [1, 1]} : vector<8x128xbf16> to vector<8x64xbf16>
      %cst_27 = arith.constant dense<0.000000e+00> : vector<8x64xf32>
      %48 = tpu.matmul %46, %47, %cst_27 {dimension_numbers = #tpu.dot_dimension_numbers<[1], [0], [0], [1], [0, 0, 1, 1], [], []>} : vector<8x8xbf16>, vector<8x64xbf16>, vector<8x64xf32> -> vector<8x64xf32>
      %49 = vector.extract_strided_slice %12 {offsets = [0, 64], sizes = [8, 64], strides = [1, 1]} : vector<8x128xbf16> to vector<8x64xbf16>
      %50 = vector.extract_strided_slice %15 {offsets = [0, 64], sizes = [8, 64], strides = [1, 1]} : vector<8x128xbf16> to vector<8x64xbf16>
      %cst_28 = arith.constant dense<0.000000e+00> : vector<8x8xf32>
      %51 = tpu.matmul %49, %50, %cst_28 {dimension_numbers = #tpu.dot_dimension_numbers<[1], [1], [0], [0], [0, 0, 1, 0], [], []>} : vector<8x64xbf16>, vector<8x64xbf16>, vector<8x8xf32> -> vector<8x8xf32>
      %c1 = arith.constant 1 : index
      %c0_29 = arith.constant 0 : index
      %c0_30 = arith.constant 0 : index
      %52 = vector.load %arg8[%c1, %c0_29, %c0_30] : memref<2x8x1xf32, #tpu.memory_space<vmem>>, vector<1x8x1xf32>
      %53 = vector.shape_cast %52 : vector<1x8x1xf32> to vector<8x1xf32>
      %cst_31 = arith.constant dense<0xFF800000> : vector<8xf32>
      %54 = vector.multi_reduction <maximumf>, %51, %cst_31 [1] : vector<8x8xf32> to vector<8xf32>
      %55 = vector.shape_cast %54 : vector<8xf32> to vector<8x1xf32>
      %56 = arith.maximumf %53, %55 : vector<8x1xf32>
      %57 = arith.subf %53, %56 : vector<8x1xf32>
      %58 = math.exp %57 : vector<8x1xf32>
      %59 = vector.broadcast %56 : vector<8x1xf32> to vector<8x8xf32>
      %60 = arith.subf %51, %59 : vector<8x8xf32>
      %61 = math.exp %60 : vector<8x8xf32>
      %c1_32 = arith.constant 1 : index
      %c0_33 = arith.constant 0 : index
      %c0_34 = arith.constant 0 : index
      %62 = vector.load %arg9[%c1_32, %c0_33, %c0_34] : memref<2x8x1xf32, #tpu.memory_space<vmem>>, vector<1x8x1xf32>
      %63 = vector.shape_cast %62 : vector<1x8x1xf32> to vector<8x1xf32>
      %64 = arith.mulf %58, %63 : vector<8x1xf32>
      %cst_35 = arith.constant dense<0.000000e+00> : vector<8xf32>
      %65 = vector.multi_reduction <add>, %61, %cst_35 [1] : vector<8x8xf32> to vector<8xf32>
      %66 = vector.shape_cast %65 : vector<8xf32> to vector<8x1xf32>
      %67 = arith.addf %64, %66 : vector<8x1xf32>
      %c1_36 = arith.constant 1 : index
      %c0_37 = arith.constant 0 : index
      %c0_38 = arith.constant 0 : index
      %68 = vector.load %arg9[%c1_36, %c0_37, %c0_38] : memref<2x8x1xf32, #tpu.memory_space<vmem>>, vector<1x8x1xf32>
      %69 = vector.shape_cast %68 : vector<1x8x1xf32> to vector<8x1xf32>
      %70 = vector.shape_cast %67 : vector<8x1xf32> to vector<1x8x1xf32>
      tpu.vector_store %arg9[%c1_36, %c0_37, %c0_38], %70 {strides = array<i32>} : memref<2x8x1xf32, #tpu.memory_space<vmem>>, vector<1x8x1xf32>,
      %c1_39 = arith.constant 1 : index
      %c0_40 = arith.constant 0 : index
      %c0_41 = arith.constant 0 : index
      %71 = vector.load %arg8[%c1_39, %c0_40, %c0_41] : memref<2x8x1xf32, #tpu.memory_space<vmem>>, vector<1x8x1xf32>
      %72 = vector.shape_cast %71 : vector<1x8x1xf32> to vector<8x1xf32>
      %73 = vector.shape_cast %56 : vector<8x1xf32> to vector<1x8x1xf32>
      tpu.vector_store %arg8[%c1_39, %c0_40, %c0_41], %73 {strides = array<i32>} : memref<2x8x1xf32, #tpu.memory_space<vmem>>, vector<1x8x1xf32>,
      %74 = vector.shape_cast %58 : vector<8x1xf32> to vector<8x1xf32>
      %75 = vector.broadcast %74 : vector<8x1xf32> to vector<8x64xf32>
      %76 = arith.truncf %61 : vector<8x8xf32> to vector<8x8xbf16>
      %77 = vector.extract_strided_slice %18 {offsets = [0, 64], sizes = [8, 64], strides = [1, 1]} : vector<8x128xbf16> to vector<8x64xbf16>
      %cst_42 = arith.constant dense<0.000000e+00> : vector<8x64xf32>
      %78 = tpu.matmul %76, %77, %cst_42 {dimension_numbers = #tpu.dot_dimension_numbers<[1], [0], [0], [1], [0, 0, 1, 1], [], []>} : vector<8x8xbf16>, vector<8x64xbf16>, vector<8x64xf32> -> vector<8x64xf32>
      %79 = tpu.concatenate %45, %75 in 1 : vector<8x64xf32>, vector<8x64xf32> -> vector<8x128xf32>
      %80 = tpu.concatenate %48, %78 in 1 : vector<8x64xf32>, vector<8x64xf32> -> vector<8x128xf32>
      %c0_43 = arith.constant 0 : index
      %c0_44 = arith.constant 0 : index
      %81 = vector.load %arg10[%c0_43, %c0_44] : memref<8x128xf32, #tpu.memory_space<vmem>>, vector<8x128xf32>
      %82 = arith.mulf %79, %81 : vector<8x128xf32>
      %83 = arith.addf %82, %80 : vector<8x128xf32>
      %c0_45 = arith.constant 0 : index
      %c0_46 = arith.constant 0 : index
      %84 = vector.load %arg10[%c0_45, %c0_46] : memref<8x128xf32, #tpu.memory_space<vmem>>, vector<8x128xf32>
      tpu.vector_store %arg10[%c0_45, %c0_46], %83 {strides = array<i32>} : memref<8x128xf32, #tpu.memory_space<vmem>>, vector<8x128xf32>,
    } else {
    }
    %c0_i32_3 = arith.constant 0 : i32
    %7 = arith.cmpi eq, %arg3, %c0_i32_3 : i32
    %8 = arith.extui %7 : i1 to i32
    %c0_i32_4 = arith.constant 0 : i32
    %9 = arith.cmpi ne, %8, %c0_i32_4 : i32
    scf.if %9 {
      %c0 = arith.constant 0 : index
      %c0_5 = arith.constant 0 : index
      %c0_6 = arith.constant 0 : index
      %10 = vector.load %arg9[%c0, %c0_5, %c0_6] : memref<2x8x1xf32, #tpu.memory_space<vmem>>, vector<1x8x1xf32>
      %11 = vector.shape_cast %10 : vector<1x8x1xf32> to vector<8x1xf32>
      %12 = tpu.reciprocal %11 {approx = true} : vector<8x1xf32> -> vector<8x1xf32>
      %13 = vector.shape_cast %12 : vector<8x1xf32> to vector<8x1xf32>
      %14 = vector.broadcast %13 : vector<8x1xf32> to vector<8x64xf32>
      %c1 = arith.constant 1 : index
      %c0_7 = arith.constant 0 : index
      %c0_8 = arith.constant 0 : index
      %15 = vector.load %arg9[%c1, %c0_7, %c0_8] : memref<2x8x1xf32, #tpu.memory_space<vmem>>, vector<1x8x1xf32>
      %16 = vector.shape_cast %15 : vector<1x8x1xf32> to vector<8x1xf32>
      %17 = tpu.reciprocal %16 {approx = true} : vector<8x1xf32> -> vector<8x1xf32>
      %18 = vector.shape_cast %17 : vector<8x1xf32> to vector<8x1xf32>
      %19 = vector.broadcast %18 : vector<8x1xf32> to vector<8x64xf32>
      %20 = tpu.concatenate %14, %19 in 1 : vector<8x64xf32>, vector<8x64xf32> -> vector<8x128xf32>
      %c0_9 = arith.constant 0 : index
      %c0_10 = arith.constant 0 : index
      %21 = vector.load %arg10[%c0_9, %c0_10] : memref<8x128xf32, #tpu.memory_space<vmem>>, vector<8x128xf32>
      %22 = arith.mulf %21, %20 : vector<8x128xf32>
      %c0_11 = arith.constant 0 : index
      %c0_12 = arith.constant 0 : index
      %c0_13 = arith.constant 0 : index
      %23 = vector.load %arg7[%c0_11, %c0_12, %c0_13] : memref<1x8x128xf32, #tpu.memory_space<vmem>>, vector<1x8x128xf32>
      %24 = vector.shape_cast %23 : vector<1x8x128xf32> to vector<8x128xf32>
      %25 = vector.shape_cast %22 : vector<8x128xf32> to vector<1x8x128xf32>
      tpu.vector_store %arg7[%c0_11, %c0_12, %c0_13], %25 {strides = array<i32>} : memref<1x8x128xf32, #tpu.memory_space<vmem>>, vector<1x8x128xf32>,
    } else {
    }
    return
  }
  func.func @transform_0(%arg0: i32, %arg1: i32, %arg2: i32, %arg3: i32) -> (i32, i32, i32) {
    %c0_i32 = arith.constant 0 : i32
    return %arg0, %arg2, %arg1 : i32, i32, i32
  }
  func.func @transform_1(%arg0: i32, %arg1: i32, %arg2: i32, %arg3: i32) -> (i32, i32, i32) {
    %c1_i32 = arith.constant 1 : i32
    %0 = arith.addi %c1_i32, %arg1 : i32
    %c0_i32 = arith.constant 0 : i32
    return %arg0, %arg3, %0 : i32, i32, i32
  }
  func.func @transform_2(%arg0: i32, %arg1: i32, %arg2: i32, %arg3: i32) -> (i32, i32, i32) {
    %c2_i32 = arith.constant 2 : i32
    %0 = arith.addi %c2_i32, %arg1 : i32
    %c0_i32 = arith.constant 0 : i32
    return %arg0, %arg3, %0 : i32, i32, i32
  }
  func.func @transform_3(%arg0: i32, %arg1: i32, %arg2: i32, %arg3: i32) -> (i32, i32, i32) {
    %c0_i32 = arith.constant 0 : i32
    return %arg0, %arg2, %arg1 : i32, i32, i32
  }
}

module attributes {stable_mosaic.version = 11 : i64} {
  func.func @_matmul_kernel(%arg0: i32, %arg1: i32, %arg2: i32, %arg3: memref<16x128xf32, #tpu.memory_space<vmem>>, %arg4: memref<128x128xbf16, #tpu.memory_space<vmem>>, %arg5: memref<1x128xf32, #tpu.memory_space<vmem>>, %arg6: memref<16x128xf32, #tpu.memory_space<vmem>>, %arg7: memref<16x128xf32, #tpu.memory_space<vmem>>) attributes {dimension_semantics = [#tpu.dimension_semantics<parallel>, #tpu.dimension_semantics<parallel>, #tpu.dimension_semantics<arbitrary>], iteration_bounds = array<i64: 1, 1, 1>, scalar_prefetch = 0 : i64, scratch_operands = 0 : i64, tpu.core_type = #tpu.core_type<tc>, window_params = [{transform_indices = @transform_0, window_bounds = array<i64: 16, 128>}, {transform_indices = @transform_1, window_bounds = array<i64: 128, 128>}, {transform_indices = @transform_2, window_bounds = array<i64: 1, 128>}, {transform_indices = @transform_3, window_bounds = array<i64: 16, 128>}, {transform_indices = @transform_4, window_bounds = array<i64: 16, 128>}]} {
    %c0_i32 = arith.constant 0 : i32
    %0 = arith.cmpi eq, %arg2, %c0_i32 : i32
    %1 = arith.extui %0 : i1 to i32
    %c0_i32_0 = arith.constant 0 : i32
    %2 = arith.cmpi ne, %1, %c0_i32_0 : i32
    scf.if %2 {
      %cst_10 = arith.constant 0.000000e+00 : f32
      %13 = vector.broadcast %cst_10 : f32 to vector<16x128xf32>
      %c0_11 = arith.constant 0 : index
      %c0_12 = arith.constant 0 : index
      %14 = vector.load %arg7[%c0_11, %c0_12] : memref<16x128xf32, #tpu.memory_space<vmem>>, vector<16x128xf32>
      tpu.vector_store %arg7[%c0_11, %c0_12], %13 {strides = array<i32>} : memref<16x128xf32, #tpu.memory_space<vmem>>, vector<16x128xf32>,
    } else {
    }
    %c0 = arith.constant 0 : index
    %c0_1 = arith.constant 0 : index
    %3 = vector.load %arg7[%c0, %c0_1] : memref<16x128xf32, #tpu.memory_space<vmem>>, vector<16x128xf32>
    %c0_2 = arith.constant 0 : index
    %c0_3 = arith.constant 0 : index
    %4 = vector.load %arg3[%c0_2, %c0_3] : memref<16x128xf32, #tpu.memory_space<vmem>>, vector<16x128xf32>
    %5 = arith.truncf %4 : vector<16x128xf32> to vector<16x128xbf16>
    %c0_4 = arith.constant 0 : index
    %c0_5 = arith.constant 0 : index
    %6 = vector.load %arg4[%c0_4, %c0_5] : memref<128x128xbf16, #tpu.memory_space<vmem>>, vector<128x128xbf16>
    %cst = arith.constant dense<0.000000e+00> : vector<16x128xf32>
    %7 = tpu.matmul %5, %6, %cst {dimension_numbers = #tpu.dot_dimension_numbers<[1], [0], [0], [1], [0, 0, 1, 1], [], []>} : vector<16x128xbf16>, vector<128x128xbf16>, vector<16x128xf32> -> vector<16x128xf32>
    %8 = arith.addf %3, %7 : vector<16x128xf32>
    %c0_6 = arith.constant 0 : index
    %c0_7 = arith.constant 0 : index
    %9 = vector.load %arg7[%c0_6, %c0_7] : memref<16x128xf32, #tpu.memory_space<vmem>>, vector<16x128xf32>
    tpu.vector_store %arg7[%c0_6, %c0_7], %8 {strides = array<i32>} : memref<16x128xf32, #tpu.memory_space<vmem>>, vector<16x128xf32>,
    %c0_i32_8 = arith.constant 0 : i32
    %10 = arith.cmpi eq, %arg2, %c0_i32_8 : i32
    %11 = arith.extui %10 : i1 to i32
    %c0_i32_9 = arith.constant 0 : i32
    %12 = arith.cmpi ne, %11, %c0_i32_9 : i32
    scf.if %12 {
      %c0_10 = arith.constant 0 : index
      %c0_11 = arith.constant 0 : index
      %13 = vector.load %arg7[%c0_10, %c0_11] : memref<16x128xf32, #tpu.memory_space<vmem>>, vector<16x128xf32>
      %c0_12 = arith.constant 0 : index
      %c0_13 = arith.constant 0 : index
      %14 = vector.load %arg5[%c0_12, %c0_13] : memref<1x128xf32, #tpu.memory_space<vmem>>, vector<1x128xf32>
      %15 = vector.broadcast %14 : vector<1x128xf32> to vector<16x128xf32>
      %16 = arith.addf %13, %15 : vector<16x128xf32>
      %c0_14 = arith.constant 0 : index
      %c0_15 = arith.constant 0 : index
      %17 = vector.load %arg6[%c0_14, %c0_15] : memref<16x128xf32, #tpu.memory_space<vmem>>, vector<16x128xf32>
      %18 = arith.addf %16, %17 : vector<16x128xf32>
      %c0_16 = arith.constant 0 : index
      %c0_17 = arith.constant 0 : index
      %19 = vector.load %arg7[%c0_16, %c0_17] : memref<16x128xf32, #tpu.memory_space<vmem>>, vector<16x128xf32>
      tpu.vector_store %arg7[%c0_16, %c0_17], %18 {strides = array<i32>} : memref<16x128xf32, #tpu.memory_space<vmem>>, vector<16x128xf32>,
    } else {
    }
    return
  }
  func.func @transform_0(%arg0: i32, %arg1: i32, %arg2: i32) -> (i32, i32) {
    %c0_i32 = arith.constant 0 : i32
    return %arg0, %arg2 : i32, i32
  }
  func.func @transform_1(%arg0: i32, %arg1: i32, %arg2: i32) -> (i32, i32) {
    %c0_i32 = arith.constant 0 : i32
    return %arg2, %arg1 : i32, i32
  }
  func.func @transform_2(%arg0: i32, %arg1: i32, %arg2: i32) -> (i32, i32) {
    %c0_i32 = arith.constant 0 : i32
    %c0_i32_0 = arith.constant 0 : i32
    return %c0_i32, %arg1 : i32, i32
  }
  func.func @transform_3(%arg0: i32, %arg1: i32, %arg2: i32) -> (i32, i32) {
    %c0_i32 = arith.constant 0 : i32
    return %arg0, %arg1 : i32, i32
  }
  func.func @transform_4(%arg0: i32, %arg1: i32, %arg2: i32) -> (i32, i32) {
    %c0_i32 = arith.constant 0 : i32
    return %arg0, %arg1 : i32, i32
  }
}

module attributes {stable_mosaic.version = 11 : i64} {
  func.func @_matmul_kernel(%arg0: i32, %arg1: i32, %arg2: i32, %arg3: memref<16x128xf32, #tpu.memory_space<vmem>>, %arg4: memref<128x256xbf16, #tpu.memory_space<vmem>>, %arg5: memref<1x256xf32, #tpu.memory_space<vmem>>, %arg6: memref<16x256xf32, #tpu.memory_space<vmem>>) attributes {dimension_semantics = [#tpu.dimension_semantics<parallel>, #tpu.dimension_semantics<parallel>, #tpu.dimension_semantics<arbitrary>], iteration_bounds = array<i64: 1, 2, 1>, scalar_prefetch = 0 : i64, scratch_operands = 0 : i64, tpu.core_type = #tpu.core_type<tc>, window_params = [{transform_indices = @transform_0, window_bounds = array<i64: 16, 128>}, {transform_indices = @transform_1, window_bounds = array<i64: 128, 256>}, {transform_indices = @transform_2, window_bounds = array<i64: 1, 256>}, {transform_indices = @transform_3, window_bounds = array<i64: 16, 256>}]} {
    %c0_i32 = arith.constant 0 : i32
    %0 = arith.cmpi eq, %arg2, %c0_i32 : i32
    %1 = arith.extui %0 : i1 to i32
    %c0_i32_0 = arith.constant 0 : i32
    %2 = arith.cmpi ne, %1, %c0_i32_0 : i32
    scf.if %2 {
      %cst_10 = arith.constant 0.000000e+00 : f32
      %13 = vector.broadcast %cst_10 : f32 to vector<16x256xf32>
      %c0_11 = arith.constant 0 : index
      %c0_12 = arith.constant 0 : index
      %14 = vector.load %arg6[%c0_11, %c0_12] : memref<16x256xf32, #tpu.memory_space<vmem>>, vector<16x256xf32>
      tpu.vector_store %arg6[%c0_11, %c0_12], %13 {strides = array<i32>} : memref<16x256xf32, #tpu.memory_space<vmem>>, vector<16x256xf32>,
    } else {
    }
    %c0 = arith.constant 0 : index
    %c0_1 = arith.constant 0 : index
    %3 = vector.load %arg6[%c0, %c0_1] : memref<16x256xf32, #tpu.memory_space<vmem>>, vector<16x256xf32>
    %c0_2 = arith.constant 0 : index
    %c0_3 = arith.constant 0 : index
    %4 = vector.load %arg3[%c0_2, %c0_3] : memref<16x128xf32, #tpu.memory_space<vmem>>, vector<16x128xf32>
    %5 = arith.truncf %4 : vector<16x128xf32> to vector<16x128xbf16>
    %c0_4 = arith.constant 0 : index
    %c0_5 = arith.constant 0 : index
    %6 = vector.load %arg4[%c0_4, %c0_5] : memref<128x256xbf16, #tpu.memory_space<vmem>>, vector<128x256xbf16>
    %cst = arith.constant dense<0.000000e+00> : vector<16x256xf32>
    %7 = tpu.matmul %5, %6, %cst {dimension_numbers = #tpu.dot_dimension_numbers<[1], [0], [0], [1], [0, 0, 1, 1], [], []>} : vector<16x128xbf16>, vector<128x256xbf16>, vector<16x256xf32> -> vector<16x256xf32>
    %8 = arith.addf %3, %7 : vector<16x256xf32>
    %c0_6 = arith.constant 0 : index
    %c0_7 = arith.constant 0 : index
    %9 = vector.load %arg6[%c0_6, %c0_7] : memref<16x256xf32, #tpu.memory_space<vmem>>, vector<16x256xf32>
    tpu.vector_store %arg6[%c0_6, %c0_7], %8 {strides = array<i32>} : memref<16x256xf32, #tpu.memory_space<vmem>>, vector<16x256xf32>,
    %c0_i32_8 = arith.constant 0 : i32
    %10 = arith.cmpi eq, %arg2, %c0_i32_8 : i32
    %11 = arith.extui %10 : i1 to i32
    %c0_i32_9 = arith.constant 0 : i32
    %12 = arith.cmpi ne, %11, %c0_i32_9 : i32
    scf.if %12 {
      %c0_10 = arith.constant 0 : index
      %c0_11 = arith.constant 0 : index
      %13 = vector.load %arg6[%c0_10, %c0_11] : memref<16x256xf32, #tpu.memory_space<vmem>>, vector<16x256xf32>
      %c0_12 = arith.constant 0 : index
      %c0_13 = arith.constant 0 : index
      %14 = vector.load %arg5[%c0_12, %c0_13] : memref<1x256xf32, #tpu.memory_space<vmem>>, vector<1x256xf32>
      %15 = vector.broadcast %14 : vector<1x256xf32> to vector<16x256xf32>
      %16 = arith.addf %13, %15 : vector<16x256xf32>
      %cst_14 = arith.constant 5.000000e-01 : f32
      %17 = vector.broadcast %cst_14 : f32 to vector<16x256xf32>
      %18 = arith.mulf %16, %17 : vector<16x256xf32>
      %cst_15 = arith.constant 0.707106769 : f32
      %19 = vector.broadcast %cst_15 : f32 to vector<16x256xf32>
      %20 = arith.mulf %16, %19 : vector<16x256xf32>
      %cst_16 = arith.constant 0.000000e+00 : f32
      %21 = vector.broadcast %cst_16 : f32 to vector<16x256xf32>
      %22 = arith.cmpf oge, %20, %21 : vector<16x256xf32>
      %cst_17 = arith.constant 1.000000e+00 : f32
      %cst_18 = arith.constant -1.000000e+00 : f32
      %23 = vector.broadcast %cst_17 : f32 to vector<16x256xf32>
      %24 = vector.broadcast %cst_18 : f32 to vector<16x256xf32>
      %25 = arith.select %22, %23, %24 : vector<16x256xi1>, vector<16x256xf32>
      %26 = math.absf %20 : vector<16x256xf32>
      %cst_19 = arith.constant 0.327591091 : f32
      %27 = vector.broadcast %cst_19 : f32 to vector<16x256xf32>
      %28 = arith.mulf %27, %26 : vector<16x256xf32>
      %cst_20 = arith.constant 1.000000e+00 : f32
      %29 = vector.broadcast %cst_20 : f32 to vector<16x256xf32>
      %30 = arith.addf %29, %28 : vector<16x256xf32>
      %cst_21 = arith.constant 1.000000e+00 : f32
      %31 = vector.broadcast %cst_21 : f32 to vector<16x256xf32>
      %32 = arith.divf %31, %30 : vector<16x256xf32>
      %cst_22 = arith.constant 1.06140542 : f32
      %33 = vector.broadcast %cst_22 : f32 to vector<16x256xf32>
      %34 = arith.mulf %33, %32 : vector<16x256xf32>
      %cst_23 = arith.constant -1.45315206 : f32
      %35 = vector.broadcast %cst_23 : f32 to vector<16x256xf32>
      %36 = arith.addf %34, %35 : vector<16x256xf32>
      %37 = arith.mulf %36, %32 : vector<16x256xf32>
      %cst_24 = arith.constant 1.42141378 : f32
      %38 = vector.broadcast %cst_24 : f32 to vector<16x256xf32>
      %39 = arith.addf %37, %38 : vector<16x256xf32>
      %40 = arith.mulf %39, %32 : vector<16x256xf32>
      %cst_25 = arith.constant -0.284496725 : f32
      %41 = vector.broadcast %cst_25 : f32 to vector<16x256xf32>
      %42 = arith.addf %40, %41 : vector<16x256xf32>
      %43 = arith.mulf %42, %32 : vector<16x256xf32>
      %cst_26 = arith.constant 0.254829586 : f32
      %44 = vector.broadcast %cst_26 : f32 to vector<16x256xf32>
      %45 = arith.addf %43, %44 : vector<16x256xf32>
      %46 = arith.mulf %45, %32 : vector<16x256xf32>
      %cst_27 = arith.constant 0.000000e+00 : f32
      %47 = vector.broadcast %cst_27 : f32 to vector<16x256xf32>
      %48 = arith.subf %47, %26 : vector<16x256xf32>
      %49 = arith.mulf %48, %26 : vector<16x256xf32>
      %50 = math.exp %49 : vector<16x256xf32>
      %51 = arith.mulf %46, %50 : vector<16x256xf32>
      %cst_28 = arith.constant 1.000000e+00 : f32
      %52 = vector.broadcast %cst_28 : f32 to vector<16x256xf32>
      %53 = arith.subf %52, %51 : vector<16x256xf32>
      %54 = arith.mulf %25, %53 : vector<16x256xf32>
      %cst_29 = arith.constant 1.000000e+00 : f32
      %55 = vector.broadcast %cst_29 : f32 to vector<16x256xf32>
      %56 = arith.addf %55, %54 : vector<16x256xf32>
      %57 = arith.mulf %18, %56 : vector<16x256xf32>
      %c0_30 = arith.constant 0 : index
      %c0_31 = arith.constant 0 : index
      %58 = vector.load %arg6[%c0_30, %c0_31] : memref<16x256xf32, #tpu.memory_space<vmem>>, vector<16x256xf32>
      tpu.vector_store %arg6[%c0_30, %c0_31], %57 {strides = array<i32>} : memref<16x256xf32, #tpu.memory_space<vmem>>, vector<16x256xf32>,
    } else {
    }
    return
  }
  func.func @transform_0(%arg0: i32, %arg1: i32, %arg2: i32) -> (i32, i32) {
    %c0_i32 = arith.constant 0 : i32
    return %arg0, %arg2 : i32, i32
  }
  func.func @transform_1(%arg0: i32, %arg1: i32, %arg2: i32) -> (i32, i32) {
    %c0_i32 = arith.constant 0 : i32
    return %arg2, %arg1 : i32, i32
  }
  func.func @transform_2(%arg0: i32, %arg1: i32, %arg2: i32) -> (i32, i32) {
    %c0_i32 = arith.constant 0 : i32
    %c0_i32_0 = arith.constant 0 : i32
    return %c0_i32, %arg1 : i32, i32
  }
  func.func @transform_3(%arg0: i32, %arg1: i32, %arg2: i32) -> (i32, i32) {
    %c0_i32 = arith.constant 0 : i32
    return %arg0, %arg1 : i32, i32
  }
}

module attributes {stable_mosaic.version = 11 : i64} {
  func.func @_matmul_kernel(%arg0: i32, %arg1: i32, %arg2: i32, %arg3: memref<16x256xf32, #tpu.memory_space<vmem>>, %arg4: memref<256x128xbf16, #tpu.memory_space<vmem>>, %arg5: memref<1x128xf32, #tpu.memory_space<vmem>>, %arg6: memref<16x128xf32, #tpu.memory_space<vmem>>, %arg7: memref<16x128xf32, #tpu.memory_space<vmem>>) attributes {dimension_semantics = [#tpu.dimension_semantics<parallel>, #tpu.dimension_semantics<parallel>, #tpu.dimension_semantics<arbitrary>], iteration_bounds = array<i64: 1, 1, 2>, scalar_prefetch = 0 : i64, scratch_operands = 0 : i64, tpu.core_type = #tpu.core_type<tc>, window_params = [{transform_indices = @transform_0, window_bounds = array<i64: 16, 256>}, {transform_indices = @transform_1, window_bounds = array<i64: 256, 128>}, {transform_indices = @transform_2, window_bounds = array<i64: 1, 128>}, {transform_indices = @transform_3, window_bounds = array<i64: 16, 128>}, {transform_indices = @transform_4, window_bounds = array<i64: 16, 128>}]} {
    %c0_i32 = arith.constant 0 : i32
    %0 = arith.cmpi eq, %arg2, %c0_i32 : i32
    %1 = arith.extui %0 : i1 to i32
    %c0_i32_0 = arith.constant 0 : i32
    %2 = arith.cmpi ne, %1, %c0_i32_0 : i32
    scf.if %2 {
      %cst_9 = arith.constant 0.000000e+00 : f32
      %13 = vector.broadcast %cst_9 : f32 to vector<16x128xf32>
      %c0_10 = arith.constant 0 : index
      %c0_11 = arith.constant 0 : index
      %14 = vector.load %arg7[%c0_10, %c0_11] : memref<16x128xf32, #tpu.memory_space<vmem>>, vector<16x128xf32>
      tpu.vector_store %arg7[%c0_10, %c0_11], %13 {strides = array<i32>} : memref<16x128xf32, #tpu.memory_space<vmem>>, vector<16x128xf32>,
    } else {
    }
    %c0 = arith.constant 0 : index
    %c0_1 = arith.constant 0 : index
    %3 = vector.load %arg7[%c0, %c0_1] : memref<16x128xf32, #tpu.memory_space<vmem>>, vector<16x128xf32>
    %c0_2 = arith.constant 0 : index
    %c0_3 = arith.constant 0 : index
    %4 = vector.load %arg3[%c0_2, %c0_3] : memref<16x256xf32, #tpu.memory_space<vmem>>, vector<16x256xf32>
    %5 = arith.truncf %4 : vector<16x256xf32> to vector<16x256xbf16>
    %c0_4 = arith.constant 0 : index
    %c0_5 = arith.constant 0 : index
    %6 = vector.load %arg4[%c0_4, %c0_5] : memref<256x128xbf16, #tpu.memory_space<vmem>>, vector<256x128xbf16>
    %cst = arith.constant dense<0.000000e+00> : vector<16x128xf32>
    %7 = tpu.matmul %5, %6, %cst {dimension_numbers = #tpu.dot_dimension_numbers<[1], [0], [0], [1], [0, 0, 1, 1], [], []>} : vector<16x256xbf16>, vector<256x128xbf16>, vector<16x128xf32> -> vector<16x128xf32>
    %8 = arith.addf %3, %7 : vector<16x128xf32>
    %c0_6 = arith.constant 0 : index
    %c0_7 = arith.constant 0 : index
    %9 = vector.load %arg7[%c0_6, %c0_7] : memref<16x128xf32, #tpu.memory_space<vmem>>, vector<16x128xf32>
    tpu.vector_store %arg7[%c0_6, %c0_7], %8 {strides = array<i32>} : memref<16x128xf32, #tpu.memory_space<vmem>>, vector<16x128xf32>,
    %c1_i32 = arith.constant 1 : i32
    %10 = arith.cmpi eq, %arg2, %c1_i32 : i32
    %11 = arith.extui %10 : i1 to i32
    %c0_i32_8 = arith.constant 0 : i32
    %12 = arith.cmpi ne, %11, %c0_i32_8 : i32
    scf.if %12 {
      %c0_9 = arith.constant 0 : index
      %c0_10 = arith.constant 0 : index
      %13 = vector.load %arg7[%c0_9, %c0_10] : memref<16x128xf32, #tpu.memory_space<vmem>>, vector<16x128xf32>
      %c0_11 = arith.constant 0 : index
      %c0_12 = arith.constant 0 : index
      %14 = vector.load %arg5[%c0_11, %c0_12] : memref<1x128xf32, #tpu.memory_space<vmem>>, vector<1x128xf32>
      %15 = vector.broadcast %14 : vector<1x128xf32> to vector<16x128xf32>
      %16 = arith.addf %13, %15 : vector<16x128xf32>
      %c0_13 = arith.constant 0 : index
      %c0_14 = arith.constant 0 : index
      %17 = vector.load %arg6[%c0_13, %c0_14] : memref<16x128xf32, #tpu.memory_space<vmem>>, vector<16x128xf32>
      %18 = arith.addf %16, %17 : vector<16x128xf32>
      %c0_15 = arith.constant 0 : index
      %c0_16 = arith.constant 0 : index
      %19 = vector.load %arg7[%c0_15, %c0_16] : memref<16x128xf32, #tpu.memory_space<vmem>>, vector<16x128xf32>
      tpu.vector_store %arg7[%c0_15, %c0_16], %18 {strides = array<i32>} : memref<16x128xf32, #tpu.memory_space<vmem>>, vector<16x128xf32>,
    } else {
    }
    return
  }
  func.func @transform_0(%arg0: i32, %arg1: i32, %arg2: i32) -> (i32, i32) {
    %c0_i32 = arith.constant 0 : i32
    return %arg0, %arg2 : i32, i32
  }
  func.func @transform_1(%arg0: i32, %arg1: i32, %arg2: i32) -> (i32, i32) {
    %c0_i32 = arith.constant 0 : i32
    return %arg2, %arg1 : i32, i32
  }
  func.func @transform_2(%arg0: i32, %arg1: i32, %arg2: i32) -> (i32, i32) {
    %c0_i32 = arith.constant 0 : i32
    %c0_i32_0 = arith.constant 0 : i32
    return %c0_i32, %arg1 : i32, i32
  }
  func.func @transform_3(%arg0: i32, %arg1: i32, %arg2: i32) -> (i32, i32) {
    %c0_i32 = arith.constant 0 : i32
    return %arg0, %arg1 : i32, i32
  }
  func.func @transform_4(%arg0: i32, %arg1: i32, %arg2: i32) -> (i32, i32) {
    %c0_i32 = arith.constant 0 : i32
    return %arg0, %arg1 : i32, i32
  }
}

module attributes {stable_mosaic.version = 11 : i64} {
  func.func @_matmul_kernel(%arg0: i32, %arg1: i32, %arg2: i32, %arg3: memref<16x128xf32, #tpu.memory_space<vmem>>, %arg4: memref<128x256xbf16, #tpu.memory_space<vmem>>, %arg5: memref<1x256xf32, #tpu.memory_space<vmem>>, %arg6: memref<16x256xf32, #tpu.memory_space<vmem>>) attributes {dimension_semantics = [#tpu.dimension_semantics<parallel>, #tpu.dimension_semantics<parallel>, #tpu.dimension_semantics<arbitrary>], iteration_bounds = array<i64: 1, 1, 1>, scalar_prefetch = 0 : i64, scratch_operands = 0 : i64, tpu.core_type = #tpu.core_type<tc>, window_params = [{transform_indices = @transform_0, window_bounds = array<i64: 16, 128>}, {transform_indices = @transform_1, window_bounds = array<i64: 128, 256>}, {transform_indices = @transform_2, window_bounds = array<i64: 1, 256>}, {transform_indices = @transform_3, window_bounds = array<i64: 16, 256>}]} {
    %c0_i32 = arith.constant 0 : i32
    %0 = arith.cmpi eq, %arg2, %c0_i32 : i32
    %1 = arith.extui %0 : i1 to i32
    %c0_i32_0 = arith.constant 0 : i32
    %2 = arith.cmpi ne, %1, %c0_i32_0 : i32
    scf.if %2 {
      %cst_10 = arith.constant 0.000000e+00 : f32
      %13 = vector.broadcast %cst_10 : f32 to vector<16x256xf32>
      %c0_11 = arith.constant 0 : index
      %c0_12 = arith.constant 0 : index
      %14 = vector.load %arg6[%c0_11, %c0_12] : memref<16x256xf32, #tpu.memory_space<vmem>>, vector<16x256xf32>
      tpu.vector_store %arg6[%c0_11, %c0_12], %13 {strides = array<i32>} : memref<16x256xf32, #tpu.memory_space<vmem>>, vector<16x256xf32>,
    } else {
    }
    %c0 = arith.constant 0 : index
    %c0_1 = arith.constant 0 : index
    %3 = vector.load %arg6[%c0, %c0_1] : memref<16x256xf32, #tpu.memory_space<vmem>>, vector<16x256xf32>
    %c0_2 = arith.constant 0 : index
    %c0_3 = arith.constant 0 : index
    %4 = vector.load %arg3[%c0_2, %c0_3] : memref<16x128xf32, #tpu.memory_space<vmem>>, vector<16x128xf32>
    %5 = arith.truncf %4 : vector<16x128xf32> to vector<16x128xbf16>
    %c0_4 = arith.constant 0 : index
    %c0_5 = arith.constant 0 : index
    %6 = vector.load %arg4[%c0_4, %c0_5] : memref<128x256xbf16, #tpu.memory_space<vmem>>, vector<128x256xbf16>
    %cst = arith.constant dense<0.000000e+00> : vector<16x256xf32>
    %7 = tpu.matmul %5, %6, %cst {dimension_numbers = #tpu.dot_dimension_numbers<[1], [0], [0], [1], [0, 0, 1, 1], [], []>} : vector<16x128xbf16>, vector<128x256xbf16>, vector<16x256xf32> -> vector<16x256xf32>
    %8 = arith.addf %3, %7 : vector<16x256xf32>
    %c0_6 = arith.constant 0 : index
    %c0_7 = arith.constant 0 : index
    %9 = vector.load %arg6[%c0_6, %c0_7] : memref<16x256xf32, #tpu.memory_space<vmem>>, vector<16x256xf32>
    tpu.vector_store %arg6[%c0_6, %c0_7], %8 {strides = array<i32>} : memref<16x256xf32, #tpu.memory_space<vmem>>, vector<16x256xf32>,
    %c0_i32_8 = arith.constant 0 : i32
    %10 = arith.cmpi eq, %arg2, %c0_i32_8 : i32
    %11 = arith.extui %10 : i1 to i32
    %c0_i32_9 = arith.constant 0 : i32
    %12 = arith.cmpi ne, %11, %c0_i32_9 : i32
    scf.if %12 {
      %c0_10 = arith.constant 0 : index
      %c0_11 = arith.constant 0 : index
      %13 = vector.load %arg6[%c0_10, %c0_11] : memref<16x256xf32, #tpu.memory_space<vmem>>, vector<16x256xf32>
      %c0_12 = arith.constant 0 : index
      %c0_13 = arith.constant 0 : index
      %14 = vector.load %arg5[%c0_12, %c0_13] : memref<1x256xf32, #tpu.memory_space<vmem>>, vector<1x256xf32>
      %15 = vector.broadcast %14 : vector<1x256xf32> to vector<16x256xf32>
      %16 = arith.addf %13, %15 : vector<16x256xf32>
      %c0_14 = arith.constant 0 : index
      %c0_15 = arith.constant 0 : index
      %17 = vector.load %arg6[%c0_14, %c0_15] : memref<16x256xf32, #tpu.memory_space<vmem>>, vector<16x256xf32>
      tpu.vector_store %arg6[%c0_14, %c0_15], %16 {strides = array<i32>} : memref<16x256xf32, #tpu.memory_space<vmem>>, vector<16x256xf32>,
    } else {
    }
    return
  }
  func.func @transform_0(%arg0: i32, %arg1: i32, %arg2: i32) -> (i32, i32) {
    %c0_i32 = arith.constant 0 : i32
    return %arg0, %arg2 : i32, i32
  }
  func.func @transform_1(%arg0: i32, %arg1: i32, %arg2: i32) -> (i32, i32) {
    %c0_i32 = arith.constant 0 : i32
    return %arg2, %arg1 : i32, i32
  }
  func.func @transform_2(%arg0: i32, %arg1: i32, %arg2: i32) -> (i32, i32) {
    %c0_i32 = arith.constant 0 : i32
    %c0_i32_0 = arith.constant 0 : i32
    return %c0_i32, %arg1 : i32, i32
  }
  func.func @transform_3(%arg0: i32, %arg1: i32, %arg2: i32) -> (i32, i32) {
    %c0_i32 = arith.constant 0 : i32
    return %arg0, %arg1 : i32, i32
  }
}

module attributes {stable_mosaic.version = 11 : i64} {
  func.func @_matmul_kernel(%arg0: i32, %arg1: i32, %arg2: i32, %arg3: memref<16x128xf32, #tpu.memory_space<vmem>>, %arg4: memref<128x128xbf16, #tpu.memory_space<vmem>>, %arg5: memref<1x128xf32, #tpu.memory_space<vmem>>, %arg6: memref<16x128xf32, #tpu.memory_space<vmem>>) attributes {dimension_semantics = [#tpu.dimension_semantics<parallel>, #tpu.dimension_semantics<parallel>, #tpu.dimension_semantics<arbitrary>], iteration_bounds = array<i64: 1, 1, 1>, scalar_prefetch = 0 : i64, scratch_operands = 0 : i64, tpu.core_type = #tpu.core_type<tc>, window_params = [{transform_indices = @transform_0, window_bounds = array<i64: 16, 128>}, {transform_indices = @transform_1, window_bounds = array<i64: 128, 128>}, {transform_indices = @transform_2, window_bounds = array<i64: 1, 128>}, {transform_indices = @transform_3, window_bounds = array<i64: 16, 128>}]} {
    %c0_i32 = arith.constant 0 : i32
    %0 = arith.cmpi eq, %arg2, %c0_i32 : i32
    %1 = arith.extui %0 : i1 to i32
    %c0_i32_0 = arith.constant 0 : i32
    %2 = arith.cmpi ne, %1, %c0_i32_0 : i32
    scf.if %2 {
      %cst_10 = arith.constant 0.000000e+00 : f32
      %13 = vector.broadcast %cst_10 : f32 to vector<16x128xf32>
      %c0_11 = arith.constant 0 : index
      %c0_12 = arith.constant 0 : index
      %14 = vector.load %arg6[%c0_11, %c0_12] : memref<16x128xf32, #tpu.memory_space<vmem>>, vector<16x128xf32>
      tpu.vector_store %arg6[%c0_11, %c0_12], %13 {strides = array<i32>} : memref<16x128xf32, #tpu.memory_space<vmem>>, vector<16x128xf32>,
    } else {
    }
    %c0 = arith.constant 0 : index
    %c0_1 = arith.constant 0 : index
    %3 = vector.load %arg6[%c0, %c0_1] : memref<16x128xf32, #tpu.memory_space<vmem>>, vector<16x128xf32>
    %c0_2 = arith.constant 0 : index
    %c0_3 = arith.constant 0 : index
    %4 = vector.load %arg3[%c0_2, %c0_3] : memref<16x128xf32, #tpu.memory_space<vmem>>, vector<16x128xf32>
    %5 = arith.truncf %4 : vector<16x128xf32> to vector<16x128xbf16>
    %c0_4 = arith.constant 0 : index
    %c0_5 = arith.constant 0 : index
    %6 = vector.load %arg4[%c0_4, %c0_5] : memref<128x128xbf16, #tpu.memory_space<vmem>>, vector<128x128xbf16>
    %cst = arith.constant dense<0.000000e+00> : vector<16x128xf32>
    %7 = tpu.matmul %5, %6, %cst {dimension_numbers = #tpu.dot_dimension_numbers<[1], [0], [0], [1], [0, 0, 1, 1], [], []>} : vector<16x128xbf16>, vector<128x128xbf16>, vector<16x128xf32> -> vector<16x128xf32>
    %8 = arith.addf %3, %7 : vector<16x128xf32>
    %c0_6 = arith.constant 0 : index
    %c0_7 = arith.constant 0 : index
    %9 = vector.load %arg6[%c0_6, %c0_7] : memref<16x128xf32, #tpu.memory_space<vmem>>, vector<16x128xf32>
    tpu.vector_store %arg6[%c0_6, %c0_7], %8 {strides = array<i32>} : memref<16x128xf32, #tpu.memory_space<vmem>>, vector<16x128xf32>,
    %c0_i32_8 = arith.constant 0 : i32
    %10 = arith.cmpi eq, %arg2, %c0_i32_8 : i32
    %11 = arith.extui %10 : i1 to i32
    %c0_i32_9 = arith.constant 0 : i32
    %12 = arith.cmpi ne, %11, %c0_i32_9 : i32
    scf.if %12 {
      %c0_10 = arith.constant 0 : index
      %c0_11 = arith.constant 0 : index
      %13 = vector.load %arg6[%c0_10, %c0_11] : memref<16x128xf32, #tpu.memory_space<vmem>>, vector<16x128xf32>
      %c0_12 = arith.constant 0 : index
      %c0_13 = arith.constant 0 : index
      %14 = vector.load %arg5[%c0_12, %c0_13] : memref<1x128xf32, #tpu.memory_space<vmem>>, vector<1x128xf32>
      %15 = vector.broadcast %14 : vector<1x128xf32> to vector<16x128xf32>
      %16 = arith.addf %13, %15 : vector<16x128xf32>
      %c0_14 = arith.constant 0 : index
      %c0_15 = arith.constant 0 : index
      %17 = vector.load %arg6[%c0_14, %c0_15] : memref<16x128xf32, #tpu.memory_space<vmem>>, vector<16x128xf32>
      tpu.vector_store %arg6[%c0_14, %c0_15], %16 {strides = array<i32>} : memref<16x128xf32, #tpu.memory_space<vmem>>, vector<16x128xf32>,
    } else {
    }
    return
  }
  func.func @transform_0(%arg0: i32, %arg1: i32, %arg2: i32) -> (i32, i32) {
    %c0_i32 = arith.constant 0 : i32
    return %arg0, %arg2 : i32, i32
  }
  func.func @transform_1(%arg0: i32, %arg1: i32, %arg2: i32) -> (i32, i32) {
    %c0_i32 = arith.constant 0 : i32
    return %arg2, %arg1 : i32, i32
  }
  func.func @transform_2(%arg0: i32, %arg1: i32, %arg2: i32) -> (i32, i32) {
    %c0_i32 = arith.constant 0 : i32
    %c0_i32_0 = arith.constant 0 : i32
    return %c0_i32, %arg1 : i32, i32
  }
  func.func @transform_3(%arg0: i32, %arg1: i32, %arg2: i32) -> (i32, i32) {
    %c0_i32 = arith.constant 0 : i32
    return %arg0, %arg1 : i32, i32
  }
}

module attributes {stable_mosaic.version = 11 : i64} {
  func.func @_attention_kernel(%arg0: i32, %arg1: i32, %arg2: i32, %arg3: i32, %arg4: memref<1x8x128xf32, #tpu.memory_space<vmem>>, %arg5: memref<1x8x128xf32, #tpu.memory_space<vmem>>, %arg6: memref<1x8x128xf32, #tpu.memory_space<vmem>>, %arg7: memref<1x8x128xf32, #tpu.memory_space<vmem>>, %arg8: memref<2x8x1xf32, #tpu.memory_space<vmem>>, %arg9: memref<2x8x1xf32, #tpu.memory_space<vmem>>, %arg10: memref<8x128xf32, #tpu.memory_space<vmem>>) attributes {dimension_semantics = [#tpu.dimension_semantics<parallel>, #tpu.dimension_semantics<parallel>, #tpu.dimension_semantics<parallel>, #tpu.dimension_semantics<arbitrary>], iteration_bounds = array<i64: 2, 1, 1, 1>, scalar_prefetch = 0 : i64, scratch_operands = 3 : i64, tpu.core_type = #tpu.core_type<tc>, window_params = [{transform_indices = @transform_0, window_bounds = array<i64: 1, 8, 128>}, {transform_indices = @transform_1, window_bounds = array<i64: 1, 8, 128>}, {transform_indices = @transform_2, window_bounds = array<i64: 1, 8, 128>}, {transform_indices = @transform_3, window_bounds = array<i64: 1, 8, 128>}]} {
    %c0_i32 = arith.constant 0 : i32
    %0 = arith.cmpi eq, %arg3, %c0_i32 : i32
    %1 = arith.extui %0 : i1 to i32
    %c0_i32_0 = arith.constant 0 : i32
    %2 = arith.cmpi ne, %1, %c0_i32_0 : i32
    scf.if %2 {
      %cst = arith.constant 0xFF800000 : f32
      %14 = vector.broadcast %cst : f32 to vector<2x8x1xf32>
      %c0 = arith.constant 0 : index
      %c0_5 = arith.constant 0 : index
      %c0_6 = arith.constant 0 : index
      %15 = vector.load %arg8[%c0, %c0_5, %c0_6] : memref<2x8x1xf32, #tpu.memory_space<vmem>>, vector<2x8x1xf32>
      tpu.vector_store %arg8[%c0, %c0_5, %c0_6], %14 {strides = array<i32>} : memref<2x8x1xf32, #tpu.memory_space<vmem>>, vector<2x8x1xf32>,
      %cst_7 = arith.constant 0.000000e+00 : f32
      %16 = vector.broadcast %cst_7 : f32 to vector<2x8x1xf32>
      %c0_8 = arith.constant 0 : index
      %c0_9 = arith.constant 0 : index
      %c0_10 = arith.constant 0 : index
      %17 = vector.load %arg9[%c0_8, %c0_9, %c0_10] : memref<2x8x1xf32, #tpu.memory_space<vmem>>, vector<2x8x1xf32>
      tpu.vector_store %arg9[%c0_8, %c0_9, %c0_10], %16 {strides = array<i32>} : memref<2x8x1xf32, #tpu.memory_space<vmem>>, vector<2x8x1xf32>,
      %cst_11 = arith.constant 0.000000e+00 : f32
      %18 = vector.broadcast %cst_11 : f32 to vector<8x128xf32>
      %c0_12 = arith.constant 0 : index
      %c0_13 = arith.constant 0 : index
      %19 = vector.load %arg10[%c0_12, %c0_13] : memref<8x128xf32, #tpu.memory_space<vmem>>, vector<8x128xf32>
      tpu.vector_store %arg10[%c0_12, %c0_13], %18 {strides = array<i32>} : memref<8x128xf32, #tpu.memory_space<vmem>>, vector<8x128xf32>,
    } else {
    }
    %c8_i32 = arith.constant 8 : i32
    %3 = arith.muli %arg3, %c8_i32 : i32
    %c6_i32 = arith.constant 6 : i32
    %4 = arith.cmpi slt, %3, %c6_i32 : i32
    %c8_i32_1 = arith.constant 8 : i32
    %5 = arith.muli %arg2, %c8_i32_1 : i32
    %c7_i32 = arith.constant 7 : i32
    %6 = arith.addi %5, %c7_i32 : i32
    %7 = arith.cmpi sle, %3, %6 : i32
    %8 = arith.andi %4, %7 : i1
    %9 = arith.extui %8 : i1 to i32
    %c0_i32_2 = arith.constant 0 : i32
    %10 = arith.cmpi ne, %9, %c0_i32_2 : i32
    scf.if %10 {
      %c0 = arith.constant 0 : index
      %c0_5 = arith.constant 0 : index
      %c0_6 = arith.constant 0 : index
      %14 = vector.load %arg4[%c0, %c0_5, %c0_6] : memref<1x8x128xf32, #tpu.memory_space<vmem>>, vector<1x8x128xf32>
      %15 = vector.shape_cast %14 : vector<1x8x128xf32> to vector<8x128xf32>
      %16 = arith.truncf %15 : vector<8x128xf32> to vector<8x128xbf16>
      %c0_7 = arith.constant 0 : index
      %c0_8 = arith.constant 0 : index
      %c0_9 = arith.constant 0 : index
      %17 = vector.load %arg5[%c0_7, %c0_8, %c0_9] : memref<1x8x128xf32, #tpu.memory_space<vmem>>, vector<1x8x128xf32>
      %18 = vector.shape_cast %17 : vector<1x8x128xf32> to vector<8x128xf32>
      %19 = arith.truncf %18 : vector<8x128xf32> to vector<8x128xbf16>
      %c0_10 = arith.constant 0 : index
      %c0_11 = arith.constant 0 : index
      %c0_12 = arith.constant 0 : index
      %20 = vector.load %arg6[%c0_10, %c0_11, %c0_12] : memref<1x8x128xf32, #tpu.memory_space<vmem>>, vector<1x8x128xf32>
      %21 = vector.shape_cast %20 : vector<1x8x128xf32> to vector<8x128xf32>
      %22 = arith.truncf %21 : vector<8x128xf32> to vector<8x128xbf16>
      %23 = tpu.iota {dimensions = array<i32: 1>} : vector<8x8xi32>
      %24 = vector.broadcast %3 : i32 to vector<8x8xi32>
      %25 = arith.addi %24, %23 : vector<8x8xi32>
      %c6_i32_13 = arith.constant 6 : i32
      %26 = vector.broadcast %c6_i32_13 : i32 to vector<8x8xi32>
      %27 = arith.cmpi slt, %25, %26 : vector<8x8xi32>
      %c8_i32_14 = arith.constant 8 : i32
      %28 = arith.muli %arg2, %c8_i32_14 : i32
      %29 = tpu.iota {dimensions = array<i32: 0>} : vector<8x8xi32>
      %30 = vector.broadcast %28 : i32 to vector<8x8xi32>
      %31 = arith.addi %30, %29 : vector<8x8xi32>
      %32 = arith.cmpi sle, %25, %31 : vector<8x8xi32>
      %33 = arith.andi %27, %32 : vector<8x8xi1>
      %34 = vector.extract_strided_slice %16 {offsets = [0, 0], sizes = [8, 64], strides = [1, 1]} : vector<8x128xbf16> to vector<8x64xbf16>
      %35 = vector.extract_strided_slice %19 {offsets = [0, 0], sizes = [8, 64], strides = [1, 1]} : vector<8x128xbf16> to vector<8x64xbf16>
      %cst = arith.constant dense<0.000000e+00> : vector<8x8xf32>
      %36 = tpu.matmul %34, %35, %cst {dimension_numbers = #tpu.dot_dimension_numbers<[1], [1], [0], [0], [0, 0, 1, 0], [], []>} : vector<8x64xbf16>, vector<8x64xbf16>, vector<8x8xf32> -> vector<8x8xf32>
      %cst_15 = arith.constant -1.000000e+30 : f32
      %37 = vector.broadcast %cst_15 : f32 to vector<8x8xf32>
      %38 = arith.select %33, %36, %37 : vector<8x8xi1>, vector<8x8xf32>
      %c0_16 = arith.constant 0 : index
      %c0_17 = arith.constant 0 : index
      %c0_18 = arith.constant 0 : index
      %39 = vector.load %arg8[%c0_16, %c0_17, %c0_18] : memref<2x8x1xf32, #tpu.memory_space<vmem>>, vector<1x8x1xf32>
      %40 = vector.shape_cast %39 : vector<1x8x1xf32> to vector<8x1xf32>
      %cst_19 = arith.constant dense<0xFF800000> : vector<8xf32>
      %41 = vector.multi_reduction <maximumf>, %38, %cst_19 [1] : vector<8x8xf32> to vector<8xf32>
      %42 = vector.shape_cast %41 : vector<8xf32> to vector<8x1xf32>
      %43 = arith.maximumf %40, %42 : vector<8x1xf32>
      %44 = arith.subf %40, %43 : vector<8x1xf32>
      %45 = math.exp %44 : vector<8x1xf32>
      %46 = vector.broadcast %43 : vector<8x1xf32> to vector<8x8xf32>
      %47 = arith.subf %38, %46 : vector<8x8xf32>
      %48 = math.exp %47 : vector<8x8xf32>
      %c0_20 = arith.constant 0 : index
      %c0_21 = arith.constant 0 : index
      %c0_22 = arith.constant 0 : index
      %49 = vector.load %arg9[%c0_20, %c0_21, %c0_22] : memref<2x8x1xf32, #tpu.memory_space<vmem>>, vector<1x8x1xf32>
      %50 = vector.shape_cast %49 : vector<1x8x1xf32> to vector<8x1xf32>
      %51 = arith.mulf %45, %50 : vector<8x1xf32>
      %cst_23 = arith.constant dense<0.000000e+00> : vector<8xf32>
      %52 = vector.multi_reduction <add>, %48, %cst_23 [1] : vector<8x8xf32> to vector<8xf32>
      %53 = vector.shape_cast %52 : vector<8xf32> to vector<8x1xf32>
      %54 = arith.addf %51, %53 : vector<8x1xf32>
      %c0_24 = arith.constant 0 : index
      %c0_25 = arith.constant 0 : index
      %c0_26 = arith.constant 0 : index
      %55 = vector.load %arg9[%c0_24, %c0_25, %c0_26] : memref<2x8x1xf32, #tpu.memory_space<vmem>>, vector<1x8x1xf32>
      %56 = vector.shape_cast %55 : vector<1x8x1xf32> to vector<8x1xf32>
      %57 = vector.shape_cast %54 : vector<8x1xf32> to vector<1x8x1xf32>
      tpu.vector_store %arg9[%c0_24, %c0_25, %c0_26], %57 {strides = array<i32>} : memref<2x8x1xf32, #tpu.memory_space<vmem>>, vector<1x8x1xf32>,
      %c0_27 = arith.constant 0 : index
      %c0_28 = arith.constant 0 : index
      %c0_29 = arith.constant 0 : index
      %58 = vector.load %arg8[%c0_27, %c0_28, %c0_29] : memref<2x8x1xf32, #tpu.memory_space<vmem>>, vector<1x8x1xf32>
      %59 = vector.shape_cast %58 : vector<1x8x1xf32> to vector<8x1xf32>
      %60 = vector.shape_cast %43 : vector<8x1xf32> to vector<1x8x1xf32>
      tpu.vector_store %arg8[%c0_27, %c0_28, %c0_29], %60 {strides = array<i32>} : memref<2x8x1xf32, #tpu.memory_space<vmem>>, vector<1x8x1xf32>,
      %61 = vector.shape_cast %45 : vector<8x1xf32> to vector<8x1xf32>
      %62 = vector.broadcast %61 : vector<8x1xf32> to vector<8x64xf32>
      %63 = arith.truncf %48 : vector<8x8xf32> to vector<8x8xbf16>
      %64 = vector.extract_strided_slice %22 {offsets = [0, 0], sizes = [8, 64], strides = [1, 1]} : vector<8x128xbf16> to vector<8x64xbf16>
      %cst_30 = arith.constant dense<0.000000e+00> : vector<8x64xf32>
      %65 = tpu.matmul %63, %64, %cst_30 {dimension_numbers = #tpu.dot_dimension_numbers<[1], [0], [0], [1], [0, 0, 1, 1], [], []>} : vector<8x8xbf16>, vector<8x64xbf16>, vector<8x64xf32> -> vector<8x64xf32>
      %66 = vector.extract_strided_slice %16 {offsets = [0, 64], sizes = [8, 64], strides = [1, 1]} : vector<8x128xbf16> to vector<8x64xbf16>
      %67 = vector.extract_strided_slice %19 {offsets = [0, 64], sizes = [8, 64], strides = [1, 1]} : vector<8x128xbf16> to vector<8x64xbf16>
      %cst_31 = arith.constant dense<0.000000e+00> : vector<8x8xf32>
      %68 = tpu.matmul %66, %67, %cst_31 {dimension_numbers = #tpu.dot_dimension_numbers<[1], [1], [0], [0], [0, 0, 1, 0], [], []>} : vector<8x64xbf16>, vector<8x64xbf16>, vector<8x8xf32> -> vector<8x8xf32>
      %cst_32 = arith.constant -1.000000e+30 : f32
      %69 = vector.broadcast %cst_32 : f32 to vector<8x8xf32>
      %70 = arith.select %33, %68, %69 : vector<8x8xi1>, vector<8x8xf32>
      %c1 = arith.constant 1 : index
      %c0_33 = arith.constant 0 : index
      %c0_34 = arith.constant 0 : index
      %71 = vector.load %arg8[%c1, %c0_33, %c0_34] : memref<2x8x1xf32, #tpu.memory_space<vmem>>, vector<1x8x1xf32>
      %72 = vector.shape_cast %71 : vector<1x8x1xf32> to vector<8x1xf32>
      %cst_35 = arith.constant dense<0xFF800000> : vector<8xf32>
      %73 = vector.multi_reduction <maximumf>, %70, %cst_35 [1] : vector<8x8xf32> to vector<8xf32>
      %74 = vector.shape_cast %73 : vector<8xf32> to vector<8x1xf32>
      %75 = arith.maximumf %72, %74 : vector<8x1xf32>
      %76 = arith.subf %72, %75 : vector<8x1xf32>
      %77 = math.exp %76 : vector<8x1xf32>
      %78 = vector.broadcast %75 : vector<8x1xf32> to vector<8x8xf32>
      %79 = arith.subf %70, %78 : vector<8x8xf32>
      %80 = math.exp %79 : vector<8x8xf32>
      %c1_36 = arith.constant 1 : index
      %c0_37 = arith.constant 0 : index
      %c0_38 = arith.constant 0 : index
      %81 = vector.load %arg9[%c1_36, %c0_37, %c0_38] : memref<2x8x1xf32, #tpu.memory_space<vmem>>, vector<1x8x1xf32>
      %82 = vector.shape_cast %81 : vector<1x8x1xf32> to vector<8x1xf32>
      %83 = arith.mulf %77, %82 : vector<8x1xf32>
      %cst_39 = arith.constant dense<0.000000e+00> : vector<8xf32>
      %84 = vector.multi_reduction <add>, %80, %cst_39 [1] : vector<8x8xf32> to vector<8xf32>
      %85 = vector.shape_cast %84 : vector<8xf32> to vector<8x1xf32>
      %86 = arith.addf %83, %85 : vector<8x1xf32>
      %c1_40 = arith.constant 1 : index
      %c0_41 = arith.constant 0 : index
      %c0_42 = arith.constant 0 : index
      %87 = vector.load %arg9[%c1_40, %c0_41, %c0_42] : memref<2x8x1xf32, #tpu.memory_space<vmem>>, vector<1x8x1xf32>
      %88 = vector.shape_cast %87 : vector<1x8x1xf32> to vector<8x1xf32>
      %89 = vector.shape_cast %86 : vector<8x1xf32> to vector<1x8x1xf32>
      tpu.vector_store %arg9[%c1_40, %c0_41, %c0_42], %89 {strides = array<i32>} : memref<2x8x1xf32, #tpu.memory_space<vmem>>, vector<1x8x1xf32>,
      %c1_43 = arith.constant 1 : index
      %c0_44 = arith.constant 0 : index
      %c0_45 = arith.constant 0 : index
      %90 = vector.load %arg8[%c1_43, %c0_44, %c0_45] : memref<2x8x1xf32, #tpu.memory_space<vmem>>, vector<1x8x1xf32>
      %91 = vector.shape_cast %90 : vector<1x8x1xf32> to vector<8x1xf32>
      %92 = vector.shape_cast %75 : vector<8x1xf32> to vector<1x8x1xf32>
      tpu.vector_store %arg8[%c1_43, %c0_44, %c0_45], %92 {strides = array<i32>} : memref<2x8x1xf32, #tpu.memory_space<vmem>>, vector<1x8x1xf32>,
      %93 = vector.shape_cast %77 : vector<8x1xf32> to vector<8x1xf32>
      %94 = vector.broadcast %93 : vector<8x1xf32> to vector<8x64xf32>
      %95 = arith.truncf %80 : vector<8x8xf32> to vector<8x8xbf16>
      %96 = vector.extract_strided_slice %22 {offsets = [0, 64], sizes = [8, 64], strides = [1, 1]} : vector<8x128xbf16> to vector<8x64xbf16>
      %cst_46 = arith.constant dense<0.000000e+00> : vector<8x64xf32>
      %97 = tpu.matmul %95, %96, %cst_46 {dimension_numbers = #tpu.dot_dimension_numbers<[1], [0], [0], [1], [0, 0, 1, 1], [], []>} : vector<8x8xbf16>, vector<8x64xbf16>, vector<8x64xf32> -> vector<8x64xf32>
      %98 = tpu.concatenate %62, %94 in 1 : vector<8x64xf32>, vector<8x64xf32> -> vector<8x128xf32>
      %99 = tpu.concatenate %65, %97 in 1 : vector<8x64xf32>, vector<8x64xf32> -> vector<8x128xf32>
      %c0_47 = arith.constant 0 : index
      %c0_48 = arith.constant 0 : index
      %100 = vector.load %arg10[%c0_47, %c0_48] : memref<8x128xf32, #tpu.memory_space<vmem>>, vector<8x128xf32>
      %101 = arith.mulf %98, %100 : vector<8x128xf32>
      %102 = arith.addf %101, %99 : vector<8x128xf32>
      %c0_49 = arith.constant 0 : index
      %c0_50 = arith.constant 0 : index
      %103 = vector.load %arg10[%c0_49, %c0_50] : memref<8x128xf32, #tpu.memory_space<vmem>>, vector<8x128xf32>
      tpu.vector_store %arg10[%c0_49, %c0_50], %102 {strides = array<i32>} : memref<8x128xf32, #tpu.memory_space<vmem>>, vector<8x128xf32>,
    } else {
    }
    %c0_i32_3 = arith.constant 0 : i32
    %11 = arith.cmpi eq, %arg3, %c0_i32_3 : i32
    %12 = arith.extui %11 : i1 to i32
    %c0_i32_4 = arith.constant 0 : i32
    %13 = arith.cmpi ne, %12, %c0_i32_4 : i32
    scf.if %13 {
      %c0 = arith.constant 0 : index
      %c0_5 = arith.constant 0 : index
      %c0_6 = arith.constant 0 : index
      %14 = vector.load %arg9[%c0, %c0_5, %c0_6] : memref<2x8x1xf32, #tpu.memory_space<vmem>>, vector<1x8x1xf32>
      %15 = vector.shape_cast %14 : vector<1x8x1xf32> to vector<8x1xf32>
      %16 = tpu.reciprocal %15 {approx = true} : vector<8x1xf32> -> vector<8x1xf32>
      %17 = vector.shape_cast %16 : vector<8x1xf32> to vector<8x1xf32>
      %18 = vector.broadcast %17 : vector<8x1xf32> to vector<8x64xf32>
      %c1 = arith.constant 1 : index
      %c0_7 = arith.constant 0 : index
      %c0_8 = arith.constant 0 : index
      %19 = vector.load %arg9[%c1, %c0_7, %c0_8] : memref<2x8x1xf32, #tpu.memory_space<vmem>>, vector<1x8x1xf32>
      %20 = vector.shape_cast %19 : vector<1x8x1xf32> to vector<8x1xf32>
      %21 = tpu.reciprocal %20 {approx = true} : vector<8x1xf32> -> vector<8x1xf32>
      %22 = vector.shape_cast %21 : vector<8x1xf32> to vector<8x1xf32>
      %23 = vector.broadcast %22 : vector<8x1xf32> to vector<8x64xf32>
      %24 = tpu.concatenate %18, %23 in 1 : vector<8x64xf32>, vector<8x64xf32> -> vector<8x128xf32>
      %c0_9 = arith.constant 0 : index
      %c0_10 = arith.constant 0 : index
      %25 = vector.load %arg10[%c0_9, %c0_10] : memref<8x128xf32, #tpu.memory_space<vmem>>, vector<8x128xf32>
      %26 = arith.mulf %25, %24 : vector<8x128xf32>
      %c0_11 = arith.constant 0 : index
      %c0_12 = arith.constant 0 : index
      %c0_13 = arith.constant 0 : index
      %27 = vector.load %arg7[%c0_11, %c0_12, %c0_13] : memref<1x8x128xf32, #tpu.memory_space<vmem>>, vector<1x8x128xf32>
      %28 = vector.shape_cast %27 : vector<1x8x128xf32> to vector<8x128xf32>
      %29 = vector.shape_cast %26 : vector<8x128xf32> to vector<1x8x128xf32>
      tpu.vector_store %arg7[%c0_11, %c0_12, %c0_13], %29 {strides = array<i32>} : memref<1x8x128xf32, #tpu.memory_space<vmem>>, vector<1x8x128xf32>,
    } else {
    }
    return
  }
  func.func @transform_0(%arg0: i32, %arg1: i32, %arg2: i32, %arg3: i32) -> (i32, i32, i32) {
    %c0_i32 = arith.constant 0 : i32
    return %arg0, %arg2, %arg1 : i32, i32, i32
  }
  func.func @transform_1(%arg0: i32, %arg1: i32, %arg2: i32, %arg3: i32) -> (i32, i32, i32) {
    %c1_i32 = arith.constant 1 : i32
    %0 = arith.addi %c1_i32, %arg1 : i32
    %c0_i32 = arith.constant 0 : i32
    return %arg0, %arg3, %0 : i32, i32, i32
  }
  func.func @transform_2(%arg0: i32, %arg1: i32, %arg2: i32, %arg3: i32) -> (i32, i32, i32) {
    %c2_i32 = arith.constant 2 : i32
    %0 = arith.addi %c2_i32, %arg1 : i32
    %c0_i32 = arith.constant 0 : i32
    return %arg0, %arg3, %0 : i32, i32, i32
  }
  func.func @transform_3(%arg0: i32, %arg1: i32, %arg2: i32, %arg3: i32) -> (i32, i32, i32) {
    %c0_i32 = arith.constant 0 : i32
    return %arg0, %arg2, %arg1 : i32, i32, i32
  }
}

module attributes {stable_mosaic.version = 11 : i64} {
  func.func @_attention_kernel(%arg0: i32, %arg1: i32, %arg2: i32, %arg3: i32, %arg4: memref<1x8x128xf32, #tpu.memory_space<vmem>>, %arg5: memref<1x8x128xf32, #tpu.memory_space<vmem>>, %arg6: memref<1x8x128xf32, #tpu.memory_space<vmem>>, %arg7: memref<1x8x128xf32, #tpu.memory_space<vmem>>, %arg8: memref<2x8x1xf32, #tpu.memory_space<vmem>>, %arg9: memref<2x8x1xf32, #tpu.memory_space<vmem>>, %arg10: memref<8x128xf32, #tpu.memory_space<vmem>>) attributes {dimension_semantics = [#tpu.dimension_semantics<parallel>, #tpu.dimension_semantics<parallel>, #tpu.dimension_semantics<parallel>, #tpu.dimension_semantics<arbitrary>], iteration_bounds = array<i64: 2, 1, 1, 1>, scalar_prefetch = 0 : i64, scratch_operands = 3 : i64, tpu.core_type = #tpu.core_type<tc>, window_params = [{transform_indices = @transform_0, window_bounds = array<i64: 1, 8, 128>}, {transform_indices = @transform_1, window_bounds = array<i64: 1, 8, 128>}, {transform_indices = @transform_2, window_bounds = array<i64: 1, 8, 128>}, {transform_indices = @transform_3, window_bounds = array<i64: 1, 8, 128>}]} {
    %c0_i32 = arith.constant 0 : i32
    %0 = arith.cmpi eq, %arg3, %c0_i32 : i32
    %1 = arith.extui %0 : i1 to i32
    %c0_i32_0 = arith.constant 0 : i32
    %2 = arith.cmpi ne, %1, %c0_i32_0 : i32
    scf.if %2 {
      %cst = arith.constant 0xFF800000 : f32
      %10 = vector.broadcast %cst : f32 to vector<2x8x1xf32>
      %c0 = arith.constant 0 : index
      %c0_5 = arith.constant 0 : index
      %c0_6 = arith.constant 0 : index
      %11 = vector.load %arg8[%c0, %c0_5, %c0_6] : memref<2x8x1xf32, #tpu.memory_space<vmem>>, vector<2x8x1xf32>
      tpu.vector_store %arg8[%c0, %c0_5, %c0_6], %10 {strides = array<i32>} : memref<2x8x1xf32, #tpu.memory_space<vmem>>, vector<2x8x1xf32>,
      %cst_7 = arith.constant 0.000000e+00 : f32
      %12 = vector.broadcast %cst_7 : f32 to vector<2x8x1xf32>
      %c0_8 = arith.constant 0 : index
      %c0_9 = arith.constant 0 : index
      %c0_10 = arith.constant 0 : index
      %13 = vector.load %arg9[%c0_8, %c0_9, %c0_10] : memref<2x8x1xf32, #tpu.memory_space<vmem>>, vector<2x8x1xf32>
      tpu.vector_store %arg9[%c0_8, %c0_9, %c0_10], %12 {strides = array<i32>} : memref<2x8x1xf32, #tpu.memory_space<vmem>>, vector<2x8x1xf32>,
      %cst_11 = arith.constant 0.000000e+00 : f32
      %14 = vector.broadcast %cst_11 : f32 to vector<8x128xf32>
      %c0_12 = arith.constant 0 : index
      %c0_13 = arith.constant 0 : index
      %15 = vector.load %arg10[%c0_12, %c0_13] : memref<8x128xf32, #tpu.memory_space<vmem>>, vector<8x128xf32>
      tpu.vector_store %arg10[%c0_12, %c0_13], %14 {strides = array<i32>} : memref<8x128xf32, #tpu.memory_space<vmem>>, vector<8x128xf32>,
    } else {
    }
    %c8_i32 = arith.constant 8 : i32
    %3 = arith.muli %arg3, %c8_i32 : i32
    %c8_i32_1 = arith.constant 8 : i32
    %4 = arith.cmpi slt, %3, %c8_i32_1 : i32
    %5 = arith.extui %4 : i1 to i32
    %c0_i32_2 = arith.constant 0 : i32
    %6 = arith.cmpi ne, %5, %c0_i32_2 : i32
    scf.if %6 {
      %c0 = arith.constant 0 : index
      %c0_5 = arith.constant 0 : index
      %c0_6 = arith.constant 0 : index
      %10 = vector.load %arg4[%c0, %c0_5, %c0_6] : memref<1x8x128xf32, #tpu.memory_space<vmem>>, vector<1x8x128xf32>
      %11 = vector.shape_cast %10 : vector<1x8x128xf32> to vector<8x128xf32>
      %12 = arith.truncf %11 : vector<8x128xf32> to vector<8x128xbf16>
      %c0_7 = arith.constant 0 : index
      %c0_8 = arith.constant 0 : index
      %c0_9 = arith.constant 0 : index
      %13 = vector.load %arg5[%c0_7, %c0_8, %c0_9] : memref<1x8x128xf32, #tpu.memory_space<vmem>>, vector<1x8x128xf32>
      %14 = vector.shape_cast %13 : vector<1x8x128xf32> to vector<8x128xf32>
      %15 = arith.truncf %14 : vector<8x128xf32> to vector<8x128xbf16>
      %c0_10 = arith.constant 0 : index
      %c0_11 = arith.constant 0 : index
      %c0_12 = arith.constant 0 : index
      %16 = vector.load %arg6[%c0_10, %c0_11, %c0_12] : memref<1x8x128xf32, #tpu.memory_space<vmem>>, vector<1x8x128xf32>
      %17 = vector.shape_cast %16 : vector<1x8x128xf32> to vector<8x128xf32>
      %18 = arith.truncf %17 : vector<8x128xf32> to vector<8x128xbf16>
      %19 = vector.extract_strided_slice %12 {offsets = [0, 0], sizes = [8, 64], strides = [1, 1]} : vector<8x128xbf16> to vector<8x64xbf16>
      %20 = vector.extract_strided_slice %15 {offsets = [0, 0], sizes = [8, 64], strides = [1, 1]} : vector<8x128xbf16> to vector<8x64xbf16>
      %cst = arith.constant dense<0.000000e+00> : vector<8x8xf32>
      %21 = tpu.matmul %19, %20, %cst {dimension_numbers = #tpu.dot_dimension_numbers<[1], [1], [0], [0], [0, 0, 1, 0], [], []>} : vector<8x64xbf16>, vector<8x64xbf16>, vector<8x8xf32> -> vector<8x8xf32>
      %c0_13 = arith.constant 0 : index
      %c0_14 = arith.constant 0 : index
      %c0_15 = arith.constant 0 : index
      %22 = vector.load %arg8[%c0_13, %c0_14, %c0_15] : memref<2x8x1xf32, #tpu.memory_space<vmem>>, vector<1x8x1xf32>
      %23 = vector.shape_cast %22 : vector<1x8x1xf32> to vector<8x1xf32>
      %cst_16 = arith.constant dense<0xFF800000> : vector<8xf32>
      %24 = vector.multi_reduction <maximumf>, %21, %cst_16 [1] : vector<8x8xf32> to vector<8xf32>
      %25 = vector.shape_cast %24 : vector<8xf32> to vector<8x1xf32>
      %26 = arith.maximumf %23, %25 : vector<8x1xf32>
      %27 = arith.subf %23, %26 : vector<8x1xf32>
      %28 = math.exp %27 : vector<8x1xf32>
      %29 = vector.broadcast %26 : vector<8x1xf32> to vector<8x8xf32>
      %30 = arith.subf %21, %29 : vector<8x8xf32>
      %31 = math.exp %30 : vector<8x8xf32>
      %c0_17 = arith.constant 0 : index
      %c0_18 = arith.constant 0 : index
      %c0_19 = arith.constant 0 : index
      %32 = vector.load %arg9[%c0_17, %c0_18, %c0_19] : memref<2x8x1xf32, #tpu.memory_space<vmem>>, vector<1x8x1xf32>
      %33 = vector.shape_cast %32 : vector<1x8x1xf32> to vector<8x1xf32>
      %34 = arith.mulf %28, %33 : vector<8x1xf32>
      %cst_20 = arith.constant dense<0.000000e+00> : vector<8xf32>
      %35 = vector.multi_reduction <add>, %31, %cst_20 [1] : vector<8x8xf32> to vector<8xf32>
      %36 = vector.shape_cast %35 : vector<8xf32> to vector<8x1xf32>
      %37 = arith.addf %34, %36 : vector<8x1xf32>
      %c0_21 = arith.constant 0 : index
      %c0_22 = arith.constant 0 : index
      %c0_23 = arith.constant 0 : index
      %38 = vector.load %arg9[%c0_21, %c0_22, %c0_23] : memref<2x8x1xf32, #tpu.memory_space<vmem>>, vector<1x8x1xf32>
      %39 = vector.shape_cast %38 : vector<1x8x1xf32> to vector<8x1xf32>
      %40 = vector.shape_cast %37 : vector<8x1xf32> to vector<1x8x1xf32>
      tpu.vector_store %arg9[%c0_21, %c0_22, %c0_23], %40 {strides = array<i32>} : memref<2x8x1xf32, #tpu.memory_space<vmem>>, vector<1x8x1xf32>,
      %c0_24 = arith.constant 0 : index
      %c0_25 = arith.constant 0 : index
      %c0_26 = arith.constant 0 : index
      %41 = vector.load %arg8[%c0_24, %c0_25, %c0_26] : memref<2x8x1xf32, #tpu.memory_space<vmem>>, vector<1x8x1xf32>
      %42 = vector.shape_cast %41 : vector<1x8x1xf32> to vector<8x1xf32>
      %43 = vector.shape_cast %26 : vector<8x1xf32> to vector<1x8x1xf32>
      tpu.vector_store %arg8[%c0_24, %c0_25, %c0_26], %43 {strides = array<i32>} : memref<2x8x1xf32, #tpu.memory_space<vmem>>, vector<1x8x1xf32>,
      %44 = vector.shape_cast %28 : vector<8x1xf32> to vector<8x1xf32>
      %45 = vector.broadcast %44 : vector<8x1xf32> to vector<8x64xf32>
      %46 = arith.truncf %31 : vector<8x8xf32> to vector<8x8xbf16>
      %47 = vector.extract_strided_slice %18 {offsets = [0, 0], sizes = [8, 64], strides = [1, 1]} : vector<8x128xbf16> to vector<8x64xbf16>
      %cst_27 = arith.constant dense<0.000000e+00> : vector<8x64xf32>
      %48 = tpu.matmul %46, %47, %cst_27 {dimension_numbers = #tpu.dot_dimension_numbers<[1], [0], [0], [1], [0, 0, 1, 1], [], []>} : vector<8x8xbf16>, vector<8x64xbf16>, vector<8x64xf32> -> vector<8x64xf32>
      %49 = vector.extract_strided_slice %12 {offsets = [0, 64], sizes = [8, 64], strides = [1, 1]} : vector<8x128xbf16> to vector<8x64xbf16>
      %50 = vector.extract_strided_slice %15 {offsets = [0, 64], sizes = [8, 64], strides = [1, 1]} : vector<8x128xbf16> to vector<8x64xbf16>
      %cst_28 = arith.constant dense<0.000000e+00> : vector<8x8xf32>
      %51 = tpu.matmul %49, %50, %cst_28 {dimension_numbers = #tpu.dot_dimension_numbers<[1], [1], [0], [0], [0, 0, 1, 0], [], []>} : vector<8x64xbf16>, vector<8x64xbf16>, vector<8x8xf32> -> vector<8x8xf32>
      %c1 = arith.constant 1 : index
      %c0_29 = arith.constant 0 : index
      %c0_30 = arith.constant 0 : index
      %52 = vector.load %arg8[%c1, %c0_29, %c0_30] : memref<2x8x1xf32, #tpu.memory_space<vmem>>, vector<1x8x1xf32>
      %53 = vector.shape_cast %52 : vector<1x8x1xf32> to vector<8x1xf32>
      %cst_31 = arith.constant dense<0xFF800000> : vector<8xf32>
      %54 = vector.multi_reduction <maximumf>, %51, %cst_31 [1] : vector<8x8xf32> to vector<8xf32>
      %55 = vector.shape_cast %54 : vector<8xf32> to vector<8x1xf32>
      %56 = arith.maximumf %53, %55 : vector<8x1xf32>
      %57 = arith.subf %53, %56 : vector<8x1xf32>
      %58 = math.exp %57 : vector<8x1xf32>
      %59 = vector.broadcast %56 : vector<8x1xf32> to vector<8x8xf32>
      %60 = arith.subf %51, %59 : vector<8x8xf32>
      %61 = math.exp %60 : vector<8x8xf32>
      %c1_32 = arith.constant 1 : index
      %c0_33 = arith.constant 0 : index
      %c0_34 = arith.constant 0 : index
      %62 = vector.load %arg9[%c1_32, %c0_33, %c0_34] : memref<2x8x1xf32, #tpu.memory_space<vmem>>, vector<1x8x1xf32>
      %63 = vector.shape_cast %62 : vector<1x8x1xf32> to vector<8x1xf32>
      %64 = arith.mulf %58, %63 : vector<8x1xf32>
      %cst_35 = arith.constant dense<0.000000e+00> : vector<8xf32>
      %65 = vector.multi_reduction <add>, %61, %cst_35 [1] : vector<8x8xf32> to vector<8xf32>
      %66 = vector.shape_cast %65 : vector<8xf32> to vector<8x1xf32>
      %67 = arith.addf %64, %66 : vector<8x1xf32>
      %c1_36 = arith.constant 1 : index
      %c0_37 = arith.constant 0 : index
      %c0_38 = arith.constant 0 : index
      %68 = vector.load %arg9[%c1_36, %c0_37, %c0_38] : memref<2x8x1xf32, #tpu.memory_space<vmem>>, vector<1x8x1xf32>
      %69 = vector.shape_cast %68 : vector<1x8x1xf32> to vector<8x1xf32>
      %70 = vector.shape_cast %67 : vector<8x1xf32> to vector<1x8x1xf32>
      tpu.vector_store %arg9[%c1_36, %c0_37, %c0_38], %70 {strides = array<i32>} : memref<2x8x1xf32, #tpu.memory_space<vmem>>, vector<1x8x1xf32>,
      %c1_39 = arith.constant 1 : index
      %c0_40 = arith.constant 0 : index
      %c0_41 = arith.constant 0 : index
      %71 = vector.load %arg8[%c1_39, %c0_40, %c0_41] : memref<2x8x1xf32, #tpu.memory_space<vmem>>, vector<1x8x1xf32>
      %72 = vector.shape_cast %71 : vector<1x8x1xf32> to vector<8x1xf32>
      %73 = vector.shape_cast %56 : vector<8x1xf32> to vector<1x8x1xf32>
      tpu.vector_store %arg8[%c1_39, %c0_40, %c0_41], %73 {strides = array<i32>} : memref<2x8x1xf32, #tpu.memory_space<vmem>>, vector<1x8x1xf32>,
      %74 = vector.shape_cast %58 : vector<8x1xf32> to vector<8x1xf32>
      %75 = vector.broadcast %74 : vector<8x1xf32> to vector<8x64xf32>
      %76 = arith.truncf %61 : vector<8x8xf32> to vector<8x8xbf16>
      %77 = vector.extract_strided_slice %18 {offsets = [0, 64], sizes = [8, 64], strides = [1, 1]} : vector<8x128xbf16> to vector<8x64xbf16>
      %cst_42 = arith.constant dense<0.000000e+00> : vector<8x64xf32>
      %78 = tpu.matmul %76, %77, %cst_42 {dimension_numbers = #tpu.dot_dimension_numbers<[1], [0], [0], [1], [0, 0, 1, 1], [], []>} : vector<8x8xbf16>, vector<8x64xbf16>, vector<8x64xf32> -> vector<8x64xf32>
      %79 = tpu.concatenate %45, %75 in 1 : vector<8x64xf32>, vector<8x64xf32> -> vector<8x128xf32>
      %80 = tpu.concatenate %48, %78 in 1 : vector<8x64xf32>, vector<8x64xf32> -> vector<8x128xf32>
      %c0_43 = arith.constant 0 : index
      %c0_44 = arith.constant 0 : index
      %81 = vector.load %arg10[%c0_43, %c0_44] : memref<8x128xf32, #tpu.memory_space<vmem>>, vector<8x128xf32>
      %82 = arith.mulf %79, %81 : vector<8x128xf32>
      %83 = arith.addf %82, %80 : vector<8x128xf32>
      %c0_45 = arith.constant 0 : index
      %c0_46 = arith.constant 0 : index
      %84 = vector.load %arg10[%c0_45, %c0_46] : memref<8x128xf32, #tpu.memory_space<vmem>>, vector<8x128xf32>
      tpu.vector_store %arg10[%c0_45, %c0_46], %83 {strides = array<i32>} : memref<8x128xf32, #tpu.memory_space<vmem>>, vector<8x128xf32>,
    } else {
    }
    %c0_i32_3 = arith.constant 0 : i32
    %7 = arith.cmpi eq, %arg3, %c0_i32_3 : i32
    %8 = arith.extui %7 : i1 to i32
    %c0_i32_4 = arith.constant 0 : i32
    %9 = arith.cmpi ne, %8, %c0_i32_4 : i32
    scf.if %9 {
      %c0 = arith.constant 0 : index
      %c0_5 = arith.constant 0 : index
      %c0_6 = arith.constant 0 : index
      %10 = vector.load %arg9[%c0, %c0_5, %c0_6] : memref<2x8x1xf32, #tpu.memory_space<vmem>>, vector<1x8x1xf32>
      %11 = vector.shape_cast %10 : vector<1x8x1xf32> to vector<8x1xf32>
      %12 = tpu.reciprocal %11 {approx = true} : vector<8x1xf32> -> vector<8x1xf32>
      %13 = vector.shape_cast %12 : vector<8x1xf32> to vector<8x1xf32>
      %14 = vector.broadcast %13 : vector<8x1xf32> to vector<8x64xf32>
      %c1 = arith.constant 1 : index
      %c0_7 = arith.constant 0 : index
      %c0_8 = arith.constant 0 : index
      %15 = vector.load %arg9[%c1, %c0_7, %c0_8] : memref<2x8x1xf32, #tpu.memory_space<vmem>>, vector<1x8x1xf32>
      %16 = vector.shape_cast %15 : vector<1x8x1xf32> to vector<8x1xf32>
      %17 = tpu.reciprocal %16 {approx = true} : vector<8x1xf32> -> vector<8x1xf32>
      %18 = vector.shape_cast %17 : vector<8x1xf32> to vector<8x1xf32>
      %19 = vector.broadcast %18 : vector<8x1xf32> to vector<8x64xf32>
      %20 = tpu.concatenate %14, %19 in 1 : vector<8x64xf32>, vector<8x64xf32> -> vector<8x128xf32>
      %c0_9 = arith.constant 0 : index
      %c0_10 = arith.constant 0 : index
      %21 = vector.load %arg10[%c0_9, %c0_10] : memref<8x128xf32, #tpu.memory_space<vmem>>, vector<8x128xf32>
      %22 = arith.mulf %21, %20 : vector<8x128xf32>
      %c0_11 = arith.constant 0 : index
      %c0_12 = arith.constant 0 : index
      %c0_13 = arith.constant 0 : index
      %23 = vector.load %arg7[%c0_11, %c0_12, %c0_13] : memref<1x8x128xf32, #tpu.memory_space<vmem>>, vector<1x8x128xf32>
      %24 = vector.shape_cast %23 : vector<1x8x128xf32> to vector<8x128xf32>
      %25 = vector.shape_cast %22 : vector<8x128xf32> to vector<1x8x128xf32>
      tpu.vector_store %arg7[%c0_11, %c0_12, %c0_13], %25 {strides = array<i32>} : memref<1x8x128xf32, #tpu.memory_space<vmem>>, vector<1x8x128xf32>,
    } else {
    }
    return
  }
  func.func @transform_0(%arg0: i32, %arg1: i32, %arg2: i32, %arg3: i32) -> (i32, i32, i32) {
    %c0_i32 = arith.constant 0 : i32
    return %arg0, %arg2, %arg1 : i32, i32, i32
  }
  func.func @transform_1(%arg0: i32, %arg1: i32, %arg2: i32, %arg3: i32) -> (i32, i32, i32) {
    %c0_i32 = arith.constant 0 : i32
    %0 = arith.addi %c0_i32, %arg1 : i32
    %c0_i32_0 = arith.constant 0 : i32
    return %arg0, %arg3, %0 : i32, i32, i32
  }
  func.func @transform_2(%arg0: i32, %arg1: i32, %arg2: i32, %arg3: i32) -> (i32, i32, i32) {
    %c1_i32 = arith.constant 1 : i32
    %0 = arith.addi %c1_i32, %arg1 : i32
    %c0_i32 = arith.constant 0 : i32
    return %arg0, %arg3, %0 : i32, i32, i32
  }
  func.func @transform_3(%arg0: i32, %arg1: i32, %arg2: i32, %arg3: i32) -> (i32, i32, i32) {
    %c0_i32 = arith.constant 0 : i32
    return %arg0, %arg2, %arg1 : i32, i32, i32
  }
}

module attributes {stable_mosaic.version = 11 : i64} {
  func.func @_matmul_kernel(%arg0: i32, %arg1: i32, %arg2: i32, %arg3: memref<16x128xf32, #tpu.memory_space<vmem>>, %arg4: memref<128x128xbf16, #tpu.memory_space<vmem>>, %arg5: memref<16x128xf32, #tpu.memory_space<vmem>>) attributes {dimension_semantics = [#tpu.dimension_semantics<parallel>, #tpu.dimension_semantics<parallel>, #tpu.dimension_semantics<arbitrary>], iteration_bounds = array<i64: 1, 1, 1>, scalar_prefetch = 0 : i64, scratch_operands = 0 : i64, tpu.core_type = #tpu.core_type<tc>, window_params = [{transform_indices = @transform_0, window_bounds = array<i64: 16, 128>}, {transform_indices = @transform_1, window_bounds = array<i64: 128, 128>}, {transform_indices = @transform_2, window_bounds = array<i64: 16, 128>}]} {
    %c0_i32 = arith.constant 0 : i32
    %0 = arith.cmpi eq, %arg2, %c0_i32 : i32
    %1 = arith.extui %0 : i1 to i32
    %c0_i32_0 = arith.constant 0 : i32
    %2 = arith.cmpi ne, %1, %c0_i32_0 : i32
    scf.if %2 {
      %cst_10 = arith.constant 0.000000e+00 : f32
      %13 = vector.broadcast %cst_10 : f32 to vector<16x128xf32>
      %c0_11 = arith.constant 0 : index
      %c0_12 = arith.constant 0 : index
      %14 = vector.load %arg5[%c0_11, %c0_12] : memref<16x128xf32, #tpu.memory_space<vmem>>, vector<16x128xf32>
      tpu.vector_store %arg5[%c0_11, %c0_12], %13 {strides = array<i32>} : memref<16x128xf32, #tpu.memory_space<vmem>>, vector<16x128xf32>,
    } else {
    }
    %c0 = arith.constant 0 : index
    %c0_1 = arith.constant 0 : index
    %3 = vector.load %arg5[%c0, %c0_1] : memref<16x128xf32, #tpu.memory_space<vmem>>, vector<16x128xf32>
    %c0_2 = arith.constant 0 : index
    %c0_3 = arith.constant 0 : index
    %4 = vector.load %arg3[%c0_2, %c0_3] : memref<16x128xf32, #tpu.memory_space<vmem>>, vector<16x128xf32>
    %5 = arith.truncf %4 : vector<16x128xf32> to vector<16x128xbf16>
    %c0_4 = arith.constant 0 : index
    %c0_5 = arith.constant 0 : index
    %6 = vector.load %arg4[%c0_4, %c0_5] : memref<128x128xbf16, #tpu.memory_space<vmem>>, vector<128x128xbf16>
    %cst = arith.constant dense<0.000000e+00> : vector<16x128xf32>
    %7 = tpu.matmul %5, %6, %cst {dimension_numbers = #tpu.dot_dimension_numbers<[1], [0], [0], [1], [0, 0, 1, 1], [], []>} : vector<16x128xbf16>, vector<128x128xbf16>, vector<16x128xf32> -> vector<16x128xf32>
    %8 = arith.addf %3, %7 : vector<16x128xf32>
    %c0_6 = arith.constant 0 : index
    %c0_7 = arith.constant 0 : index
    %9 = vector.load %arg5[%c0_6, %c0_7] : memref<16x128xf32, #tpu.memory_space<vmem>>, vector<16x128xf32>
    tpu.vector_store %arg5[%c0_6, %c0_7], %8 {strides = array<i32>} : memref<16x128xf32, #tpu.memory_space<vmem>>, vector<16x128xf32>,
    %c0_i32_8 = arith.constant 0 : i32
    %10 = arith.cmpi eq, %arg2, %c0_i32_8 : i32
    %11 = arith.extui %10 : i1 to i32
    %c0_i32_9 = arith.constant 0 : i32
    %12 = arith.cmpi ne, %11, %c0_i32_9 : i32
    scf.if %12 {
      %c0_10 = arith.constant 0 : index
      %c0_11 = arith.constant 0 : index
      %13 = vector.load %arg5[%c0_10, %c0_11] : memref<16x128xf32, #tpu.memory_space<vmem>>, vector<16x128xf32>
      %c0_12 = arith.constant 0 : index
      %c0_13 = arith.constant 0 : index
      %14 = vector.load %arg5[%c0_12, %c0_13] : memref<16x128xf32, #tpu.memory_space<vmem>>, vector<16x128xf32>
      tpu.vector_store %arg5[%c0_12, %c0_13], %13 {strides = array<i32>} : memref<16x128xf32, #tpu.memory_space<vmem>>, vector<16x128xf32>,
    } else {
    }
    return
  }
  func.func @transform_0(%arg0: i32, %arg1: i32, %arg2: i32) -> (i32, i32) {
    %c0_i32 = arith.constant 0 : i32
    return %arg0, %arg2 : i32, i32
  }
  func.func @transform_1(%arg0: i32, %arg1: i32, %arg2: i32) -> (i32, i32) {
    %c0_i32 = arith.constant 0 : i32
    return %arg2, %arg1 : i32, i32
  }
  func.func @transform_2(%arg0: i32, %arg1: i32, %arg2: i32) -> (i32, i32) {
    %c0_i32 = arith.constant 0 : i32
    return %arg0, %arg1 : i32, i32
  }
}

</mosaic_0001>

<bundles_post_ra>
// kernel: whisper_forward.45
= control target key start
LH: loop header
LB: loop body
LE: loop exit
PB: predicated region body
PF: predicated region fallthrough
CT: control target
= control target key end

     0   :  { %s107_s0 = inlined_call_operand.vmem [shape: f32[16,128], index: 0, kind: input, shape index: {}]   ;;  %s108_s1 = inlined_call_operand.vmem [shape: f32[1,128], index: 1, kind: input, shape index: {}]   ;;  %s109_s2 = inlined_call_operand.vmem [shape: f32[1,128], index: 2, kind: input, shape index: {}]   ;;  %s110_s3 = inlined_call_operand.vmem [shape: f32[16,128], index: 3, kind: output, shape index: {}]  }
   0x1   :  { %v14_v0 = vld [vmem:[%s107_s0] sm:$0xff]  ;;  %v15_v1 = vld [vmem:[%s107_s0 + $0x8] sm:$0xff] }
   0x2   :  { %16 = vadd.xlane.f32.xlu0 %v14_v0  ;;  %v63_v17 = vld [vmem:[%s108_s1] ss:$0 sm:$0xff] }
   0x3   :  { %v64_v19 = vld [vmem:[%s109_s2] ss:$0 sm:$0xff] }
   0x6   :  { %18 = vadd.xlane.f32.xlu0 %v15_v1 }
  0x8f   :  { %v17_v2 = vpop.xlane.xlu0 %16 }
  0x90   :  { %v21_v3 = vmul.f32 0.0078125, %v17_v2 }
  0x92   :  { %v23_v4 = vsub.f32 %v14_v0, %v21_v3 }
  0x93   :  { %v19_v5 = vpop.xlane.xlu0 %18 }
  0x94   :  { %v22_v6 = vmul.f32 0.0078125, %v19_v5  ;;  %v25_v7 = vmul.f32 %v23_v4, %v23_v4 }
  0x96   :  { %v24_v8 = vsub.f32 %v15_v1, %v22_v6  ;;  %27 = vadd.xlane.f32.xlu1 %v25_v7 }
  0x98   :  { %v26_v9 = vmul.f32 %v24_v8, %v24_v8 }
  0x9a   :  { %29 = vadd.xlane.f32.xlu1 %v26_v9 }
 0x123   :  { %v28_v10 = vpop.xlane.xlu1 %27 }
 0x124   :  { %v31_v11 = vmul.f32 0.0078125, %v28_v10 }
 0x126   :  { %v33_v12 = vadd.f32 1e-05, %v31_v11 }
 0x127   :  { %v30_v13 = vpop.xlane.xlu1 %29 }
 0x128   :  { %65 = vrsqrt.f32 %v33_v12  ;;  %v32_v14 = vmul.f32 0.0078125, %v30_v13 }
 0x12a   :  { %v34_v15 = vadd.f32 1e-05, %v32_v14 }
 0x12c   :  { %67 = vrsqrt.f32 %v34_v15 }
 0x132   :  { %v66_v16 = vpop.eup %65 }
 0x133   :  { %v37_v18 = vmul.f32 %v66_v16, %v23_v4 }
 0x135   :  { %v46_v20 = vmul.f32 %v63_v17, %v37_v18 }
 0x136   :  { %v68_v21 = vpop.eup %67 }
 0x137   :  { %v55_v22 = vadd.f32 %v64_v19, %v46_v20  ;;  %v38_v23 = vmul.f32 %v68_v21, %v24_v8 }
 0x139   :  { %57 = vst [vmem:[%s110_s3] sm:$0xff] %v55_v22  ;;  %v47_v24 = vmul.f32 %v63_v17, %v38_v23 }
 0x13b   :  { %v56_v25 = vadd.f32 %v64_v19, %v47_v24 }
 0x13d   :  { %58 = vst [vmem:[%s110_s3 + $0x8] sm:$0xff] %v56_v25 }

// kernel: whisper_forward.43
= control target key start
LH: loop header
LB: loop body
LE: loop exit
PB: predicated region body
PF: predicated region fallthrough
CT: control target
= control target key end

     0   :  { %vm52_vm0 = vcmask 1043456   ;;  %vm45_vm1 = vcmask 195584   ;;  %s371_s1 = inlined_call_operand.vmem [shape: bf16[24,128], index: 1, kind: input, shape index: {}]   ;;  %s372_s0 = inlined_call_operand.vmem [shape: f32[32,24], index: 0, kind: input, shape index: {}]   ;;  %s373_s2 = inlined_call_operand.vmem [shape: f32[1,128], index: 2, kind: input, shape index: {}]   ;;  %s374_s3 = inlined_call_operand.vmem [shape: f32[32,128], index: 3, kind: output, shape index: {}]  }
   0x1   :  { %v267_v0 = vld [vmem:[%s371_s1] sm:$0xff]   ;;  %v268_v1 = vld [vmem:[%s371_s1 + $0x8] ss:$0 sps:$4 sm:$0xff]   ;;  %v29_v5 = vld [vmem:[%s372_s0 + $0x10] sm:$0xff] }
   0x2   :  { %v27_v2 = vld [vmem:[%s372_s0] sm:$0xff]  ;;  %v28_v3 = vld [vmem:[%s372_s0 + $0x8] sm:$0xff]  ;;  %256 = vmatprep.subr.bf16.mxu0 %v267_v0  ;;  %v30_v6 = vld [vmem:[%s372_s0 + $0x18] sm:$0xff]  ;;  %v54_v7 = vsel %vm52_vm0, %v268_v1, 0 }
   0x3   :  { %v31_v4 = vpack.c.bf16 %v28_v3, %v27_v2  ;;  %257 = vmatpush3.bf16.msra.mxu0 %v267_v0  ;;  %v32_v8 = vpack.c.bf16 %v30_v6, %v29_v5  ;;  %v251_v10 = vld [vmem:[%s373_s2] ss:$0 sm:$0xff] }
   0x4   :  { %264 = vmatprep.subr.msk.bf16.mxu0 %vm52_vm0, %v268_v1 }
   0x5   :  { %260 = vmatprep.mubr.msk.bf16.mxu0 %vm45_vm1, %v31_v4 }
   0x7   :  { %259 = vmatpush3.bf16.msra.mxu0 %v54_v7 }
   0xa   :  { %261 = vmatmul.mubr.msk.bf16.vlgmr.msra.gmra.mrb[0].mxu0 %vm45_vm1, %v32_v8 }
  0xdd   :  { %v262_v9 = vpop.f32.mrb[0].mxu0 }
  0xde   :  { %v90_v11 = vpop.f32.mrb[1].mxu0  ;;  %v327_v13 = vadd.f32 %v262_v9, %v251_v10 }
  0xdf   :  { %v263_v12 = vpop.f32.mrb[2].mxu0  ;;  %v329_v15 = vadd.f32 %v251_v10, %v90_v11 }
  0xe0   :  { %v93_v14 = vpop.f32.mrb[3].mxu0  ;;  %v332_v16 = vmul.f32 0.70710677, %v327_v13  ;;  %v334_v17 = vadd.f32 %v263_v12, %v251_v10 }
  0xe1   :  { %v337_v18 = vmul.f32 0.70710677, %v329_v15  ;;  %v343_v21 = vadd.f32 %v251_v10, %v93_v14 }
  0xe2   :  { %v149_v19 = vand.u32 2147483647, %v332_v16  ;;  %v341_v20 = vmul.f32 0.70710677, %v334_v17  ;;  %vm141_vm2 = vcmp.ge.f32.partialorder %v332_v16, 0.0 }
  0xe3   :  { %v147_v22 = vand.u32 2147483647, %v337_v18  ;;  %v348_v27 = vmul.f32 0.70710677, %v343_v21  ;;  %vm139_vm3 = vcmp.ge.f32.partialorder %v337_v18, 0.0 }
  0xe4   :  { %v153_v23 = vmul.f32 0.3275911, %v149_v19  ;;  %v150_v25 = vand.u32 2147483647, %v341_v20  ;;  %v205_v34 = vsub.f32 0.0, %v149_v19  ;;  %vm142_vm4 = vcmp.ge.f32.partialorder %v341_v20, 0.0 }
  0xe5   :  { %v151_v24 = vmul.f32 0.3275911, %v147_v22  ;;  %v148_v30 = vand.u32 2147483647, %v348_v27  ;;  %v203_v35 = vsub.f32 0.0, %v147_v22  ;;  %vm140_vm5 = vcmp.ge.f32.partialorder %v348_v27, 0.0 }
  0xe6   :  { %v157_v26 = vadd.f32 1.0, %v153_v23  ;;  %v154_v29 = vmul.f32 0.3275911, %v150_v25  ;;  %v209_v37 = vmul.f32 %v205_v34, %v149_v19  ;;  %v206_v38 = vsub.f32 0.0, %v150_v25 }
  0xe7   :  { %v155_v28 = vadd.f32 1.0, %v151_v24  ;;  %v152_v32 = vmul.f32 0.3275911, %v148_v30  ;;  %v207_v41 = vmul.f32 %v203_v35, %v147_v22  ;;  %v204_v43 = vsub.f32 0.0, %v148_v30 }
  0xe8   :  { %269 = vrcp.f32 %v157_v26  ;;  %v158_v31 = vadd.f32 1.0, %v154_v29  ;;  %v215_v46 = vmul.f32 1.442695, %v209_v37  ;;  %v210_v48 = vmul.f32 %v206_v38, %v150_v25 }
  0xe9   :  { %271 = vrcp.f32 %v155_v28  ;;  %v156_v33 = vadd.f32 1.0, %v152_v32  ;;  %v211_v50 = vmul.f32 1.442695, %v207_v41  ;;  %v208_v54 = vmul.f32 %v204_v43, %v148_v30 }
  0xea   :  { %273 = vrcp.f32 %v158_v31  ;;  %v217_v59 = vmul.f32 1.442695, %v210_v48  ;;  %v285_v35 = vmov -1.0   ;;  %v132_v27 = vmul.f32 0.5, %v343_v21 }
  0xeb   :  { %275 = vrcp.f32 %v156_v33  ;;  %v213_v0 = vmul.f32 1.442695, %v208_v54  ;;  %v145_v37 = vsel %vm141_vm2, 1.0, %v285_v35  ;;  %v146_v48 = vsel %vm142_vm4, 1.0, %v285_v35 }
  0xec   :  { %277 = vpow2.f32 %v215_v46  ;;  %v131_v46 = vmul.f32 0.5, %v329_v15  ;;  %v144_v20 = vsel %vm140_vm5, 1.0, %v285_v35 }
  0xed   :  { %279 = vpow2.f32 %v211_v50 }
  0xee   :  { %281 = vpow2.f32 %v217_v59 }
  0xef   :  { %283 = vpow2.f32 %v213_v0 }
  0xf2   :  { %v270_v36 = vpop.eup %269 }
  0xf3   :  { %v272_v39 = vpop.eup %271  ;;  %v169_v40 = vmul.f32 1.0614054, %v270_v36 }
  0xf4   :  { %v167_v42 = vmul.f32 1.0614054, %v272_v39  ;;  %v274_v45 = vpop.eup %273 }
  0xf5   :  { %v173_v44 = vadd.f32 -1.4531521, %v169_v40  ;;  %v170_v51 = vmul.f32 1.0614054, %v274_v45  ;;  %v276_v52 = vpop.eup %275 }
  0xf6   :  { %v171_v47 = vadd.f32 -1.4531521, %v167_v42  ;;  %v168_v57 = vmul.f32 1.0614054, %v276_v52  ;;  %v278_v23 = vpop.eup %277  ;;  %v133_v42 = vmul.f32 0.5, %v327_v13  ;;  %v134_v13 = vmul.f32 0.5, %v334_v17 }
  0xf7   :  { %v177_v49 = vmul.f32 %v270_v36, %v173_v44  ;;  %v174_v56 = vadd.f32 -1.4531521, %v170_v51  ;;  %v280_v25 = vpop.eup %279 }
  0xf8   :  { %v175_v53 = vmul.f32 %v272_v39, %v171_v47  ;;  %v172_v62 = vadd.f32 -1.4531521, %v168_v57  ;;  %v282_v34 = vpop.eup %281 }
  0xf9   :  { %v181_v55 = vadd.f32 1.4214138, %v177_v49  ;;  %v178_v61 = vmul.f32 %v274_v45, %v174_v56  ;;  %v284_v41 = vpop.eup %283 }
  0xfa   :  { %v179_v58 = vadd.f32 1.4214138, %v175_v53  ;;  %v176_v3 = vmul.f32 %v276_v52, %v172_v62 }
  0xfb   :  { %v185_v60 = vmul.f32 %v270_v36, %v181_v55  ;;  %v182_v2 = vadd.f32 1.4214138, %v178_v61 }
  0xfc   :  { %v183_v63 = vmul.f32 %v272_v39, %v179_v58  ;;  %v180_v7 = vadd.f32 1.4214138, %v176_v3 }
  0xfd   :  { %v189_v1 = vadd.f32 -0.28449672, %v185_v60  ;;  %v186_v6 = vmul.f32 %v274_v45, %v182_v2 }
  0xfe   :  { %v187_v4 = vadd.f32 -0.28449672, %v183_v63  ;;  %v184_v11 = vmul.f32 %v276_v52, %v180_v7 }
  0xff   :  { %v193_v5 = vmul.f32 %v270_v36, %v189_v1  ;;  %v190_v10 = vadd.f32 -0.28449672, %v186_v6 }
 0x100   :  { %v191_v8 = vmul.f32 %v272_v39, %v187_v4  ;;  %v188_v22 = vadd.f32 -0.28449672, %v184_v11 }
 0x101   :  { %v197_v9 = vadd.f32 0.2548296, %v193_v5  ;;  %v194_v19 = vmul.f32 %v274_v45, %v190_v10 }
 0x102   :  { %v195_v12 = vadd.f32 0.2548296, %v191_v8  ;;  %v192_v29 = vmul.f32 %v276_v52, %v188_v22 }
 0x103   :  { %v201_v14 = vmul.f32 %v270_v36, %v197_v9  ;;  %v198_v28 = vadd.f32 0.2548296, %v194_v19  ;;  %v143_v36 = vsel %vm139_vm3, 1.0, %v285_v35 }
 0x104   :  { %v199_v24 = vmul.f32 %v272_v39, %v195_v12  ;;  %v196_v33 = vadd.f32 0.2548296, %v192_v29 }
 0x105   :  { %v221_v26 = vmul.f32 %v278_v23, %v201_v14  ;;  %v202_v32 = vmul.f32 %v274_v45, %v198_v28 }
 0x106   :  { %v219_v30 = vmul.f32 %v280_v25, %v199_v24  ;;  %v200_v39 = vmul.f32 %v276_v52, %v196_v33 }
 0x107   :  { %v225_v31 = vsub.f32 1.0, %v221_v26  ;;  %v222_v16 = vmul.f32 %v282_v34, %v202_v32 }
 0x108   :  { %v223_v38 = vsub.f32 1.0, %v219_v30  ;;  %v220_v45 = vmul.f32 %v284_v41, %v200_v39 }
 0x109   :  { %v229_v40 = vmul.f32 %v225_v31, %v145_v37  ;;  %v226_v44 = vsub.f32 1.0, %v222_v16 }
 0x10a   :  { %v227_v18 = vmul.f32 %v223_v38, %v143_v36  ;;  %v224_v51 = vsub.f32 1.0, %v220_v45 }
 0x10b   :  { %v233_v43 = vadd.f32 1.0, %v229_v40  ;;  %v230_v50 = vmul.f32 %v226_v44, %v146_v48 }
 0x10c   :  { %v231_v47 = vadd.f32 1.0, %v227_v18  ;;  %v228_v54 = vmul.f32 %v224_v51, %v144_v20 }
 0x10d   :  { %v237_v49 = vmul.f32 %v233_v43, %v133_v42  ;;  %v234_v52 = vadd.f32 1.0, %v230_v50 }
 0x10e   :  { %v235_v53 = vmul.f32 %v231_v47, %v131_v46  ;;  %v232_v55 = vadd.f32 1.0, %v228_v54 }
 0x10f   :  { %241 = vst [vmem:[%s374_s3 + $0x10] sm:$0xff] %v237_v49  ;;  %v238_v15 = vmul.f32 %v234_v52, %v134_v13 }
 0x110   :  { %239 = vst [vmem:[%s374_s3] sm:$0xff] %v235_v53  ;;  %v236_v56 = vmul.f32 %v232_v55, %v132_v27 }
 0x111   :  { %242 = vst [vmem:[%s374_s3 + $0x18] sm:$0xff] %v238_v15 }
 0x112   :  { %240 = vst [vmem:[%s374_s3 + $0x8] sm:$0xff] %v236_v56 }

// kernel: whisper_forward.44
= control target key start
LH: loop header
LB: loop body
LE: loop exit
PB: predicated region body
PF: predicated region fallthrough
CT: control target
= control target key end

     0   :  { %s770_s12 = smov 0   ;;  %s772_s13 = smov 0   ;;  %s887_s0 = inlined_call_operand.vmem [shape: f32[16,384], index: 0, kind: input, shape index: {}]   ;;  %s888_s1 = inlined_call_operand.vmem [shape: bf16[384,128], index: 1, kind: input, shape index: {}]   ;;  %s889_s2 = inlined_call_operand.vmem [shape: f32[1,128], index: 2, kind: input, shape index: {}]   ;;  %s890_s3 = inlined_call_operand.vmem [shape: f32[16,128], index: 3, kind: output, shape index: {}]  }
   0x1   :  { %s774_s14 = smov 0   ;;  %s776_s15 = smov 0  }
   0x2   :  { %s778_s16 = smov 0  }
   0x3 LB: > { %s25_s17 = sadd.s32 1, %s740_s15  ;;  %p48_p1 = scmp.ne.s32.totalorder %s732_s13, %s728_s12  ;;  %s744_s16 = sphi %s778_s16, %s13_s16   ;;  %s740_s15 = sphi %s776_s15, %s894_s15   ;;  %s736_s14 = sphi %s774_s14, %s893_s14   ;;  %s732_s13 = sphi %s772_s13, %s892_s13   ;;  %s728_s12 = sphi %s770_s12, %s891_s12  }
   0x4   : > { %p26_p0 = scmp.ge.s32.totalorder %s25_s17, 3  ;;  %p49_p2 = scmp.eq.s32.totalorder %s744_s16, 0 }
   0x5   : > { %s41_s19 = sadd.s32 1, %s732_s13  ;;  %p595_p5 = scmp.ge.s32.totalorder %s744_s16, 3 }
   0x6   : > { %s896_s17 = smov (%p26_p0, %s25_s17), 0  ;;  %p50_p3 = por %p49_p2, %p48_p1 }
   0x7   : > { %s37_s18 = ssub.s32 %s740_s15, %s896_s17  ;;  %162 = sbr.rel (%p595_p5) target bundleno = 21 (0x15), region = 20 }
   0x8   : > { %p39_p4 = scmp.eq.s32.totalorder %s37_s18, 0 }
   0xa   : > { %s805_s20 = scalar_select %p39_p4, %s732_s13, %s41_s19  }
   0xe   : > { %165 = sbr.rel (!%p50_p3) target bundleno = 21 (0x15), region = 24  ;;  %s167_s21 = sand.u32 (%p50_p3), 1, %s732_s13  }
   0xf   : > { %s597_s22 = sshll.u32 (%p50_p3), %s740_s15, 3  ;;  %s596_s23 = sshll.u32 (%p50_p3), %s167_s21, 4 }
  0x10   : > { %s174_s26 = scalar_lea.vmem (%p50_p3), %s887_s0, %s597_s22  ;;  %s169_s27 = scalar_lea.vmem (%p50_p3), [#allocation2], %s596_s23 }
  0x11   : > { %v204_v0 = vld [vmem:[%s174_s26] sm:$0xff] (%p50_p3)  ;;  %v206_v1 = vld [vmem:[%s174_s26 + $0x18] sm:$0xff] (%p50_p3) }
  0x12   : > { %205 = vst [vmem:[%s169_s27] sm:$0xff] (%p50_p3), %v204_v0  ;;  %207 = vst [vmem:[%s169_s27 + $0x8] sm:$0xff] (%p50_p3), %v206_v1 }
  0x15 PF: > { %p598_p6 = scmp.ge.s32.totalorder %s744_s16, 1  ;;  %p224_p7 = scmp.lt.s32.totalorder %s744_s16, 4 }
  0x17   : > { %p225_p8 = pnand %p598_p6, %p224_p7 }
  0x18   : > { %s231_s28 = sand.u32 (!%p225_p8), 1, %s728_s12   ;;  %s600_s29 = sshll.u32 (!%p225_p8), %s736_s14, 4 }
  0x19   : > { %228 = sbr.rel (%p225_p8) target bundleno = 346 (0x15a), region = 66  ;;  %s817_s30 = sshll.u32 (!%p225_p8), %s231_s28, 4 }
  0x1a   : > { %p270_p9 = scmp.lt.s32.totalorder (!%p225_p8), %s600_s29, 47  ;;  %s233_s8 = scalar_lea.vmem (!%p225_p8), [#allocation2], %s817_s30 }
  0x1b   : > { %p602_p10 = scmp.ne.s32.totalorder (!%p225_p8), %s736_s14, 0 }
  0x20   : > { %s898_s29 = smov (!%p270_p9, %s600_s29), 47  ;;  %294 = sbr.rel (%p602_p10) target bundleno = 39 (0x27), region = 74 }
  0x21   : > { %s601_s4 = sshll.u32 %s898_s29, 2  ;;  %v746_v2 = vmov (!%p602_p10), 0.0  }
  0x22   : > { %s822_s7 = scalar_lea.vmem %s888_s1, %s601_s4  ;;  %295 = vst [vmem:[%s890_s3] sm:$0xff] (!%p602_p10), %v746_v2  ;;  %296 = vst [vmem:[%s890_s3 + $0x8] sm:$0xff] (!%p602_p10), %v746_v2 }
  0x27 PF: > { %v690_v3 = vld [vmem:[%s822_s7] sm:$0xff]   ;;  %v747_v4 = vmov 0.0   ;;  %v691_v5 = vld [vmem:[%s822_s7 + $0x8] sm:$0xff]   ;;  %vm748_vm0 = vmmov 0   ;;  %v692_v6 = vld [vmem:[%s822_s7 + $0x10] sm:$0xff]   ;;  %p611_p11 = scmp.ne.s32.totalorder %s736_s14, 2 }
  0x28   : > { %626 = vmatprep.subr.bf16.mxu0 %v747_v4  ;;  %642 = vmatprep.mubr.msk.bf16.mxu0 %vm748_vm0, %v747_v4  ;;  %v693_v7 = vld [vmem:[%s822_s7 + $0x18] sm:$0xff]   ;;  %v694_v8 = vld [vmem:[%s822_s7 + $0x20] sm:$0xff]   ;;  %v695_v9 = vld [vmem:[%s822_s7 + $0x28] sm:$0xff]   ;;  %v749_v1 = vmov (!%p611_p11), -1.0  }
  0x29   : > { %627 = vmatpush3.bf16.msra.mxu0 %v690_v3  ;;  %v696_v10 = vld [vmem:[%s822_s7 + $0x30] sm:$0xff]   ;;  %v697_v11 = vld [vmem:[%s822_s7 + $0x38] sm:$0xff]   ;;  %v297_v15 = vld [vmem:[%s890_s3] sm:$0xff] }
  0x2a   : > { %628 = vmatprep.subr.bf16.mxu0 %v747_v4  ;;  %v299_v12 = vld [vmem:[%s233_s8] sm:$0xff]  ;;  %v300_v13 = vld [vmem:[%s233_s8 + $0x8] sm:$0xff] }
  0x2b   : > { %v301_v14 = vpack.c.bf16 %v300_v13, %v299_v12  ;;  %v298_v17 = vld [vmem:[%s890_s3 + $0x8] sm:$0xff]  ;;  %v612_v24 = vld [vmem:[%s889_s2] ss:$0 sm:$0xff] (!%p611_p11) }
  0x2d   : > { %629 = vmatpush3.bf16.msra.mxu0 %v691_v5 }
  0x2e   : > { %630 = vmatprep.subr.bf16.mxu0 %v747_v4 }
  0x31   : > { %631 = vmatpush3.bf16.msra.mxu0 %v692_v6 }
  0x32   : > { %632 = vmatprep.subr.bf16.mxu0 %v747_v4 }
  0x35   : > { %633 = vmatpush3.bf16.msra.mxu0 %v693_v7 }
  0x36   : > { %634 = vmatprep.subr.bf16.mxu0 %v747_v4 }
  0x39   : > { %635 = vmatpush3.bf16.msra.mxu0 %v694_v8 }
  0x3a   : > { %636 = vmatprep.subr.bf16.mxu0 %v747_v4 }
  0x3d   : > { %637 = vmatpush3.bf16.msra.mxu0 %v695_v9 }
  0x3e   : > { %638 = vmatprep.subr.bf16.mxu0 %v747_v4 }
  0x41   : > { %639 = vmatpush3.bf16.msra.mxu0 %v696_v10 }
  0x42   : > { %640 = vmatprep.subr.bf16.mxu0 %v747_v4 }
  0x45   : > { %641 = vmatpush3.bf16.msra.mxu0 %v697_v11 }
  0x48   : > { %643 = vmatmul.mubr.bf16.vlgmr.msra.gmra.mrb[0].mxu0 %v301_v14 }
 0x11a   : > { %414 = sbr.rel (%p611_p11) target bundleno = 346 (0x15a), region = 78 }
 0x11b   : > { %v400_v16 = vpop.f32.mrb[0].mxu0 }
 0x11c   : > { %v407_v18 = vadd.f32 %v400_v16, %v297_v15  ;;  %v644_v19 = vpop.f32.mrb[1].mxu0 }
 0x11d   : > { %v403_v20 = vpop.f32.mrb[2].mxu0 }
 0x11e   : > { %409 = vst [vmem:[%s890_s3] sm:$0xff] %v407_v18  ;;  %v408_v21 = vadd.f32 %v403_v20, %v298_v17  ;;  %v645_v22 = vpop.f32.mrb[3].mxu0 }
 0x120   : > { %410 = vst [vmem:[%s890_s3 + $0x8] sm:$0xff] %v408_v21 }
 0x125   : > { %v415_v23 = vld [vmem:[%s890_s3] sm:$0xff] }
 0x126   : > { %v424_v26 = vadd.f32 %v612_v24, %v415_v23 }
 0x127   : > { %v416_v25 = vld [vmem:[%s890_s3 + $0x8] sm:$0xff] }
 0x128   : > { %v425_v27 = vadd.f32 %v612_v24, %v416_v25  ;;  %v428_v28 = vmul.f32 0.70710677, %v424_v26  ;;  %v426_v7 = vmul.f32 0.5, %v424_v26 }
 0x12a   : > { %v429_v29 = vmul.f32 0.70710677, %v425_v27  ;;  %v434_v30 = vand.u32 2147483647, %v428_v28  ;;  %vm430_vm1 = vcmp.ge.f32.partialorder %v428_v28, 0.0  ;;  %v427_v9 = vmul.f32 0.5, %v425_v27 }
 0x12b   : > { %v432_v2 = vsel %vm430_vm1, 1.0, %v749_v1 }
 0x12c   : > { %v435_v31 = vand.u32 2147483647, %v429_v29  ;;  %v436_v32 = vmul.f32 0.3275911, %v434_v30  ;;  %v462_v36 = vsub.f32 0.0, %v434_v30  ;;  %vm431_vm2 = vcmp.ge.f32.partialorder %v429_v29, 0.0 }
 0x12d   : > { %v433_v5 = vsel %vm431_vm2, 1.0, %v749_v1 }
 0x12e   : > { %v437_v33 = vmul.f32 0.3275911, %v435_v31  ;;  %v438_v34 = vadd.f32 1.0, %v436_v32  ;;  %v463_v37 = vsub.f32 0.0, %v435_v31  ;;  %v464_v38 = vmul.f32 %v462_v36, %v434_v30 }
 0x130   : > { %v439_v35 = vadd.f32 1.0, %v437_v33  ;;  %698 = vrcp.f32 %v438_v34  ;;  %v465_v39 = vmul.f32 %v463_v37, %v435_v31  ;;  %v466_v43 = vmul.f32 1.442695, %v464_v38 }
 0x132   : > { %700 = vrcp.f32 %v439_v35  ;;  %v468_v46 = vmul.f32 1.442695, %v465_v39 }
 0x133   : > { %702 = vpow2.f32 %v466_v43 }
 0x134   : > { %704 = vpow2.f32 %v468_v46 }
 0x13a   : > { %v699_v40 = vpop.eup %698 }
 0x13b   : > { %v444_v42 = vmul.f32 1.0614054, %v699_v40 }
 0x13c   : > { %v701_v41 = vpop.eup %700 }
 0x13d   : > { %v445_v44 = vmul.f32 1.0614054, %v701_v41  ;;  %v446_v45 = vadd.f32 -1.4531521, %v444_v42  ;;  %v703_v59 = vpop.eup %702 }
 0x13e   : > { %v705_v61 = vpop.eup %704 }
 0x13f   : > { %v447_v47 = vadd.f32 -1.4531521, %v445_v44  ;;  %v448_v48 = vmul.f32 %v699_v40, %v446_v45 }
 0x141   : > { %v449_v49 = vmul.f32 %v701_v41, %v447_v47  ;;  %v450_v50 = vadd.f32 1.4214138, %v448_v48 }
 0x143   : > { %v451_v51 = vadd.f32 1.4214138, %v449_v49  ;;  %v452_v52 = vmul.f32 %v699_v40, %v450_v50 }
 0x145   : > { %v453_v53 = vmul.f32 %v701_v41, %v451_v51  ;;  %v454_v54 = vadd.f32 -0.28449672, %v452_v52 }
 0x147   : > { %v455_v55 = vadd.f32 -0.28449672, %v453_v53  ;;  %v456_v56 = vmul.f32 %v699_v40, %v454_v54 }
 0x149   : > { %v457_v57 = vmul.f32 %v701_v41, %v455_v55  ;;  %v458_v58 = vadd.f32 0.2548296, %v456_v56 }
 0x14b   : > { %v459_v60 = vadd.f32 0.2548296, %v457_v57  ;;  %v460_v62 = vmul.f32 %v699_v40, %v458_v58 }
 0x14d   : > { %v461_v63 = vmul.f32 %v701_v41, %v459_v60  ;;  %v470_v0 = vmul.f32 %v703_v59, %v460_v62 }
 0x14f   : > { %v471_v3 = vmul.f32 %v705_v61, %v461_v63  ;;  %v472_v4 = vsub.f32 1.0, %v470_v0 }
 0x151   : > { %v473_v6 = vsub.f32 1.0, %v471_v3  ;;  %v474_v8 = vmul.f32 %v472_v4, %v432_v2 }
 0x153   : > { %v475_v10 = vmul.f32 %v473_v6, %v433_v5  ;;  %v476_v11 = vadd.f32 1.0, %v474_v8 }
 0x155   : > { %v477_v12 = vadd.f32 1.0, %v475_v10  ;;  %v478_v13 = vmul.f32 %v476_v11, %v426_v7 }
 0x157   : > { %v479_v14 = vmul.f32 %v477_v12, %v427_v9  ;;  %480 = vst [vmem:[%s890_s3] sm:$0xff] %v478_v13 }
 0x159   : > { %481 = vst [vmem:[%s890_s3 + $0x8] sm:$0xff] %v479_v14 }
 0x15a PF: > { %s13_s16 = sadd.s32 1, %s744_s16   ;;  %s891_s12 = smov %s732_s13 }
 0x15b   : > { %p10_p12 = scmp.ge.s32.totalorder %s13_s16, 5   ;;  %s892_s13 = smov %s805_s20 }
 0x15c   : > { %s893_s14 = smov %s740_s15  ;;  %s894_s15 = smov %s896_s17 }
 0x15d   :  { %12 = sbr.rel (!%p10_p12) target bundleno = 3 (0x3), region = 119 }

// kernel: whisper_forward.46
= control target key start
LH: loop header
LB: loop body
LE: loop exit
PB: predicated region body
PF: predicated region fallthrough
CT: control target
= control target key end

     0   :  { %s789_s12 = smov 0   ;;  %s791_s13 = smov 0   ;;  %s894_s0 = inlined_call_operand.vmem [shape: f32[16,128], index: 0, kind: input, shape index: {}]   ;;  %s895_s1 = inlined_call_operand.vmem [shape: bf16[128,384], index: 1, kind: input, shape index: {}]   ;;  %s896_s2 = inlined_call_operand.vmem [shape: f32[1,384], index: 2, kind: input, shape index: {}]   ;;  %s897_s3 = inlined_call_operand.vmem [shape: f32[16,384], index: 3, kind: output, shape index: {}]  }
   0x1   :  { %s793_s14 = smov 0   ;;  %s795_s15 = smov 0  }
   0x2   :  { %s797_s16 = smov 0  }
   0x3 LB: > { %s28_s17 = sadd.s32 1, %s761_s15  ;;  %s625_s18 = sadd.s32 4294967295, %s765_s16   ;;  %s765_s16 = sphi %s797_s16, %s13_s16   ;;  %s761_s15 = sphi %s795_s15, %s902_s15   ;;  %s757_s14 = sphi %s793_s14, %s901_s14   ;;  %s753_s13 = sphi %s791_s13, %s900_s13   ;;  %s749_s12 = sphi %s789_s12, %s899_s12  }
   0x4   : > { %p30_p0 = scmp.ge.s32.totalorder %s28_s17, 3  ;;  %p76_p1 = scmp.ne.s32.totalorder %s753_s13, %s749_s12 }
   0x5   : > { %p77_p2 = scmp.eq.s32.totalorder %s765_s16, 0  ;;  %p134_p4 = scmp.eq.s32.totalorder %s625_s18, 2 }
   0x6   : > { %s904_s17 = smov (%p30_p0, %s28_s17), 0  ;;  %s69_s20 = sadd.s32 1, %s753_s13 }
   0x7   : > { %p78_p3 = por %p77_p2, %p76_p1  ;;  %s65_s19 = ssub.s32 %s761_s15, %s904_s17 }
   0x8   : > { %p67_p5 = scmp.eq.s32.totalorder %s65_s19, 0  ;;  %p824_p6 = por %p134_p4, %p76_p1 }
   0x9   : > { %p629_p7 = scmp.ge.s32.totalorder %s765_s16, 3 }
   0xa   : > { %s829_s22 = scalar_select %p67_p5, %s753_s13, %s69_s20  }
   0xb   : > { %168 = sbr.rel (%p629_p7) target bundleno = 32 (0x20), region = 20 }
  0x12   : > { %171 = sbr.rel (!%p78_p3) target bundleno = 32 (0x20), region = 24  ;;  %s173_s23 = sand.u32 (%p78_p3), 1, %s753_s13  }
  0x13   : > { %s631_s24 = sshll.u32 (%p78_p3), %s761_s15, 2  ;;  %s630_s25 = sshll.u32 (%p78_p3), %s173_s23, 6 }
  0x14   : > { %s837_s28 = scalar_lea.vmem (%p78_p3), %s895_s1, %s631_s24  ;;  %s175_s29 = scalar_lea.vmem (%p78_p3), [#allocation2], %s630_s25 }
  0x15   : > { %v196_v0 = vld [vmem:[%s837_s28] sm:$0xf] (%p78_p3)  ;;  %v198_v1 = vld [vmem:[%s837_s28 + $0xc] sm:$0xf] (%p78_p3)  ;;  %v200_v2 = vld [vmem:[%s837_s28 + $0x18] sm:$0xf] (%p78_p3) }
  0x16   : > { %197 = vst [vmem:[%s175_s29] sm:$0xf] (%p78_p3), %v196_v0  ;;  %199 = vst [vmem:[%s175_s29 + $0x4] sm:$0xf] (%p78_p3), %v198_v1  ;;  %v202_v3 = vld [vmem:[%s837_s28 + $0x24] sm:$0xf] (%p78_p3) }
  0x17   : > { %v204_v4 = vld [vmem:[%s837_s28 + $0x30] sm:$0xf] (%p78_p3)  ;;  %201 = vst [vmem:[%s175_s29 + $0x8] sm:$0xf] (%p78_p3), %v200_v2  ;;  %203 = vst [vmem:[%s175_s29 + $0xc] sm:$0xf] (%p78_p3), %v202_v3 }
  0x18   : > { %205 = vst [vmem:[%s175_s29 + $0x10] sm:$0xf] (%p78_p3), %v204_v4  ;;  %v206_v5 = vld [vmem:[%s837_s28 + $0x3c] sm:$0xf] (%p78_p3)  ;;  %v208_v6 = vld [vmem:[%s837_s28 + $0x48] sm:$0xf] (%p78_p3) }
  0x19   : > { %v210_v7 = vld [vmem:[%s837_s28 + $0x54] sm:$0xf]  ;;  %207 = vst [vmem:[%s175_s29 + $0x14] sm:$0xf] %v206_v5  ;;  %209 = vst [vmem:[%s175_s29 + $0x18] sm:$0xf] %v208_v6 }
  0x1a   : > { %211 = vst [vmem:[%s175_s29 + $0x1c] sm:$0xf] %v210_v7  ;;  %v212_v8 = vld [vmem:[%s837_s28 + $0x60] sm:$0xf]  ;;  %v214_v9 = vld [vmem:[%s837_s28 + $0x6c] sm:$0xf] }
  0x1b   : > { %v216_v10 = vld [vmem:[%s837_s28 + $0x78] sm:$0xf]  ;;  %213 = vst [vmem:[%s175_s29 + $0x20] sm:$0xf] %v212_v8  ;;  %215 = vst [vmem:[%s175_s29 + $0x24] sm:$0xf] %v214_v9 }
  0x1c   : > { %217 = vst [vmem:[%s175_s29 + $0x28] sm:$0xf] %v216_v10  ;;  %v218_v11 = vld [vmem:[%s837_s28 + $0x84] sm:$0xf]  ;;  %v220_v12 = vld [vmem:[%s837_s28 + $0x90] sm:$0xf] }
  0x1d   : > { %v222_v13 = vld [vmem:[%s837_s28 + $0x9c] sm:$0xf]  ;;  %219 = vst [vmem:[%s175_s29 + $0x2c] sm:$0xf] %v218_v11  ;;  %221 = vst [vmem:[%s175_s29 + $0x30] sm:$0xf] %v220_v12 }
  0x1e   : > { %223 = vst [vmem:[%s175_s29 + $0x34] sm:$0xf] %v222_v13  ;;  %v224_v14 = vld [vmem:[%s837_s28 + $0xa8] sm:$0xf]  ;;  %v226_v15 = vld [vmem:[%s837_s28 + $0xb4] sm:$0xf] }
  0x1f   : > { %225 = vst [vmem:[%s175_s29 + $0x38] sm:$0xf] %v224_v14  ;;  %227 = vst [vmem:[%s175_s29 + $0x3c] sm:$0xf] %v226_v15 }
  0x20 PF: > { %p632_p8 = scmp.ge.s32.totalorder %s765_s16, 1  ;;  %p287_p9 = scmp.lt.s32.totalorder %s765_s16, 4 }
  0x22   : > { %p288_p10 = pnand %p632_p8, %p287_p9 }
  0x23   : > { %s294_s30 = sand.u32 (!%p288_p10), 1, %s749_s12   ;;  %v767_v16 = vmov (!%p288_p10), 0.0   ;;  %vm768_vm0 = vmmov (!%p288_p10), 0   ;;  %v350_v25 = vld [vmem:[%s894_s0] sm:$0xff] (!%p288_p10)  ;;  %v351_v26 = vld [vmem:[%s894_s0 + $0x8] sm:$0xff] (!%p288_p10)  ;;  %p337_p11 = scmp.lt.s32.totalorder (!%p288_p10), %s757_s14, 2 }
  0x24   : > { %291 = sbr.rel (%p288_p10) target bundleno = 295 (0x127), region = 69  ;;  %657 = vmatprep.subr.bf16.mxu0 (!%p288_p10), %v767_v16  ;;  %s633_s4 = sshll.u32 (!%p288_p10), %s294_s30, 6  ;;  %673 = vmatprep.mubr.msk.bf16.mxu0 (!%p288_p10), %vm768_vm0, %v767_v16  ;;  %v352_v27 = vpack.c.bf16 (!%p288_p10), %v351_v26, %v350_v25 }
  0x25   : > { %s296_s5 = scalar_lea.vmem (!%p288_p10), [#allocation2], %s633_s4  ;;  %s634_s20 = sshll.u32 (!%p288_p10), %s294_s30, 4 }
  0x26   : > { %v719_v17 = vld [vmem:[%s296_s5] sm:$0xff] (!%p288_p10)   ;;  %v720_v18 = vld [vmem:[%s296_s5 + $0x8] sm:$0xff] (!%p288_p10)   ;;  %v721_v19 = vld [vmem:[%s296_s5 + $0x10] sm:$0xff] (!%p288_p10)   ;;  %s326_s23 = scalar_lea.vmem (!%p288_p10), [#allocation3], %s634_s20 }
  0x27   : > { %658 = vmatpush3.bf16.msra.mxu0 (!%p288_p10), %v719_v17  ;;  %v722_v20 = vld [vmem:[%s296_s5 + $0x18] sm:$0xff] (!%p288_p10)   ;;  %v723_v21 = vld [vmem:[%s296_s5 + $0x20] sm:$0xff] (!%p288_p10)   ;;  %v724_v22 = vld [vmem:[%s296_s5 + $0x28] sm:$0xff] (!%p288_p10)  }
  0x28   : > { %659 = vmatprep.subr.bf16.mxu0 (!%p288_p10), %v767_v16  ;;  %v725_v23 = vld [vmem:[%s296_s5 + $0x30] sm:$0xff] (!%p288_p10)   ;;  %v726_v24 = vld [vmem:[%s296_s5 + $0x38] sm:$0xff] (!%p288_p10)  }
  0x2b   : > { %660 = vmatpush3.bf16.msra.mxu0 %v720_v18  ;;  %s338_s10 = scalar_select %p337_p11, %s757_s14, 2 }
  0x2c   : > { %661 = vmatprep.subr.bf16.mxu0 %v767_v16  ;;  %s645_s24 = sshll.u32 (%p824_p6), %s757_s14, 3 }
  0x2d   : > { %s339_s19 = scalar_lea.vmem %s896_s2, %s338_s10  ;;  %s489_s26 = scalar_lea.vmem (%p824_p6), %s897_s3, %s645_s24 }
  0x2e   : > { %v643_v29 = vld [vmem:[%s339_s19] ss:$0 sm:$0xff] }
  0x2f   : > { %662 = vmatpush3.bf16.msra.mxu0 %v721_v19 }
  0x30   : > { %663 = vmatprep.subr.bf16.mxu0 %v767_v16 }
  0x33   : > { %664 = vmatpush3.bf16.msra.mxu0 %v722_v20 }
  0x34   : > { %665 = vmatprep.subr.bf16.mxu0 %v767_v16 }
  0x37   : > { %666 = vmatpush3.bf16.msra.mxu0 %v723_v21 }
  0x38   : > { %667 = vmatprep.subr.bf16.mxu0 %v767_v16 }
  0x3b   : > { %668 = vmatpush3.bf16.msra.mxu0 %v724_v22 }
  0x3c   : > { %669 = vmatprep.subr.bf16.mxu0 %v767_v16 }
  0x3f   : > { %670 = vmatpush3.bf16.msra.mxu0 %v725_v23 }
  0x40   : > { %671 = vmatprep.subr.bf16.mxu0 %v767_v16 }
  0x43   : > { %672 = vmatpush3.bf16.msra.mxu0 %v726_v24 }
  0x46   : > { %674 = vmatmul.mubr.bf16.vlgmr.msra.gmra.mrb[0].mxu0 %v352_v27 }
 0x118   : > { %484 = sbr.rel (!%p824_p6) target bundleno = 295 (0x127), region = 85 }
 0x119   : > { %v451_v28 = vpop.f32.mrb[0].mxu0 }
 0x11a   : > { %v675_v30 = vpop.f32.mrb[1].mxu0  ;;  %v474_v32 = vadd.f32 %v643_v29, %v451_v28 }
 0x11b   : > { %v454_v31 = vpop.f32.mrb[2].mxu0 }
 0x11c   : > { %v676_v33 = vpop.f32.mrb[3].mxu0  ;;  %476 = vst [vmem:[%s326_s23] sm:$0xff] %v474_v32  ;;  %v475_v34 = vadd.f32 %v643_v29, %v454_v31 }
 0x11e   : > { %477 = vst [vmem:[%s326_s23 + $0x8] sm:$0xff] %v475_v34 }
 0x123   : > { %v519_v35 = vld [vmem:[%s326_s23] sm:$0xff] }
 0x124   : > { %520 = vst [vmem:[%s489_s26] sm:$0xff] %v519_v35 }
 0x125   : > { %v521_v36 = vld [vmem:[%s326_s23 + $0x8] sm:$0xff] }
 0x126   : > { %522 = vst [vmem:[%s489_s26 + $0x18] sm:$0xff] %v521_v36 }
 0x127 PF: > { %s13_s16 = sadd.s32 1, %s765_s16   ;;  %s899_s12 = smov %s753_s13 }
 0x128   : > { %p10_p12 = scmp.ge.s32.totalorder %s13_s16, 5   ;;  %s900_s13 = smov %s829_s22 }
 0x129   : > { %s901_s14 = smov %s761_s15  ;;  %s902_s15 = smov %s904_s17 }
 0x12a   :  { %12 = sbr.rel (!%p10_p12) target bundleno = 3 (0x3), region = 160 }

// kernel: whisper_forward.47
= control target key start
LH: loop header
LB: loop body
LE: loop exit
PB: predicated region body
PF: predicated region fallthrough
CT: control target
= control target key end

     0   :  { %s947_s12 = smov 0   ;;  %s949_s13 = smov 0   ;;  %s1034_s0 = inlined_call_operand.vmem [shape: f32[2,8,384], index: 0, kind: input, shape index: {}, may-alias: {0,1,2}]   ;;  %s1035_s1 = inlined_call_operand.vmem [shape: f32[2,8,384], index: 1, kind: input, shape index: {}, may-alias: {0,1,2}]   ;;  %s1036_s2 = inlined_call_operand.vmem [shape: f32[2,8,384], index: 2, kind: input, shape index: {}, may-alias: {0,1,2}]   ;;  %s1037_s3 = inlined_call_operand.vmem [shape: f32[2,8,128], index: 3, kind: output, shape index: {}]  }
   0x1   :  { %s951_s14 = smov 0  }
   0x2 LB: > { %s39_s15 = sadd.s32 1, %s916_s13  ;;  %p805_p0 = scmp.ge.s32.totalorder %s920_s14, 1  ;;  %s920_s14 = sphi %s951_s14, %s13_s14   ;;  %s916_s13 = sphi %s949_s13, %s1039_s13   ;;  %s912_s12 = sphi %s947_s12, %s1038_s12  }
   0x3   : > { %p41_p1 = scmp.ge.s32.totalorder %s39_s15, 2  ;;  %p228_p2 = scmp.lt.s32.totalorder %s920_s14, 3 }
   0x5   : > { %s1041_s15 = smov (%p41_p1, %s39_s15), 0  ;;  %p229_p3 = pnand %p805_p0, %p228_p2 }
   0x6   : > { %p290_p4 = scmp.lt.s32.totalorder (!%p229_p3), %s912_s12, 1  ;;  %v922_v0 = vmov (!%p229_p3), 0.0   ;;  %vm923_vm0 = vmmov (!%p229_p3), 0   ;;  %vm362_vm1 = vcmask (!%p229_p3), 523264   ;;  %vm345_vm2 = vcmask (!%p229_p3), 7168   ;;  %s926_s24 = smov (!%p229_p3), 64  }
   0x7   : > { %232 = sbr.rel (%p229_p3) target bundleno = 1375 (0x55f), region = 32  ;;  %828 = vmatprep.subr.bf16.mxu0 (!%p229_p3), %v922_v0  ;;  %830 = vmatprep.mubr.msk.bf16.mxu0 (!%p229_p3), %vm923_vm0, %v922_v0  ;;  %v924_v6 = vmov (!%p229_p3), -inf   ;;  %348 = vst.msk [vmem:[#allocation3] sm:$0xff] (!%p229_p3), %vm345_vm2, %v922_v0  ;;  %349 = vst.msk [vmem:[#allocation3 + $0x8] sm:$0xff] (!%p229_p3), %vm345_vm2, %v922_v0  ;;  %vm410_vm3 = vcmask (!%p229_p3), 64512   ;;  %v925_v12 = vmov (!%p229_p3), 0  }
   0x8   : > { %834 = vmatprep.subr.bf16.mxu1 (!%p229_p3), %v922_v0  ;;  %836 = vmatprep.mubr.msk.bf16.mxu1 (!%p229_p3), %vm923_vm0, %v922_v0  ;;  %346 = vst.msk [vmem:[#allocation2] sm:$0xff] (!%p229_p3), %vm345_vm2, %v924_v6  ;;  %347 = vst.msk [vmem:[#allocation2 + $0x8] sm:$0xff] (!%p229_p3), %vm345_vm2, %v924_v6  ;;  %vm444_vm4 = vcmask (!%p229_p3), 1043456  }
   0x9   : > { %884 = vset.pattern.permute.xlu0 (!%p229_p3), %v925_v12  ;;  %885 = vset.pattern.permute.xlu1 (!%p229_p3), %v925_v12 }
   0xe   : > { %s1043_s12 = smov (!%p290_p4, %s912_s12), 1  ;;  %v426_v33 = vld [vmem:[#allocation3] sm:$0xff]  ;;  %v558_v60 = vld [vmem:[#allocation3 + $0x8] sm:$0xff] }
   0xf   : > { %s974_s16 = smul.u32 24, %s1043_s12  ;;  %v409_v13 = vld [vmem:[#allocation2] sm:$0xff]  ;;  %v541_v48 = vld [vmem:[#allocation2 + $0x8] sm:$0xff]  ;;  %s809_s29 = sshll.u32 %s1043_s12, 3 }
  0x10   : > { %s339_s5 = scalar_lea.vmem %s1037_s3, %s809_s29 }
  0x11   : > { %s817_s17 = sadd.s32 8, %s974_s16  ;;  %s301_s23 = scalar_lea.vmem %s1034_s0, %s974_s16 }
  0x12   : > { %s314_s20 = scalar_lea.vmem %s1035_s1, %s817_s17  ;;  %v356_v4 = vld [vmem:[%s301_s23] sm:$0xff]  ;;  %s819_s25 = sadd.s32 16, %s974_s16 }
  0x13   : > { %v358_v1 = vld [vmem:[%s314_s20] sm:$0xff]  ;;  %v357_v5 = vpack.c.bf16 %v356_v4, %v356_v4  ;;  %s328_s28 = scalar_lea.vmem %s1036_s2, %s819_s25 }
  0x14   : > { %v359_v2 = vpack.c.bf16 %v358_v1, %v358_v1  ;;  %v360_v15 = vld [vmem:[%s328_s28] sm:$0xff] }
  0x15   : > { %v361_v18 = vpack.c.bf16 %v360_v15, %v360_v15 }
  0x16   : > { %v367_v3 = vsel %vm362_vm1, %v359_v2, 0  ;;  %492 = vrot.lane.b32.xlu1 %v359_v2, %s926_s24 }
  0x17   : > { %829 = vmatpush3.bf16.xpose.msra.mxu0 %v367_v3  ;;  %v446_v19 = vsel %vm444_vm4, %v361_v18, 0 }
  0x18   : > { %846 = vmatprep.subr.bf16.mxu0 %v922_v0  ;;  %835 = vmatpush3.bf16.msra.mxu1 %v446_v19 }
  0x19   : > { %840 = vmatprep.subr.bf16.mxu1 %v922_v0 }
  0x1a   : > { %489 = vrot.lane.b32.xlu1 %v357_v5, %s926_s24 }
  0x1e   : > { %831 = vmatmul.mubr.msk.bf16.vlgmr.msra.gmra.mrb[0].mxu0 %vm362_vm1, %v357_v5 }
  0x1f   : > { %848 = vmatprep.mubr.msk.bf16.mxu0 %vm923_vm0, %v922_v0 }
  0x88   : > { %v493_v25 = vpop.permute.xlu1 %492 }
  0x89   : > { %v498_v27 = vsel %vm362_vm1, %v493_v25, 0 }
  0x8c   : > { %v490_v30 = vpop.permute.xlu1 %489 }
  0xf1   : > { %v403_v7 = vpop.f32.mrb[0].mxu0 }
  0xf2   : > { %v832_v8 = vpop.f32.mrb[1].mxu0  ;;  %v411_v9 = vsel %vm410_vm3, %v403_v7, -inf }
  0xf3   : > { %412 = vmax.xlane.f32.xlu0 %v411_v9  ;;  %v406_v10 = vpop.f32.mrb[2].mxu0 }
  0xf4   : > { %v833_v11 = vpop.f32.mrb[3].mxu0 }
 0x180   : > { %v413_v14 = vpop.xlane.xlu0 %412 }
 0x181   : > { %v414_v16 = vmax.f32 %v409_v13, %v413_v14 }
 0x183   : > { %v415_v17 = vsub.f32 %v409_v13, %v414_v16  ;;  %434 = vst.msk [vmem:[#allocation2] sm:$0xff] %vm345_vm2, %v414_v16  ;;  %420 = vperm.xlu0 %884, %v414_v16  }
 0x185   : > { %v416_v31 = vmul.f32 1.442695, %v415_v17 }
 0x187   : > { %573 = vrot.lane.b32.xlu0 %v361_v18, %s926_s24 }
 0x202   : > { %v421_v20 = vpop.permute.xlu0 %420 }
 0x203   : > { %v423_v21 = vsub.f32 %v403_v7, %v421_v20 }
 0x205   : > { %v424_v22 = vmul.f32 1.442695, %v423_v21 }
 0x206   : > { %v574_v23 = vpop.permute.xlu0 %573 }
 0x207   : > { %886 = vpow2.f32 %v424_v22  ;;  %v579_v24 = vsel %vm444_vm4, %v574_v23, 0 }
 0x208   : > { %847 = vmatpush3.bf16.msra.mxu0 %v579_v24  ;;  %888 = vpow2.f32 %v416_v31 }
 0x211   : > { %v887_v26 = vpop.eup %886 }
 0x212   : > { %v428_v28 = vsel %vm410_vm3, %v887_v26, 0.0  ;;  %v440_v29 = vpack.c.bf16 %v887_v26, %v887_v26  ;;  %v889_v32 = vpop.eup %888 }
 0x213   : > { %429 = vadd.xlane.f32.xlu0 %v428_v28  ;;  %v427_v34 = vmul.f32 %v889_v32, %v426_v33 }
 0x214   : > { %837 = vmatmul.mubr.msk.bf16.vlgmr.msra.gmra.mrb[0].mxu1 %vm410_vm3, %v440_v29 }
 0x215   : > { %841 = vmatpush3.bf16.xpose.msra.mxu1 %v498_v27  ;;  %842 = vmatprep.mubr.msk.bf16.mxu1 %vm923_vm0, %v922_v0 }
 0x21c   : > { %843 = vmatmul.mubr.msk.bf16.vlgmr.msra.gmra.mrb[4].mxu1 %vm362_vm1, %v490_v30 }
 0x229   : > { %437 = vperm.xlu0 %884, %v889_v32  }
 0x2a0   : > { %v430_v35 = vpop.xlane.xlu0 %429 }
 0x2a1   : > { %v431_v36 = vadd.f32 %v430_v35, %v427_v34 }
 0x2a3   : > { %433 = vst.msk [vmem:[#allocation3] sm:$0xff] %vm345_vm2, %v431_v36 }
 0x2a8   : > { %v438_v6 = vpop.permute.xlu0 %437 }
 0x2aa   : > { %v634_v37 = vld [vmem:[#allocation3] sm:$0xff] }
 0x2ab   : > { %890 = vrcp.f32 %v634_v37 }
 0x2b5   : > { %v891_v38 = vpop.eup %890 }
 0x2b6   : > { %638 = vperm.xlu0 %884, %v891_v38  }
 0x2e7   : > { %v482_v39 = vpop.f32.mrb[0].mxu1 }
 0x2e8   : > { %v838_v40 = vpop.f32.mrb[1].mxu1 }
 0x2e9   : > { %v485_v41 = vpop.f32.mrb[2].mxu1 }
 0x2ea   : > { %v839_v42 = vpop.f32.mrb[3].mxu1 }
 0x2ef   : > { %v534_v43 = vpop.f32.mrb[4].mxu1 }
 0x2f0   : > { %v844_v44 = vpop.f32.mrb[5].mxu1  ;;  %v542_v45 = vsel %vm410_vm3, %v534_v43, -inf }
 0x2f1   : > { %543 = vmax.xlane.f32.xlu1 %v542_v45  ;;  %v537_v46 = vpop.f32.mrb[6].mxu1 }
 0x2f2   : > { %v845_v47 = vpop.f32.mrb[7].mxu1 }
 0x335   : > { %v639_v7 = vpop.permute.xlu0 %638 }
 0x37e   : > { %v544_v49 = vpop.xlane.xlu1 %543 }
 0x37f   : > { %v545_v50 = vmax.f32 %v541_v48, %v544_v49 }
 0x381   : > { %v546_v51 = vsub.f32 %v541_v48, %v545_v50  ;;  %565 = vst.msk [vmem:[#allocation2 + $0x8] sm:$0xff] %vm345_vm2, %v545_v50  ;;  %551 = vperm.xlu1 %885, %v545_v50  }
 0x383   : > { %v547_v58 = vmul.f32 1.442695, %v546_v51 }
 0x400   : > { %v552_v52 = vpop.permute.xlu1 %551 }
 0x401   : > { %v554_v53 = vsub.f32 %v534_v43, %v552_v52 }
 0x403   : > { %v555_v54 = vmul.f32 1.442695, %v554_v53 }
 0x405   : > { %892 = vpow2.f32 %v555_v54 }
 0x406   : > { %894 = vpow2.f32 %v547_v58 }
 0x40f   : > { %v893_v55 = vpop.eup %892 }
 0x410   : > { %v560_v56 = vsel %vm410_vm3, %v893_v55, 0.0  ;;  %v571_v57 = vpack.c.bf16 %v893_v55, %v893_v55  ;;  %v895_v59 = vpop.eup %894 }
 0x411   : > { %561 = vadd.xlane.f32.xlu1 %v560_v56  ;;  %v559_v61 = vmul.f32 %v895_v59, %v558_v60 }
 0x412   : > { %849 = vmatmul.mubr.msk.bf16.vlgmr.msra.gmra.mrb[4].mxu0 %vm410_vm3, %v571_v57 }
 0x422   : > { %568 = vperm.xlu1 %885, %v895_v59  }
 0x49e   : > { %v562_v62 = vpop.xlane.xlu1 %561 }
 0x49f   : > { %v563_v63 = vadd.f32 %v562_v62, %v559_v61 }
 0x4a1   : > { %564 = vst.msk [vmem:[#allocation3 + $0x8] sm:$0xff] %vm345_vm2, %v563_v63 }
 0x4a2   : > { %v569_v8 = vpop.permute.xlu1 %568 }
 0x4a3   : > { %v621_v10 = vsel %vm362_vm1, %v438_v6, %v569_v8 }
 0x4a4   : > { %v628_v11 = vmul.f32 0.0, %v621_v10 }
 0x4a8   : > { %v642_v0 = vld [vmem:[#allocation3 + $0x8] sm:$0xff] }
 0x4a9   : > { %896 = vrcp.f32 %v642_v0 }
 0x4b3   : > { %v897_v1 = vpop.eup %896 }
 0x4b4   : > { %646 = vperm.xlu0 %884, %v897_v1  }
 0x4e5   : > { %v615_v2 = vpop.f32.mrb[4].mxu0 }
 0x4e6   : > { %623 = vrot.lane.b32.xlu0 %v615_v2, %s926_s24  ;;  %v850_v3 = vpop.f32.mrb[5].mxu0 }
 0x4e7   : > { %v618_v4 = vpop.f32.mrb[6].mxu0 }
 0x4e8   : > { %v851_v5 = vpop.f32.mrb[7].mxu0 }
 0x533   : > { %v647_v9 = vpop.permute.xlu0 %646 }
 0x534   : > { %v650_v15 = vsel %vm362_vm1, %v639_v7, %v647_v9 }
 0x558   : > { %v624_v12 = vpop.permute.xlu0 %623 }
 0x559   : > { %v626_v13 = vsel %vm362_vm1, %v482_v39, %v624_v12 }
 0x55a   : > { %v629_v14 = vadd.f32 %v628_v11, %v626_v13 }
 0x55c   : > { %v652_v16 = vmul.f32 %v650_v15, %v629_v14 }
 0x55e   : > { %653 = vst [vmem:[%s339_s5] sm:$0xff] %v652_v16 }
 0x55f PF: > { %s13_s14 = sadd.s32 1, %s920_s14   ;;  %s1038_s12 = smov %s916_s13 }
 0x560   : > { %p10_p5 = scmp.ge.s32.totalorder %s13_s14, 4   ;;  %s1039_s13 = smov %s1041_s15 }
 0x562   :  { %12 = sbr.rel (!%p10_p5) target bundleno = 2 (0x2), region = 83 }

// kernel: whisper_forward.48
= control target key start
LH: loop header
LB: loop body
LE: loop exit
PB: predicated region body
PF: predicated region fallthrough
CT: control target
= control target key end

     0   :  { %v210_v0 = vmov 0.0   ;;  %vm211_vm0 = vmmov 0   ;;  %s282_s1 = inlined_call_operand.vmem [shape: bf16[128,128], index: 1, kind: input, shape index: {}]   ;;  %s283_s0 = inlined_call_operand.vmem [shape: f32[16,128], index: 0, kind: input, shape index: {}]   ;;  %s284_s2 = inlined_call_operand.vmem [shape: f32[1,128], index: 2, kind: input, shape index: {}]   ;;  %s285_s3 = inlined_call_operand.vmem [shape: f32[16,128], index: 3, kind: input, shape index: {}]   ;;  %s286_s4 = inlined_call_operand.vmem [shape: f32[16,128], index: 4, kind: output, shape index: {}]  }
   0x1   :  { %180 = vmatprep.subr.bf16.mxu0 %v210_v0  ;;  %v202_v1 = vld [vmem:[%s282_s1] sm:$0xff]   ;;  %196 = vmatprep.mubr.msk.bf16.mxu0 %vm211_vm0, %v210_v0  ;;  %v203_v2 = vld [vmem:[%s282_s1 + $0x8] sm:$0xff]   ;;  %v204_v3 = vld [vmem:[%s282_s1 + $0x10] sm:$0xff]  }
   0x2   :  { %181 = vmatpush3.bf16.msra.mxu0 %v202_v1  ;;  %v205_v4 = vld [vmem:[%s282_s1 + $0x18] sm:$0xff]   ;;  %v206_v5 = vld [vmem:[%s282_s1 + $0x20] sm:$0xff]   ;;  %v207_v6 = vld [vmem:[%s282_s1 + $0x28] sm:$0xff]  }
   0x3   :  { %182 = vmatprep.subr.bf16.mxu0 %v210_v0  ;;  %v208_v7 = vld [vmem:[%s282_s1 + $0x30] sm:$0xff]   ;;  %v209_v8 = vld [vmem:[%s282_s1 + $0x38] sm:$0xff]   ;;  %v26_v9 = vld [vmem:[%s283_s0] sm:$0xff] }
   0x4   :  { %v27_v10 = vld [vmem:[%s283_s0 + $0x8] sm:$0xff]  ;;  %v170_v13 = vld [vmem:[%s284_s2] ss:$0 sm:$0xff] }
   0x5   :  { %v28_v11 = vpack.c.bf16 %v27_v10, %v26_v9  ;;  %v152_v15 = vld [vmem:[%s285_s3] sm:$0xff]  ;;  %v153_v19 = vld [vmem:[%s285_s3 + $0x8] sm:$0xff] }
   0x6   :  { %183 = vmatpush3.bf16.msra.mxu0 %v203_v2 }
   0x7   :  { %184 = vmatprep.subr.bf16.mxu0 %v210_v0 }
   0xa   :  { %185 = vmatpush3.bf16.msra.mxu0 %v204_v3 }
   0xb   :  { %186 = vmatprep.subr.bf16.mxu0 %v210_v0 }
   0xe   :  { %187 = vmatpush3.bf16.msra.mxu0 %v205_v4 }
   0xf   :  { %188 = vmatprep.subr.bf16.mxu0 %v210_v0 }
  0x12   :  { %189 = vmatpush3.bf16.msra.mxu0 %v206_v5 }
  0x13   :  { %190 = vmatprep.subr.bf16.mxu0 %v210_v0 }
  0x16   :  { %191 = vmatpush3.bf16.msra.mxu0 %v207_v6 }
  0x17   :  { %192 = vmatprep.subr.bf16.mxu0 %v210_v0 }
  0x1a   :  { %193 = vmatpush3.bf16.msra.mxu0 %v208_v7 }
  0x1b   :  { %194 = vmatprep.subr.bf16.mxu0 %v210_v0 }
  0x1e   :  { %195 = vmatpush3.bf16.msra.mxu0 %v209_v8 }
  0x21   :  { %197 = vmatmul.mubr.bf16.vlgmr.msra.gmra.mrb[0].mxu0 %v28_v11 }
  0xf4   :  { %v127_v12 = vpop.f32.mrb[0].mxu0 }
  0xf5   :  { %v198_v14 = vpop.f32.mrb[1].mxu0  ;;  %v150_v17 = vadd.f32 %v170_v13, %v127_v12 }
  0xf6   :  { %v130_v16 = vpop.f32.mrb[2].mxu0 }
  0xf7   :  { %v199_v18 = vpop.f32.mrb[3].mxu0  ;;  %v154_v20 = vadd.f32 %v152_v15, %v150_v17  ;;  %v151_v21 = vadd.f32 %v170_v13, %v130_v16 }
  0xf9   :  { %156 = vst [vmem:[%s286_s4] sm:$0xff] %v154_v20  ;;  %v155_v22 = vadd.f32 %v153_v19, %v151_v21 }
  0xfb   :  { %157 = vst [vmem:[%s286_s4 + $0x8] sm:$0xff] %v155_v22 }

// kernel: whisper_forward.50
= control target key start
LH: loop header
LB: loop body
LE: loop exit
PB: predicated region body
PF: predicated region fallthrough
CT: control target
= control target key end

     0   :  { %s957_s12 = smov 0   ;;  %s959_s13 = smov 0   ;;  %s1093_s0 = inlined_call_operand.vmem [shape: f32[16,128], index: 0, kind: input, shape index: {}]   ;;  %s1094_s1 = inlined_call_operand.vmem [shape: bf16[128,512], index: 1, kind: input, shape index: {}]   ;;  %s1095_s2 = inlined_call_operand.vmem [shape: f32[1,512], index: 2, kind: input, shape index: {}]   ;;  %s1096_s3 = inlined_call_operand.vmem [shape: f32[16,512], index: 3, kind: output, shape index: {}]  }
   0x1   :  { %s961_s14 = smov 0   ;;  %s963_s15 = smov 0  }
   0x2   :  { %s965_s16 = smov 0  }
   0x3 LB: > { %s28_s17 = sadd.s32 1, %s929_s15  ;;  %s777_s18 = sadd.s32 4294967295, %s933_s16   ;;  %s933_s16 = sphi %s965_s16, %s13_s16   ;;  %s929_s15 = sphi %s963_s15, %s1101_s15   ;;  %s925_s14 = sphi %s961_s14, %s1100_s14   ;;  %s921_s13 = sphi %s959_s13, %s1099_s13   ;;  %s917_s12 = sphi %s957_s12, %s1098_s12  }
   0x4   : > { %p30_p0 = scmp.ge.s32.totalorder %s28_s17, 2  ;;  %p76_p1 = scmp.ne.s32.totalorder %s921_s13, %s917_s12 }
   0x5   : > { %p77_p2 = scmp.eq.s32.totalorder %s933_s16, 0  ;;  %p134_p4 = scmp.eq.s32.totalorder %s777_s18, 1 }
   0x6   : > { %s1103_s17 = smov (%p30_p0, %s28_s17), 0  ;;  %s69_s20 = sadd.s32 1, %s921_s13 }
   0x7   : > { %p78_p3 = por %p77_p2, %p76_p1  ;;  %s65_s19 = ssub.s32 %s929_s15, %s1103_s17 }
   0x8   : > { %p67_p5 = scmp.eq.s32.totalorder %s65_s19, 0  ;;  %p992_p6 = por %p134_p4, %p76_p1 }
   0x9   : > { %p781_p7 = scmp.ge.s32.totalorder %s933_s16, 2 }
   0xa   : > { %s997_s22 = scalar_select %p67_p5, %s921_s13, %s69_s20  }
   0xb   : > { %168 = sbr.rel (%p781_p7) target bundleno = 30 (0x1e), region = 20 }
  0x12   : > { %171 = sbr.rel (!%p78_p3) target bundleno = 30 (0x1e), region = 24  ;;  %s173_s23 = sand.u32 (%p78_p3), 1, %s921_s13  }
  0x13   : > { %s810_s24 = sshll.u32 (%p78_p3), %s929_s15, 3  ;;  %s782_s25 = sshll.u32 (%p78_p3), %s173_s23, 7 }
  0x14   : > { %s1005_s28 = scalar_lea.vmem (%p78_p3), %s1094_s1, %s810_s24  ;;  %s175_s29 = scalar_lea.vmem (%p78_p3), [#allocation2], %s782_s25 }
  0x15   : > { %v239_v0 = vld [vmem:[%s1005_s28] sm:$0xff] (%p78_p3)  ;;  %v241_v1 = vld [vmem:[%s1005_s28 + $0x10] sm:$0xff] (%p78_p3) }
  0x16   : > { %v243_v2 = vld [vmem:[%s1005_s28 + $0x20] sm:$0xff] (%p78_p3)  ;;  %240 = vst [vmem:[%s175_s29] sm:$0xff] (%p78_p3), %v239_v0  ;;  %242 = vst [vmem:[%s175_s29 + $0x8] sm:$0xff] (%p78_p3), %v241_v1  ;;  %v245_v3 = vld [vmem:[%s1005_s28 + $0x30] sm:$0xff] (%p78_p3) }
  0x17   : > { %244 = vst [vmem:[%s175_s29 + $0x10] sm:$0xff] (%p78_p3), %v243_v2  ;;  %v247_v4 = vld [vmem:[%s1005_s28 + $0x40] sm:$0xff] (%p78_p3)  ;;  %v249_v5 = vld [vmem:[%s1005_s28 + $0x50] sm:$0xff] (%p78_p3)  ;;  %246 = vst [vmem:[%s175_s29 + $0x18] sm:$0xff] (%p78_p3), %v245_v3 }
  0x18   : > { %248 = vst [vmem:[%s175_s29 + $0x20] sm:$0xff] (%p78_p3), %v247_v4  ;;  %250 = vst [vmem:[%s175_s29 + $0x28] sm:$0xff] (%p78_p3), %v249_v5  ;;  %v251_v6 = vld [vmem:[%s1005_s28 + $0x60] sm:$0xff] (%p78_p3)  ;;  %v253_v7 = vld [vmem:[%s1005_s28 + $0x70] sm:$0xff] (%p78_p3) }
  0x19   : > { %v255_v8 = vld [vmem:[%s1005_s28 + $0x80] sm:$0xff]  ;;  %252 = vst [vmem:[%s175_s29 + $0x30] sm:$0xff] %v251_v6  ;;  %254 = vst [vmem:[%s175_s29 + $0x38] sm:$0xff] %v253_v7  ;;  %v257_v9 = vld [vmem:[%s1005_s28 + $0x90] sm:$0xff] }
  0x1a   : > { %256 = vst [vmem:[%s175_s29 + $0x40] sm:$0xff] %v255_v8  ;;  %v259_v10 = vld [vmem:[%s1005_s28 + $0xa0] sm:$0xff]  ;;  %v261_v11 = vld [vmem:[%s1005_s28 + $0xb0] sm:$0xff]  ;;  %258 = vst [vmem:[%s175_s29 + $0x48] sm:$0xff] %v257_v9 }
  0x1b   : > { %260 = vst [vmem:[%s175_s29 + $0x50] sm:$0xff] %v259_v10  ;;  %262 = vst [vmem:[%s175_s29 + $0x58] sm:$0xff] %v261_v11  ;;  %v263_v12 = vld [vmem:[%s1005_s28 + $0xc0] sm:$0xff]  ;;  %v265_v13 = vld [vmem:[%s1005_s28 + $0xd0] sm:$0xff] }
  0x1c   : > { %v267_v14 = vld [vmem:[%s1005_s28 + $0xe0] sm:$0xff]  ;;  %264 = vst [vmem:[%s175_s29 + $0x60] sm:$0xff] %v263_v12  ;;  %266 = vst [vmem:[%s175_s29 + $0x68] sm:$0xff] %v265_v13  ;;  %v269_v15 = vld [vmem:[%s1005_s28 + $0xf0] sm:$0xff] }
  0x1d   : > { %268 = vst [vmem:[%s175_s29 + $0x70] sm:$0xff] %v267_v14  ;;  %270 = vst [vmem:[%s175_s29 + $0x78] sm:$0xff] %v269_v15 }
  0x1e PF: > { %p785_p8 = scmp.ge.s32.totalorder %s933_s16, 1  ;;  %p283_p9 = scmp.lt.s32.totalorder %s933_s16, 3 }
  0x20   : > { %p284_p10 = pnand %p785_p8, %p283_p9 }
  0x21   : > { %s290_s30 = sand.u32 (!%p284_p10), 1, %s917_s12   ;;  %v935_v16 = vmov (!%p284_p10), 0   ;;  %v355_v33 = vld [vmem:[%s1093_s0] sm:$0xff] (!%p284_p10)  ;;  %v356_v34 = vld [vmem:[%s1093_s0 + $0x8] sm:$0xff] (!%p284_p10)  ;;  %s788_s10 = sshll.u32 (!%p284_p10), %s925_s14, 1  ;;  %v514_v36 = vlaneseq (!%p284_p10) }
  0x22   : > { %287 = sbr.rel (%p284_p10) target bundleno = 342 (0x156), region = 66  ;;  %s786_s4 = sshll.u32 (!%p284_p10), %s290_s30, 7  ;;  %486 = vmatprep.mubr.bf16.mxu0 (!%p284_p10), %v935_v16  ;;  %v357_v35 = vpack.c.bf16 (!%p284_p10), %v356_v34, %v355_v33 }
  0x23   : > { %s292_s5 = scalar_lea.vmem (!%p284_p10), [#allocation2], %s786_s4  ;;  %p336_p11 = scmp.lt.s32.totalorder (!%p284_p10), %s788_s10, 3  ;;  %v515_v37 = vshrl.u32 (!%p284_p10), %v514_v36, 7 }
  0x24   : > { %v855_v17 = vld [vmem:[%s292_s5 + $0x4] ss:$8 sps:$4 sm:$0xff] (!%p284_p10)   ;;  %v857_v18 = vld [vmem:[%s292_s5] ss:$8 sps:$4 sm:$0xff] (!%p284_p10)   ;;  %v858_v19 = vld [vmem:[%s292_s5 + $0x14] ss:$8 sps:$4 sm:$0xff] (!%p284_p10)  }
  0x25   : > { %454 = vmatprep.subr.bf16.mxu0 (!%p284_p10), %v855_v17  ;;  %v860_v20 = vld [vmem:[%s292_s5 + $0x10] ss:$8 sps:$4 sm:$0xff] (!%p284_p10)   ;;  %v861_v21 = vld [vmem:[%s292_s5 + $0x24] ss:$8 sps:$4 sm:$0xff] (!%p284_p10)   ;;  %v863_v22 = vld [vmem:[%s292_s5 + $0x20] ss:$8 sps:$4 sm:$0xff] (!%p284_p10)  }
  0x26   : > { %455 = vmatpush1.bf16.msra.mxu0 (!%p284_p10), %v857_v18  ;;  %v864_v23 = vld [vmem:[%s292_s5 + $0x34] ss:$8 sps:$4 sm:$0xff] (!%p284_p10)   ;;  %v866_v24 = vld [vmem:[%s292_s5 + $0x30] ss:$8 sps:$4 sm:$0xff] (!%p284_p10)   ;;  %v867_v25 = vld [vmem:[%s292_s5 + $0x44] ss:$8 sps:$4 sm:$0xff] (!%p284_p10)  }
  0x27   : > { %456 = vmatprep.subr.bf16.mxu0 (!%p284_p10), %v858_v19  ;;  %v869_v26 = vld [vmem:[%s292_s5 + $0x40] ss:$8 sps:$4 sm:$0xff] (!%p284_p10)   ;;  %v870_v27 = vld [vmem:[%s292_s5 + $0x54] ss:$8 sps:$4 sm:$0xff] (!%p284_p10)   ;;  %v872_v28 = vld [vmem:[%s292_s5 + $0x50] ss:$8 sps:$4 sm:$0xff] (!%p284_p10)  }
  0x28   : > { %v873_v29 = vld [vmem:[%s292_s5 + $0x64] ss:$8 sps:$4 sm:$0xff] (!%p284_p10)   ;;  %v875_v30 = vld [vmem:[%s292_s5 + $0x60] ss:$8 sps:$4 sm:$0xff] (!%p284_p10)   ;;  %v876_v31 = vld [vmem:[%s292_s5 + $0x74] ss:$8 sps:$4 sm:$0xff] (!%p284_p10)  }
  0x29   : > { %v878_v32 = vld [vmem:[%s292_s5 + $0x70] ss:$8 sps:$4 sm:$0xff]   ;;  %s1105_s10 = smov (!%p336_p11, %s788_s10), 3  ;;  %v516_v38 = vsub.s32 0, %v515_v37  ;;  %v520_v40 = vsub.s32 1, %v515_v37  ;;  %s787_s20 = sshll.u32 %s290_s30, 5 }
  0x2a   : > { %457 = vmatpush1.bf16.msra.mxu0 %v860_v20  ;;  %s338_s19 = scalar_lea.vmem %s1095_s2, %s1105_s10  ;;  %s323_s12 = scalar_lea.vmem [#allocation3], %s787_s20 }
  0x2b   : > { %458 = vmatprep.subr.bf16.mxu0 %v861_v21  ;;  %v512_v39 = vld [vmem:[%s338_s19] sm:$0x3]  ;;  %s811_s23 = sshll.u32 (%p992_p6), %s925_s14, 4 }
  0x2c   : > { %v517_v41 = vrot.slane %v512_v39, %v516_v38  ;;  %v521_v43 = vrot.slane %v512_v39, %v520_v40  ;;  %s652_s26 = scalar_lea.vmem (%p992_p6), %s1096_s3, %s811_s23 }
  0x2e   : > { %459 = vmatpush1.bf16.msra.mxu0 %v863_v22 }
  0x2f   : > { %460 = vmatprep.subr.bf16.mxu0 %v864_v23 }
  0x32   : > { %461 = vmatpush1.bf16.msra.mxu0 %v866_v24 }
  0x33   : > { %462 = vmatprep.subr.bf16.mxu0 %v867_v25 }
  0x36   : > { %463 = vmatpush1.bf16.msra.mxu0 %v869_v26 }
  0x37   : > { %464 = vmatprep.subr.bf16.mxu0 %v870_v27 }
  0x3a   : > { %465 = vmatpush1.bf16.msra.mxu0 %v872_v28 }
  0x3b   : > { %466 = vmatprep.subr.bf16.mxu0 %v873_v29 }
  0x3e   : > { %467 = vmatpush1.bf16.msra.mxu0 %v875_v30 }
  0x3f   : > { %468 = vmatprep.subr.bf16.mxu0 %v876_v31 }
  0x42   : > { %469 = vmatpush1.bf16.msra.mxu0 %v878_v32 }
  0x45   : > { %487 = vmatmul.mubr.bf16.vlgmr.msra.gmra.mrb[0].mxu0 %v357_v35 }
 0x118   : > { %v488_v42 = vpop.f32.mrb[0].mxu0 }
 0x119   : > { %v490_v44 = vpop.f32.mrb[1].mxu0  ;;  %v1038_v46 = vadd.f32 %v517_v41, %v488_v42 }
 0x11a   : > { %v492_v45 = vpop.f32.mrb[2].mxu0  ;;  %v1040_v48 = vadd.f32 %v521_v43, %v490_v44 }
 0x11b   : > { %v494_v47 = vpop.f32.mrb[3].mxu0  ;;  %v1043_v49 = vmul.f32 0.70710677, %v1038_v46  ;;  %v1045_v50 = vadd.f32 %v517_v41, %v492_v45 }
 0x11c   : > { %v1048_v51 = vmul.f32 0.70710677, %v1040_v48  ;;  %v1054_v54 = vadd.f32 %v521_v43, %v494_v47 }
 0x11d   : > { %v544_v52 = vand.u32 2147483647, %v1043_v49  ;;  %v1052_v53 = vmul.f32 0.70710677, %v1045_v50  ;;  %vm536_vm0 = vcmp.ge.f32.partialorder %v1043_v49, 0.0 }
 0x11e   : > { %v545_v55 = vand.u32 2147483647, %v1048_v51  ;;  %v1059_v60 = vmul.f32 0.70710677, %v1054_v54  ;;  %vm537_vm1 = vcmp.ge.f32.partialorder %v1048_v51, 0.0  ;;  %v528_v51 = vmul.f32 0.5, %v1038_v46 }
 0x11f   : > { %v548_v56 = vmul.f32 0.3275911, %v544_v52  ;;  %v546_v58 = vand.u32 2147483647, %v1052_v53  ;;  %v600_v3 = vsub.f32 0.0, %v544_v52  ;;  %vm538_vm2 = vcmp.ge.f32.partialorder %v1052_v53, 0.0 }
 0x120   : > { %v549_v57 = vmul.f32 0.3275911, %v545_v55  ;;  %v547_v63 = vand.u32 2147483647, %v1059_v60  ;;  %v601_v4 = vsub.f32 0.0, %v545_v55  ;;  %vm539_vm3 = vcmp.ge.f32.partialorder %v1059_v60, 0.0 }
 0x121   : > { %v552_v59 = vadd.f32 1.0, %v548_v56  ;;  %v550_v62 = vmul.f32 0.3275911, %v546_v58  ;;  %v604_v6 = vmul.f32 %v600_v3, %v544_v52  ;;  %v602_v7 = vsub.f32 0.0, %v546_v58 }
 0x122   : > { %v553_v61 = vadd.f32 1.0, %v549_v57  ;;  %v551_v1 = vmul.f32 0.3275911, %v547_v63  ;;  %v605_v10 = vmul.f32 %v601_v4, %v545_v55  ;;  %v603_v12 = vsub.f32 0.0, %v547_v63 }
 0x123   : > { %879 = vrcp.f32 %v552_v59  ;;  %v554_v0 = vadd.f32 1.0, %v550_v62  ;;  %v608_v15 = vmul.f32 1.442695, %v604_v6  ;;  %v606_v17 = vmul.f32 %v602_v7, %v546_v58 }
 0x124   : > { %881 = vrcp.f32 %v553_v61  ;;  %v555_v2 = vadd.f32 1.0, %v551_v1  ;;  %v610_v19 = vmul.f32 1.442695, %v605_v10  ;;  %v607_v23 = vmul.f32 %v603_v12, %v547_v63 }
 0x125   : > { %883 = vrcp.f32 %v554_v0  ;;  %v612_v28 = vmul.f32 1.442695, %v606_v17  ;;  %v936_v4 = vmov -1.0   ;;  %v531_v60 = vmul.f32 0.5, %v1054_v54 }
 0x126   : > { %885 = vrcp.f32 %v555_v2  ;;  %v614_v33 = vmul.f32 1.442695, %v607_v23  ;;  %v541_v6 = vsel %vm537_vm1, 1.0, %v936_v4  ;;  %v542_v17 = vsel %vm538_vm2, 1.0, %v936_v4 }
 0x127   : > { %887 = vpow2.f32 %v608_v15  ;;  %v529_v15 = vmul.f32 0.5, %v1040_v48  ;;  %v543_v53 = vsel %vm539_vm3, 1.0, %v936_v4 }
 0x128   : > { %889 = vpow2.f32 %v610_v19 }
 0x129   : > { %891 = vpow2.f32 %v612_v28 }
 0x12a   : > { %893 = vpow2.f32 %v614_v33 }
 0x12d   : > { %v880_v5 = vpop.eup %879 }
 0x12e   : > { %v882_v8 = vpop.eup %881  ;;  %v564_v9 = vmul.f32 1.0614054, %v880_v5 }
 0x12f   : > { %v565_v11 = vmul.f32 1.0614054, %v882_v8  ;;  %v884_v14 = vpop.eup %883 }
 0x130   : > { %v568_v13 = vadd.f32 -1.4531521, %v564_v9  ;;  %v566_v20 = vmul.f32 1.0614054, %v884_v14  ;;  %v886_v21 = vpop.eup %885 }
 0x131   : > { %v569_v16 = vadd.f32 -1.4531521, %v565_v11  ;;  %v567_v26 = vmul.f32 1.0614054, %v886_v21  ;;  %v888_v56 = vpop.eup %887 }
 0x132   : > { %v572_v18 = vmul.f32 %v880_v5, %v568_v13  ;;  %v570_v25 = vadd.f32 -1.4531521, %v566_v20  ;;  %v890_v58 = vpop.eup %889 }
 0x133   : > { %v573_v22 = vmul.f32 %v882_v8, %v569_v16  ;;  %v571_v31 = vadd.f32 -1.4531521, %v567_v26  ;;  %v892_v3 = vpop.eup %891 }
 0x134   : > { %v576_v24 = vadd.f32 1.4214138, %v572_v18  ;;  %v574_v30 = vmul.f32 %v884_v14, %v570_v25  ;;  %v894_v10 = vpop.eup %893 }
 0x135   : > { %v577_v27 = vadd.f32 1.4214138, %v573_v22  ;;  %v575_v36 = vmul.f32 %v886_v21, %v571_v31 }
 0x136   : > { %v580_v29 = vmul.f32 %v880_v5, %v576_v24  ;;  %v578_v35 = vadd.f32 1.4214138, %v574_v30 }
 0x137   : > { %v581_v32 = vmul.f32 %v882_v8, %v577_v27  ;;  %v579_v40 = vadd.f32 1.4214138, %v575_v36 }
 0x138   : > { %v584_v34 = vadd.f32 -0.28449672, %v580_v29  ;;  %v582_v39 = vmul.f32 %v884_v14, %v578_v35 }
 0x139   : > { %v585_v37 = vadd.f32 -0.28449672, %v581_v32  ;;  %v583_v44 = vmul.f32 %v886_v21, %v579_v40 }
 0x13a   : > { %v588_v38 = vmul.f32 %v880_v5, %v584_v34  ;;  %v586_v43 = vadd.f32 -0.28449672, %v582_v39 }
 0x13b   : > { %v589_v41 = vmul.f32 %v882_v8, %v585_v37  ;;  %v587_v55 = vadd.f32 -0.28449672, %v583_v44 }
 0x13c   : > { %v592_v42 = vadd.f32 0.2548296, %v588_v38  ;;  %v590_v52 = vmul.f32 %v884_v14, %v586_v43 }
 0x13d   : > { %v593_v45 = vadd.f32 0.2548296, %v589_v41  ;;  %v591_v62 = vmul.f32 %v886_v21, %v587_v55 }
 0x13e   : > { %v596_v47 = vmul.f32 %v880_v5, %v592_v42  ;;  %v594_v61 = vadd.f32 0.2548296, %v590_v52  ;;  %v540_v5 = vsel %vm536_vm0, 1.0, %v936_v4 }
 0x13f   : > { %v597_v57 = vmul.f32 %v882_v8, %v593_v45  ;;  %v595_v2 = vadd.f32 0.2548296, %v591_v62 }
 0x140   : > { %v616_v59 = vmul.f32 %v888_v56, %v596_v47  ;;  %v598_v1 = vmul.f32 %v884_v14, %v594_v61 }
 0x141   : > { %v617_v63 = vmul.f32 %v890_v58, %v597_v57  ;;  %v599_v9 = vmul.f32 %v886_v21, %v595_v2  ;;  %v530_v21 = vmul.f32 0.5, %v1045_v50 }
 0x142   : > { %v620_v0 = vsub.f32 1.0, %v616_v59  ;;  %v618_v8 = vmul.f32 %v892_v3, %v598_v1 }
 0x143   : > { %v621_v7 = vsub.f32 1.0, %v617_v63  ;;  %v619_v14 = vmul.f32 %v894_v10, %v599_v9 }
 0x144   : > { %v624_v49 = vmul.f32 %v620_v0, %v540_v5  ;;  %v622_v13 = vsub.f32 1.0, %v618_v8 }
 0x145   : > { %v625_v11 = vmul.f32 %v621_v7, %v541_v6  ;;  %v623_v20 = vsub.f32 1.0, %v619_v14 }
 0x146   : > { %v628_v12 = vadd.f32 1.0, %v624_v49  ;;  %v626_v19 = vmul.f32 %v622_v13, %v542_v17 }
 0x147   : > { %v629_v16 = vadd.f32 1.0, %v625_v11  ;;  %v627_v23 = vmul.f32 %v623_v20, %v543_v53  ;;  %646 = sbr.rel (!%p992_p6) target bundleno = 342 (0x156), region = 82 }
 0x148   : > { %v632_v18 = vmul.f32 %v628_v12, %v528_v51  ;;  %v630_v46 = vadd.f32 1.0, %v626_v19 }
 0x149   : > { %v633_v22 = vmul.f32 %v629_v16, %v529_v15  ;;  %v631_v25 = vadd.f32 1.0, %v627_v23 }
 0x14a   : > { %636 = vst [vmem:[%s323_s12] sm:$0xff] %v632_v18  ;;  %v634_v24 = vmul.f32 %v630_v46, %v530_v21 }
 0x14b   : > { %637 = vst [vmem:[%s323_s12 + $0x8] sm:$0xff] %v633_v22  ;;  %v635_v48 = vmul.f32 %v631_v25, %v531_v60 }
 0x14c   : > { %638 = vst [vmem:[%s323_s12 + $0x10] sm:$0xff] %v634_v24 }
 0x14d   : > { %639 = vst [vmem:[%s323_s12 + $0x18] sm:$0xff] %v635_v48 }
 0x151   : > { %v665_v26 = vld [vmem:[%s323_s12] sm:$0xff] }
 0x152   : > { %v667_v27 = vld [vmem:[%s323_s12 + $0x8] sm:$0xff]  ;;  %666 = vst [vmem:[%s652_s26] sm:$0xff] %v665_v26 }
 0x153   : > { %v669_v28 = vld [vmem:[%s323_s12 + $0x10] sm:$0xff]  ;;  %668 = vst [vmem:[%s652_s26 + $0x8] sm:$0xff] %v667_v27 }
 0x154   : > { %v671_v50 = vld [vmem:[%s323_s12 + $0x18] sm:$0xff]  ;;  %670 = vst [vmem:[%s652_s26 + $0x20] sm:$0xff] %v669_v28 }
 0x155   : > { %672 = vst [vmem:[%s652_s26 + $0x28] sm:$0xff] %v671_v50 }
 0x156 PF: > { %s13_s16 = sadd.s32 1, %s933_s16   ;;  %s1098_s12 = smov %s921_s13 }
 0x157   : > { %p10_p12 = scmp.ge.s32.totalorder %s13_s16, 4   ;;  %s1099_s13 = smov %s997_s22 }
 0x158   : > { %s1100_s14 = smov %s929_s15  ;;  %s1101_s15 = smov %s1103_s17 }
 0x159   :  { %12 = sbr.rel (!%p10_p12) target bundleno = 3 (0x3), region = 142 }

// kernel: whisper_forward.51
= control target key start
LH: loop header
LB: loop body
LE: loop exit
PB: predicated region body
PF: predicated region fallthrough
CT: control target
= control target key end

     0   :  { %s858_s15 = smov 0   ;;  %s860_s16 = smov 0   ;;  %s988_s0 = inlined_call_operand.vmem [shape: f32[16,512], index: 0, kind: input, shape index: {}]   ;;  %s989_s1 = inlined_call_operand.vmem [shape: bf16[512,128], index: 1, kind: input, shape index: {}]   ;;  %s990_s2 = inlined_call_operand.vmem [shape: f32[1,128], index: 2, kind: input, shape index: {}]   ;;  %s991_s3 = inlined_call_operand.vmem [shape: f32[16,128], index: 3, kind: input, shape index: {}]   ;;  %s992_s4 = inlined_call_operand.vmem [shape: f32[16,128], index: 4, kind: output, shape index: {}]  }
   0x1   :  { %s862_s17 = smov 0   ;;  %s864_s18 = smov 0  }
   0x2   :  { %s866_s19 = smov 0  }
   0x3 LB: > { %s26_s20 = sadd.s32 1, %s826_s18  ;;  %p49_p1 = scmp.ne.s32.totalorder %s818_s16, %s814_s15  ;;  %s830_s19 = sphi %s866_s19, %s14_s19   ;;  %s826_s18 = sphi %s864_s18, %s996_s18   ;;  %s822_s17 = sphi %s862_s17, %s995_s17   ;;  %s818_s16 = sphi %s860_s16, %s994_s16   ;;  %s814_s15 = sphi %s858_s15, %s993_s15  }
   0x4   : > { %p27_p0 = scmp.ge.s32.totalorder %s26_s20, 2  ;;  %p50_p2 = scmp.eq.s32.totalorder %s830_s19, 0 }
   0x5   : > { %s42_s22 = sadd.s32 1, %s818_s16  ;;  %p681_p5 = scmp.ge.s32.totalorder %s830_s19, 2 }
   0x6   : > { %s998_s20 = smov (%p27_p0, %s26_s20), 0  ;;  %p51_p3 = por %p50_p2, %p49_p1 }
   0x7   : > { %s38_s21 = ssub.s32 %s826_s18, %s998_s20  ;;  %203 = sbr.rel (%p681_p5) target bundleno = 21 (0x15), region = 24 }
   0x8   : > { %p40_p4 = scmp.eq.s32.totalorder %s38_s21, 0 }
   0xa   : > { %s893_s23 = scalar_select %p40_p4, %s818_s16, %s42_s22  }
   0xe   : > { %206 = sbr.rel (!%p51_p3) target bundleno = 21 (0x15), region = 28  ;;  %s208_s24 = sand.u32 (%p51_p3), 1, %s818_s16  }
   0xf   : > { %s712_s25 = sshll.u32 (%p51_p3), %s826_s18, 4  ;;  %s682_s26 = sshll.u32 (%p51_p3), %s208_s24, 5 }
  0x10   : > { %s216_s29 = scalar_lea.vmem (%p51_p3), %s988_s0, %s712_s25  ;;  %s210_s30 = scalar_lea.vmem (%p51_p3), [#allocation2], %s682_s26 }
  0x11   : > { %v229_v0 = vld [vmem:[%s216_s29] sm:$0xff] (%p51_p3)  ;;  %v231_v1 = vld [vmem:[%s216_s29 + $0x8] sm:$0xff] (%p51_p3) }
  0x12   : > { %v233_v2 = vld [vmem:[%s216_s29 + $0x20] sm:$0xff] (%p51_p3)  ;;  %230 = vst [vmem:[%s210_s30] sm:$0xff] (%p51_p3), %v229_v0  ;;  %232 = vst [vmem:[%s210_s30 + $0x8] sm:$0xff] (%p51_p3), %v231_v1  ;;  %v235_v3 = vld [vmem:[%s216_s29 + $0x28] sm:$0xff] (%p51_p3) }
  0x13   : > { %234 = vst [vmem:[%s210_s30 + $0x10] sm:$0xff] (%p51_p3), %v233_v2  ;;  %236 = vst [vmem:[%s210_s30 + $0x18] sm:$0xff] (%p51_p3), %v235_v3 }
  0x15 PF: > { %p685_p6 = scmp.ge.s32.totalorder %s830_s19, 1  ;;  %p253_p7 = scmp.lt.s32.totalorder %s830_s19, 3 }
  0x17   : > { %p254_p8 = pnand %p685_p6, %p253_p7 }
  0x18   : > { %s260_s5 = sand.u32 (!%p254_p8), 1, %s814_s15   ;;  %s687_s6 = sshll.u32 (!%p254_p8), %s822_s17, 5 }
  0x19   : > { %257 = sbr.rel (%p254_p8) target bundleno = 304 (0x130), region = 55  ;;  %s686_s7 = sshll.u32 (!%p254_p8), %s260_s5, 5 }
  0x1a   : > { %p310_p9 = scmp.lt.s32.totalorder (!%p254_p8), %s687_s6, 63  ;;  %s910_s12 = scalar_lea.vmem (!%p254_p8), [#allocation2], %s686_s7 }
  0x1b   : > { %p689_p10 = scmp.ne.s32.totalorder (!%p254_p8), %s822_s17, 0 }
  0x20   : > { %s1000_s6 = smov (!%p310_p9, %s687_s6), 63  ;;  %343 = sbr.rel (%p689_p10) target bundleno = 39 (0x27), region = 63 }
  0x21   : > { %s688_s8 = sshll.u32 %s1000_s6, 2  ;;  %v832_v4 = vmov (!%p689_p10), 0.0  }
  0x22   : > { %s908_s11 = scalar_lea.vmem %s989_s1, %s688_s8  ;;  %344 = vst [vmem:[%s992_s4] sm:$0xff] (!%p689_p10), %v832_v4  ;;  %345 = vst [vmem:[%s992_s4 + $0x8] sm:$0xff] (!%p689_p10), %v832_v4 }
  0x27 PF: > { %v776_v5 = vld [vmem:[%s908_s11 + $0x40] sm:$0xff]   ;;  %v778_v7 = vld [vmem:[%s908_s11 + $0x48] sm:$0xff]   ;;  %v780_v9 = vld [vmem:[%s908_s11 + $0x50] sm:$0xff]   ;;  %p706_p11 = scmp.ne.s32.totalorder %s822_s17, 1 }
  0x28   : > { %v777_v6 = vld [vmem:[%s908_s11] sm:$0xff]   ;;  %713 = vmatprep.subr.bf16.mxu0 %v776_v5  ;;  %v779_v8 = vld [vmem:[%s908_s11 + $0x8] sm:$0xff]   ;;  %v781_v10 = vld [vmem:[%s908_s11 + $0x10] sm:$0xff]  }
  0x29   : > { %714 = vmatpush3.bf16.msra.mxu0 %v777_v6  ;;  %v782_v11 = vld [vmem:[%s908_s11 + $0x58] sm:$0xff]   ;;  %v784_v13 = vld [vmem:[%s908_s11 + $0x60] sm:$0xff]   ;;  %v786_v15 = vld [vmem:[%s908_s11 + $0x68] sm:$0xff]  }
  0x2a   : > { %715 = vmatprep.subr.bf16.mxu0 %v778_v7  ;;  %v783_v12 = vld [vmem:[%s908_s11 + $0x18] sm:$0xff]   ;;  %v785_v14 = vld [vmem:[%s908_s11 + $0x20] sm:$0xff]   ;;  %v349_v16 = vld [vmem:[%s910_s12 + $0x8] sm:$0xff] }
  0x2b   : > { %v351_v17 = vld [vmem:[%s910_s12 + $0x18] sm:$0xff]  ;;  %v787_v19 = vld [vmem:[%s908_s11 + $0x28] sm:$0xff]   ;;  %v788_v20 = vld [vmem:[%s908_s11 + $0x70] sm:$0xff]  }
  0x2c   : > { %v353_v18 = vpack.c.bf16 %v351_v17, %v349_v16  ;;  %v789_v21 = vld [vmem:[%s908_s11 + $0x30] sm:$0xff]   ;;  %v790_v22 = vld [vmem:[%s908_s11 + $0x78] sm:$0xff]   ;;  %v348_v24 = vld [vmem:[%s910_s12] sm:$0xff] }
  0x2d   : > { %716 = vmatpush3.bf16.msra.mxu0 %v779_v8  ;;  %v791_v23 = vld [vmem:[%s908_s11 + $0x38] sm:$0xff]   ;;  %v350_v25 = vld [vmem:[%s910_s12 + $0x10] sm:$0xff]  ;;  %v346_v28 = vld [vmem:[%s992_s4] sm:$0xff] }
  0x2e   : > { %717 = vmatprep.subr.bf16.mxu0 %v780_v9  ;;  %514 = vmatprep.mubr.bf16.mxu0 %v353_v18  ;;  %v352_v26 = vpack.c.bf16 %v350_v25, %v348_v24  ;;  %v347_v32 = vld [vmem:[%s992_s4 + $0x8] sm:$0xff]  ;;  %v707_v38 = vld [vmem:[%s990_s2] ss:$0 sm:$0xff] (!%p706_p11) }
  0x2f   : > { %v542_v39 = vld [vmem:[%s991_s3] sm:$0xff] (!%p706_p11)  ;;  %v543_v42 = vld [vmem:[%s991_s3 + $0x8] sm:$0xff] (!%p706_p11) }
  0x31   : > { %718 = vmatpush3.bf16.msra.mxu0 %v781_v10 }
  0x32   : > { %719 = vmatprep.subr.bf16.mxu0 %v782_v11 }
  0x35   : > { %720 = vmatpush3.bf16.msra.mxu0 %v783_v12 }
  0x36   : > { %721 = vmatprep.subr.bf16.mxu0 %v784_v13 }
  0x39   : > { %722 = vmatpush3.bf16.msra.mxu0 %v785_v14 }
  0x3a   : > { %723 = vmatprep.subr.bf16.mxu0 %v786_v15 }
  0x3d   : > { %724 = vmatpush3.bf16.msra.mxu0 %v787_v19 }
  0x3e   : > { %725 = vmatprep.subr.bf16.mxu0 %v788_v20 }
  0x41   : > { %726 = vmatpush3.bf16.msra.mxu0 %v789_v21 }
  0x42   : > { %727 = vmatprep.subr.bf16.mxu0 %v790_v22 }
  0x45   : > { %728 = vmatpush3.bf16.msra.mxu0 %v791_v23 }
  0x48   : > { %515 = vmatmul.mubr.bf16.vlgmr.msra.gmra.mrb[0].mxu0 %v352_v26 }
 0x11b   : > { %v729_v27 = vpop.f32.mrb[0].mxu0 }
 0x11c   : > { %v730_v29 = vpop.f32.mrb[1].mxu0 }
 0x11d   : > { %v731_v30 = vadd.f32 %v730_v29, %v729_v27  ;;  %v732_v31 = vpop.f32.mrb[2].mxu0  ;;  %530 = sbr.rel (%p706_p11) target bundleno = 304 (0x130), region = 67 }
 0x11e   : > { %v733_v33 = vpop.f32.mrb[3].mxu0 }
 0x11f   : > { %v523_v34 = vadd.f32 %v731_v30, %v346_v28  ;;  %v734_v35 = vadd.f32 %v733_v33, %v732_v31 }
 0x121   : > { %525 = vst [vmem:[%s992_s4] sm:$0xff] %v523_v34  ;;  %v524_v36 = vadd.f32 %v734_v35, %v347_v32 }
 0x123   : > { %526 = vst [vmem:[%s992_s4 + $0x8] sm:$0xff] %v524_v36 }
 0x128   : > { %v531_v37 = vld [vmem:[%s992_s4] sm:$0xff] }
 0x129   : > { %v540_v40 = vadd.f32 %v707_v38, %v531_v37 }
 0x12a   : > { %v532_v41 = vld [vmem:[%s992_s4 + $0x8] sm:$0xff] }
 0x12b   : > { %v541_v43 = vadd.f32 %v707_v38, %v532_v41  ;;  %v544_v44 = vadd.f32 %v542_v39, %v540_v40 }
 0x12d   : > { %v545_v45 = vadd.f32 %v543_v42, %v541_v43  ;;  %546 = vst [vmem:[%s992_s4] sm:$0xff] %v544_v44 }
 0x12f   : > { %547 = vst [vmem:[%s992_s4 + $0x8] sm:$0xff] %v545_v45 }
 0x130 PF: > { %s14_s19 = sadd.s32 1, %s830_s19   ;;  %s993_s15 = smov %s818_s16 }
 0x131   : > { %p11_p12 = scmp.ge.s32.totalorder %s14_s19, 4   ;;  %s994_s16 = smov %s893_s23 }
 0x132   : > { %s995_s17 = smov %s826_s18  ;;  %s996_s18 = smov %s998_s20 }
 0x133   :  { %13 = sbr.rel (!%p11_p12) target bundleno = 3 (0x3), region = 111 }

// kernel: whisper_forward.66
= control target key start
LH: loop header
LB: loop body
LE: loop exit
PB: predicated region body
PF: predicated region fallthrough
CT: control target
= control target key end

     0   :  { %v250_v1 = vmov 0   ;;  %v186_v20 = vlaneseq  ;;  %s340_s1 = inlined_call_operand.vmem [shape: bf16[128,256], index: 1, kind: input, shape index: {}]   ;;  %s341_s0 = inlined_call_operand.vmem [shape: f32[16,128], index: 0, kind: input, shape index: {}]   ;;  %s342_s2 = inlined_call_operand.vmem [shape: f32[1,256], index: 2, kind: input, shape index: {}]   ;;  %s343_s3 = inlined_call_operand.vmem [shape: f32[16,256], index: 3, kind: output, shape index: {}]  }
   0x1   :  { %v226_v0 = vld [vmem:[%s340_s1 + $0x4] ss:$8 sps:$4 sm:$0xff]   ;;  %158 = vmatprep.mubr.bf16.mxu0 %v250_v1  ;;  %v228_v2 = vld [vmem:[%s340_s1] ss:$8 sps:$4 sm:$0xff]   ;;  %v229_v3 = vld [vmem:[%s340_s1 + $0x14] ss:$8 sps:$4 sm:$0xff]  }
   0x2   :  { %126 = vmatprep.subr.bf16.mxu0 %v226_v0  ;;  %v231_v4 = vld [vmem:[%s340_s1 + $0x10] ss:$8 sps:$4 sm:$0xff]   ;;  %v232_v5 = vld [vmem:[%s340_s1 + $0x24] ss:$8 sps:$4 sm:$0xff]   ;;  %v234_v6 = vld [vmem:[%s340_s1 + $0x20] ss:$8 sps:$4 sm:$0xff]  }
   0x3   :  { %127 = vmatpush1.bf16.msra.mxu0 %v228_v2  ;;  %v235_v7 = vld [vmem:[%s340_s1 + $0x34] ss:$8 sps:$4 sm:$0xff]   ;;  %v237_v8 = vld [vmem:[%s340_s1 + $0x30] ss:$8 sps:$4 sm:$0xff]   ;;  %v238_v9 = vld [vmem:[%s340_s1 + $0x44] ss:$8 sps:$4 sm:$0xff]  }
   0x4   :  { %128 = vmatprep.subr.bf16.mxu0 %v229_v3  ;;  %v240_v10 = vld [vmem:[%s340_s1 + $0x40] ss:$8 sps:$4 sm:$0xff]   ;;  %v241_v11 = vld [vmem:[%s340_s1 + $0x54] ss:$8 sps:$4 sm:$0xff]   ;;  %v243_v12 = vld [vmem:[%s340_s1 + $0x50] ss:$8 sps:$4 sm:$0xff]  }
   0x5   :  { %v244_v13 = vld [vmem:[%s340_s1 + $0x64] ss:$8 sps:$4 sm:$0xff]   ;;  %v246_v14 = vld [vmem:[%s340_s1 + $0x60] ss:$8 sps:$4 sm:$0xff]   ;;  %v247_v15 = vld [vmem:[%s340_s1 + $0x74] ss:$8 sps:$4 sm:$0xff]  }
   0x6   :  { %v249_v16 = vld [vmem:[%s340_s1 + $0x70] ss:$8 sps:$4 sm:$0xff]   ;;  %v27_v17 = vld [vmem:[%s341_s0] sm:$0xff]  ;;  %v28_v18 = vld [vmem:[%s341_s0 + $0x8] sm:$0xff]  ;;  %v187_v21 = vshrl.u32 %v186_v20, 7 }
   0x7   :  { %129 = vmatpush1.bf16.msra.mxu0 %v231_v4  ;;  %v29_v19 = vpack.c.bf16 %v28_v18, %v27_v17  ;;  %v184_v23 = vld [vmem:[%s342_s2] sm:$0x3] }
   0x8   :  { %130 = vmatprep.subr.bf16.mxu0 %v232_v5  ;;  %v188_v22 = vsub.s32 0, %v187_v21  ;;  %v192_v24 = vsub.s32 1, %v187_v21 }
   0xa   :  { %v189_v25 = vrot.slane %v184_v23, %v188_v22  ;;  %v193_v27 = vrot.slane %v184_v23, %v192_v24 }
   0xb   :  { %131 = vmatpush1.bf16.msra.mxu0 %v234_v6 }
   0xc   :  { %132 = vmatprep.subr.bf16.mxu0 %v235_v7 }
   0xf   :  { %133 = vmatpush1.bf16.msra.mxu0 %v237_v8 }
  0x10   :  { %134 = vmatprep.subr.bf16.mxu0 %v238_v9 }
  0x13   :  { %135 = vmatpush1.bf16.msra.mxu0 %v240_v10 }
  0x14   :  { %136 = vmatprep.subr.bf16.mxu0 %v241_v11 }
  0x17   :  { %137 = vmatpush1.bf16.msra.mxu0 %v243_v12 }
  0x18   :  { %138 = vmatprep.subr.bf16.mxu0 %v244_v13 }
  0x1b   :  { %139 = vmatpush1.bf16.msra.mxu0 %v246_v14 }
  0x1c   :  { %140 = vmatprep.subr.bf16.mxu0 %v247_v15 }
  0x1f   :  { %141 = vmatpush1.bf16.msra.mxu0 %v249_v16 }
  0x22   :  { %159 = vmatmul.mubr.bf16.vlgmr.msra.gmra.mrb[0].mxu0 %v29_v19 }
  0xf5   :  { %v160_v26 = vpop.f32.mrb[0].mxu0 }
  0xf6   :  { %v162_v28 = vpop.f32.mrb[1].mxu0  ;;  %v196_v30 = vadd.f32 %v189_v25, %v160_v26 }
  0xf7   :  { %v164_v29 = vpop.f32.mrb[2].mxu0  ;;  %v197_v32 = vadd.f32 %v193_v27, %v162_v28 }
  0xf8   :  { %v166_v31 = vpop.f32.mrb[3].mxu0  ;;  %200 = vst [vmem:[%s343_s3] sm:$0xff] %v196_v30  ;;  %v198_v33 = vadd.f32 %v189_v25, %v164_v29 }
  0xf9   :  { %201 = vst [vmem:[%s343_s3 + $0x8] sm:$0xff] %v197_v32  ;;  %v199_v34 = vadd.f32 %v193_v27, %v166_v31 }
  0xfa   :  { %202 = vst [vmem:[%s343_s3 + $0x10] sm:$0xff] %v198_v33 }
  0xfb   :  { %203 = vst [vmem:[%s343_s3 + $0x18] sm:$0xff] %v199_v34 }

// kernel: whisper_forward.65
= control target key start
LH: loop header
LB: loop body
LE: loop exit
PB: predicated region body
PF: predicated region fallthrough
CT: control target
= control target key end

     0   :  { %v203_v0 = vmov 0.0   ;;  %vm204_vm0 = vmmov 0   ;;  %s264_s1 = inlined_call_operand.vmem [shape: bf16[128,128], index: 1, kind: input, shape index: {}]   ;;  %s265_s0 = inlined_call_operand.vmem [shape: f32[16,128], index: 0, kind: input, shape index: {}]   ;;  %s266_s2 = inlined_call_operand.vmem [shape: f32[1,128], index: 2, kind: input, shape index: {}]   ;;  %s267_s3 = inlined_call_operand.vmem [shape: f32[16,128], index: 3, kind: output, shape index: {}]  }
   0x1   :  { %173 = vmatprep.subr.bf16.mxu0 %v203_v0  ;;  %v195_v1 = vld [vmem:[%s264_s1] sm:$0xff]   ;;  %189 = vmatprep.mubr.msk.bf16.mxu0 %vm204_vm0, %v203_v0  ;;  %v196_v2 = vld [vmem:[%s264_s1 + $0x8] sm:$0xff]   ;;  %v197_v3 = vld [vmem:[%s264_s1 + $0x10] sm:$0xff]  }
   0x2   :  { %174 = vmatpush3.bf16.msra.mxu0 %v195_v1  ;;  %v198_v4 = vld [vmem:[%s264_s1 + $0x18] sm:$0xff]   ;;  %v199_v5 = vld [vmem:[%s264_s1 + $0x20] sm:$0xff]   ;;  %v200_v6 = vld [vmem:[%s264_s1 + $0x28] sm:$0xff]  }
   0x3   :  { %175 = vmatprep.subr.bf16.mxu0 %v203_v0  ;;  %v201_v7 = vld [vmem:[%s264_s1 + $0x30] sm:$0xff]   ;;  %v202_v8 = vld [vmem:[%s264_s1 + $0x38] sm:$0xff]   ;;  %v23_v9 = vld [vmem:[%s265_s0] sm:$0xff] }
   0x4   :  { %v24_v10 = vld [vmem:[%s265_s0 + $0x8] sm:$0xff]  ;;  %v163_v13 = vld [vmem:[%s266_s2] ss:$0 sm:$0xff] }
   0x5   :  { %v25_v11 = vpack.c.bf16 %v24_v10, %v23_v9 }
   0x6   :  { %176 = vmatpush3.bf16.msra.mxu0 %v196_v2 }
   0x7   :  { %177 = vmatprep.subr.bf16.mxu0 %v203_v0 }
   0xa   :  { %178 = vmatpush3.bf16.msra.mxu0 %v197_v3 }
   0xb   :  { %179 = vmatprep.subr.bf16.mxu0 %v203_v0 }
   0xe   :  { %180 = vmatpush3.bf16.msra.mxu0 %v198_v4 }
   0xf   :  { %181 = vmatprep.subr.bf16.mxu0 %v203_v0 }
  0x12   :  { %182 = vmatpush3.bf16.msra.mxu0 %v199_v5 }
  0x13   :  { %183 = vmatprep.subr.bf16.mxu0 %v203_v0 }
  0x16   :  { %184 = vmatpush3.bf16.msra.mxu0 %v200_v6 }
  0x17   :  { %185 = vmatprep.subr.bf16.mxu0 %v203_v0 }
  0x1a   :  { %186 = vmatpush3.bf16.msra.mxu0 %v201_v7 }
  0x1b   :  { %187 = vmatprep.subr.bf16.mxu0 %v203_v0 }
  0x1e   :  { %188 = vmatpush3.bf16.msra.mxu0 %v202_v8 }
  0x21   :  { %190 = vmatmul.mubr.bf16.vlgmr.msra.gmra.mrb[0].mxu0 %v25_v11 }
  0xf4   :  { %v124_v12 = vpop.f32.mrb[0].mxu0 }
  0xf5   :  { %v191_v14 = vpop.f32.mrb[1].mxu0  ;;  %v147_v16 = vadd.f32 %v163_v13, %v124_v12 }
  0xf6   :  { %v127_v15 = vpop.f32.mrb[2].mxu0 }
  0xf7   :  { %v192_v17 = vpop.f32.mrb[3].mxu0  ;;  %149 = vst [vmem:[%s267_s3] sm:$0xff] %v147_v16  ;;  %v148_v18 = vadd.f32 %v163_v13, %v127_v15 }
  0xf9   :  { %150 = vst [vmem:[%s267_s3 + $0x8] sm:$0xff] %v148_v18 }

// kernel: whisper_forward.85
= control target key start
LH: loop header
LB: loop body
LE: loop exit
PB: predicated region body
PF: predicated region fallthrough
CT: control target
= control target key end

     0   :  { %v190_v0 = vmov 0.0   ;;  %vm191_vm0 = vmmov 0   ;;  %s243_s1 = inlined_call_operand.vmem [shape: bf16[128,128], index: 1, kind: input, shape index: {}]   ;;  %s244_s0 = inlined_call_operand.vmem [shape: f32[16,128], index: 0, kind: input, shape index: {}]   ;;  %s245_s2 = inlined_call_operand.vmem [shape: f32[16,128], index: 2, kind: output, shape index: {}]  }
   0x1   :  { %160 = vmatprep.subr.bf16.mxu0 %v190_v0  ;;  %v182_v1 = vld [vmem:[%s243_s1] sm:$0xff]   ;;  %176 = vmatprep.mubr.msk.bf16.mxu0 %vm191_vm0, %v190_v0  ;;  %v183_v2 = vld [vmem:[%s243_s1 + $0x8] sm:$0xff]   ;;  %v184_v3 = vld [vmem:[%s243_s1 + $0x10] sm:$0xff]  }
   0x2   :  { %161 = vmatpush3.bf16.msra.mxu0 %v182_v1  ;;  %v185_v4 = vld [vmem:[%s243_s1 + $0x18] sm:$0xff]   ;;  %v186_v5 = vld [vmem:[%s243_s1 + $0x20] sm:$0xff]   ;;  %v187_v6 = vld [vmem:[%s243_s1 + $0x28] sm:$0xff]  }
   0x3   :  { %162 = vmatprep.subr.bf16.mxu0 %v190_v0  ;;  %v188_v7 = vld [vmem:[%s243_s1 + $0x30] sm:$0xff]   ;;  %v189_v8 = vld [vmem:[%s243_s1 + $0x38] sm:$0xff]   ;;  %v20_v9 = vld [vmem:[%s244_s0] sm:$0xff] }
   0x4   :  { %v21_v10 = vld [vmem:[%s244_s0 + $0x8] sm:$0xff] }
   0x5   :  { %v22_v11 = vpack.c.bf16 %v21_v10, %v20_v9 }
   0x6   :  { %163 = vmatpush3.bf16.msra.mxu0 %v183_v2 }
   0x7   :  { %164 = vmatprep.subr.bf16.mxu0 %v190_v0 }
   0xa   :  { %165 = vmatpush3.bf16.msra.mxu0 %v184_v3 }
   0xb   :  { %166 = vmatprep.subr.bf16.mxu0 %v190_v0 }
   0xe   :  { %167 = vmatpush3.bf16.msra.mxu0 %v185_v4 }
   0xf   :  { %168 = vmatprep.subr.bf16.mxu0 %v190_v0 }
  0x12   :  { %169 = vmatpush3.bf16.msra.mxu0 %v186_v5 }
  0x13   :  { %170 = vmatprep.subr.bf16.mxu0 %v190_v0 }
  0x16   :  { %171 = vmatpush3.bf16.msra.mxu0 %v187_v6 }
  0x17   :  { %172 = vmatprep.subr.bf16.mxu0 %v190_v0 }
  0x1a   :  { %173 = vmatpush3.bf16.msra.mxu0 %v188_v7 }
  0x1b   :  { %174 = vmatprep.subr.bf16.mxu0 %v190_v0 }
  0x1e   :  { %175 = vmatpush3.bf16.msra.mxu0 %v189_v8 }
  0x21   :  { %177 = vmatmul.mubr.bf16.vlgmr.msra.gmra.mrb[0].mxu0 %v22_v11 }
  0xf4   :  { %v121_v12 = vpop.f32.mrb[0].mxu0 }
  0xf5   :  { %v178_v13 = vpop.f32.mrb[1].mxu0  ;;  %137 = vst [vmem:[%s245_s2] sm:$0xff] %v121_v12 }
  0xf6   :  { %v124_v14 = vpop.f32.mrb[2].mxu0 }
  0xf7   :  { %v179_v15 = vpop.f32.mrb[3].mxu0  ;;  %138 = vst [vmem:[%s245_s2 + $0x8] sm:$0xff] %v124_v14 }

// kernel: whisper_forward.62
= control target key start
LH: loop header
LB: loop body
LE: loop exit
PB: predicated region body
PF: predicated region fallthrough
CT: control target
= control target key end

     0   :  { %s964_s12 = smov 0   ;;  %s966_s13 = smov 0   ;;  %s1059_s0 = inlined_call_operand.vmem [shape: f32[2,8,384], index: 0, kind: input, shape index: {}, may-alias: {0,1,2}]   ;;  %s1060_s1 = inlined_call_operand.vmem [shape: f32[2,8,384], index: 1, kind: input, shape index: {}, may-alias: {0,1,2}]   ;;  %s1061_s2 = inlined_call_operand.vmem [shape: f32[2,8,384], index: 2, kind: input, shape index: {}, may-alias: {0,1,2}]   ;;  %s1062_s3 = inlined_call_operand.vmem [shape: f32[2,8,128], index: 3, kind: output, shape index: {}]  }
   0x1   :  { %s968_s14 = smov 0  }
   0x2 LB: > { %s39_s15 = sadd.s32 1, %s933_s13  ;;  %p822_p0 = scmp.ge.s32.totalorder %s937_s14, 1  ;;  %s937_s14 = sphi %s968_s14, %s13_s14   ;;  %s933_s13 = sphi %s966_s13, %s1066_s13   ;;  %s929_s12 = sphi %s964_s12, %s1065_s12  }
   0x3   : > { %p41_p1 = scmp.ge.s32.totalorder %s39_s15, 2  ;;  %p228_p2 = scmp.lt.s32.totalorder %s937_s14, 3 }
   0x5   : > { %s1068_s15 = smov (%p41_p1, %s39_s15), 0  ;;  %p229_p3 = pnand %p822_p0, %p228_p2 }
   0x6   : > { %p290_p4 = scmp.lt.s32.totalorder (!%p229_p3), %s929_s12, 1  ;;  %v939_v0 = vmov (!%p229_p3), 0.0   ;;  %vm940_vm0 = vmmov (!%p229_p3), 0   ;;  %vm377_vm1 = vcmask (!%p229_p3), 523264   ;;  %vm345_vm2 = vcmask (!%p229_p3), 7168   ;;  %s943_s24 = smov (!%p229_p3), 64  }
   0x7   : > { %232 = sbr.rel (%p229_p3) target bundleno = 1377 (0x561), region = 32  ;;  %845 = vmatprep.subr.bf16.mxu0 (!%p229_p3), %v939_v0  ;;  %847 = vmatprep.mubr.msk.bf16.mxu0 (!%p229_p3), %vm940_vm0, %v939_v0  ;;  %v941_v6 = vmov (!%p229_p3), -inf   ;;  %348 = vst.msk [vmem:[#allocation3] sm:$0xff] (!%p229_p3), %vm345_vm2, %v939_v0  ;;  %349 = vst.msk [vmem:[#allocation3 + $0x8] sm:$0xff] (!%p229_p3), %vm345_vm2, %v939_v0  ;;  %v366_v7 = vlaneseq (!%p229_p3)  ;;  %vm426_vm6 = vcmask (!%p229_p3), 64512   ;;  %v942_v17 = vmov (!%p229_p3), 0  }
   0x8   : > { %851 = vmatprep.subr.bf16.mxu1 (!%p229_p3), %v939_v0  ;;  %853 = vmatprep.mubr.msk.bf16.mxu1 (!%p229_p3), %vm940_vm0, %v939_v0  ;;  %346 = vst.msk [vmem:[#allocation2] sm:$0xff] (!%p229_p3), %vm345_vm2, %v941_v6  ;;  %347 = vst.msk [vmem:[#allocation2 + $0x8] sm:$0xff] (!%p229_p3), %vm345_vm2, %v941_v6  ;;  %vm460_vm7 = vcmask (!%p229_p3), 1043456  }
   0x9   : > { %v367_v8 = vand.u32 (!%p229_p3), 127, %v366_v7  ;;  %v372_v9 = vshrl.u32 (!%p229_p3), %v366_v7, 7  ;;  %901 = vset.pattern.permute.xlu0 (!%p229_p3), %v942_v17  ;;  %902 = vset.pattern.permute.xlu1 (!%p229_p3), %v942_v17 }
   0xb   : > { %vm370_vm3 = vcmp.lt.s32.totalorder (!%p229_p3), %v367_v8, 6  ;;  %vm375_vm4 = vcmp.le.s32.totalorder (!%p229_p3), %v367_v8, %v372_v9 }
   0xc   : > { %vm1012_vm5 = vmand (!%p229_p3), %vm370_vm3, %vm375_vm4 }
   0xe   : > { %s1070_s12 = smov (!%p290_p4, %s929_s12), 1  ;;  %v442_v38 = vld [vmem:[#allocation3] sm:$0xff] }
   0xf   : > { %s991_s16 = smul.u32 24, %s1070_s12  ;;  %v425_v18 = vld [vmem:[#allocation2] sm:$0xff]  ;;  %v558_v54 = vld [vmem:[#allocation2 + $0x8] sm:$0xff]  ;;  %s826_s29 = sshll.u32 %s1070_s12, 3 }
  0x10   : > { %s339_s5 = scalar_lea.vmem %s1062_s3, %s826_s29 }
  0x11   : > { %s834_s17 = sadd.s32 8, %s991_s16  ;;  %s301_s23 = scalar_lea.vmem %s1059_s0, %s991_s16 }
  0x12   : > { %s314_s20 = scalar_lea.vmem %s1060_s1, %s834_s17  ;;  %v360_v4 = vld [vmem:[%s301_s23] sm:$0xff]  ;;  %s836_s25 = sadd.s32 16, %s991_s16 }
  0x13   : > { %v362_v1 = vld [vmem:[%s314_s20] sm:$0xff]  ;;  %v361_v5 = vpack.c.bf16 %v360_v4, %v360_v4  ;;  %s328_s28 = scalar_lea.vmem %s1061_s2, %s836_s25 }
  0x14   : > { %v363_v2 = vpack.c.bf16 %v362_v1, %v362_v1  ;;  %v364_v20 = vld [vmem:[%s328_s28] sm:$0xff] }
  0x15   : > { %v365_v23 = vpack.c.bf16 %v364_v20, %v364_v20 }
  0x16   : > { %v382_v3 = vsel %vm377_vm1, %v363_v2, 0  ;;  %508 = vrot.lane.b32.xlu1 %v363_v2, %s943_s24  ;;  %v575_v2 = vld [vmem:[#allocation3 + $0x8] sm:$0xff] }
  0x17   : > { %846 = vmatpush3.bf16.xpose.msra.mxu0 %v382_v3  ;;  %v462_v24 = vsel %vm460_vm7, %v365_v23, 0 }
  0x18   : > { %863 = vmatprep.subr.bf16.mxu0 %v939_v0  ;;  %852 = vmatpush3.bf16.msra.mxu1 %v462_v24 }
  0x19   : > { %857 = vmatprep.subr.bf16.mxu1 %v939_v0 }
  0x1a   : > { %505 = vrot.lane.b32.xlu1 %v361_v5, %s943_s24 }
  0x1e   : > { %848 = vmatmul.mubr.msk.bf16.vlgmr.msra.gmra.mrb[0].mxu0 %vm377_vm1, %v361_v5 }
  0x1f   : > { %865 = vmatprep.mubr.msk.bf16.mxu0 %vm940_vm0, %v939_v0 }
  0x88   : > { %v509_v30 = vpop.permute.xlu1 %508 }
  0x89   : > { %v514_v32 = vsel %vm377_vm1, %v509_v30, 0 }
  0x8c   : > { %v506_v35 = vpop.permute.xlu1 %505 }
  0xf1   : > { %v418_v11 = vpop.f32.mrb[0].mxu0 }
  0xf2   : > { %v424_v12 = vsel %vm1012_vm5, %v418_v11, -1e+30  ;;  %v849_v13 = vpop.f32.mrb[1].mxu0 }
  0xf3   : > { %v421_v14 = vpop.f32.mrb[2].mxu0  ;;  %v427_v15 = vsel %vm426_vm6, %v424_v12, -inf }
  0xf4   : > { %428 = vmax.xlane.f32.xlu0 %v427_v15  ;;  %v850_v16 = vpop.f32.mrb[3].mxu0 }
 0x181   : > { %v429_v19 = vpop.xlane.xlu0 %428 }
 0x182   : > { %v430_v21 = vmax.f32 %v425_v18, %v429_v19 }
 0x184   : > { %v431_v22 = vsub.f32 %v425_v18, %v430_v21  ;;  %450 = vst.msk [vmem:[#allocation2] sm:$0xff] %vm345_vm2, %v430_v21  ;;  %436 = vperm.xlu0 %901, %v430_v21  }
 0x186   : > { %v432_v36 = vmul.f32 1.442695, %v431_v22 }
 0x188   : > { %590 = vrot.lane.b32.xlu0 %v365_v23, %s943_s24 }
 0x203   : > { %v437_v25 = vpop.permute.xlu0 %436 }
 0x204   : > { %v439_v26 = vsub.f32 %v424_v12, %v437_v25 }
 0x206   : > { %v440_v27 = vmul.f32 1.442695, %v439_v26 }
 0x207   : > { %v591_v28 = vpop.permute.xlu0 %590 }
 0x208   : > { %903 = vpow2.f32 %v440_v27  ;;  %v596_v29 = vsel %vm460_vm7, %v591_v28, 0 }
 0x209   : > { %864 = vmatpush3.bf16.msra.mxu0 %v596_v29  ;;  %905 = vpow2.f32 %v432_v36 }
 0x212   : > { %v904_v31 = vpop.eup %903 }
 0x213   : > { %v444_v33 = vsel %vm426_vm6, %v904_v31, 0.0  ;;  %v456_v34 = vpack.c.bf16 %v904_v31, %v904_v31  ;;  %v906_v37 = vpop.eup %905 }
 0x214   : > { %445 = vadd.xlane.f32.xlu0 %v444_v33  ;;  %v443_v39 = vmul.f32 %v906_v37, %v442_v38 }
 0x215   : > { %854 = vmatmul.mubr.msk.bf16.vlgmr.msra.gmra.mrb[0].mxu1 %vm426_vm6, %v456_v34 }
 0x216   : > { %858 = vmatpush3.bf16.xpose.msra.mxu1 %v514_v32  ;;  %859 = vmatprep.mubr.msk.bf16.mxu1 %vm940_vm0, %v939_v0 }
 0x21d   : > { %860 = vmatmul.mubr.msk.bf16.vlgmr.msra.gmra.mrb[4].mxu1 %vm377_vm1, %v506_v35 }
 0x22a   : > { %453 = vperm.xlu0 %901, %v906_v37  }
 0x2a1   : > { %v446_v40 = vpop.xlane.xlu0 %445 }
 0x2a2   : > { %v447_v41 = vadd.f32 %v446_v40, %v443_v39 }
 0x2a4   : > { %449 = vst.msk [vmem:[#allocation3] sm:$0xff] %vm345_vm2, %v447_v41 }
 0x2a9   : > { %v454_v12 = vpop.permute.xlu0 %453 }
 0x2ab   : > { %v651_v42 = vld [vmem:[#allocation3] sm:$0xff] }
 0x2ac   : > { %907 = vrcp.f32 %v651_v42 }
 0x2b6   : > { %v908_v43 = vpop.eup %907 }
 0x2b7   : > { %655 = vperm.xlu0 %901, %v908_v43  }
 0x2e8   : > { %v498_v44 = vpop.f32.mrb[0].mxu1 }
 0x2e9   : > { %v855_v45 = vpop.f32.mrb[1].mxu1 }
 0x2ea   : > { %v501_v46 = vpop.f32.mrb[2].mxu1 }
 0x2eb   : > { %v856_v47 = vpop.f32.mrb[3].mxu1 }
 0x2f0   : > { %v550_v48 = vpop.f32.mrb[4].mxu1 }
 0x2f1   : > { %v556_v49 = vsel %vm1012_vm5, %v550_v48, -1e+30  ;;  %v861_v50 = vpop.f32.mrb[5].mxu1 }
 0x2f2   : > { %v553_v51 = vpop.f32.mrb[6].mxu1  ;;  %v559_v52 = vsel %vm426_vm6, %v556_v49, -inf }
 0x2f3   : > { %560 = vmax.xlane.f32.xlu1 %v559_v52  ;;  %v862_v53 = vpop.f32.mrb[7].mxu1 }
 0x336   : > { %v656_v13 = vpop.permute.xlu0 %655 }
 0x380   : > { %v561_v55 = vpop.xlane.xlu1 %560 }
 0x381   : > { %v562_v56 = vmax.f32 %v558_v54, %v561_v55 }
 0x383   : > { %v563_v57 = vsub.f32 %v558_v54, %v562_v56  ;;  %582 = vst.msk [vmem:[#allocation2 + $0x8] sm:$0xff] %vm345_vm2, %v562_v56  ;;  %568 = vperm.xlu1 %902, %v562_v56  }
 0x385   : > { %v564_v0 = vmul.f32 1.442695, %v563_v57 }
 0x402   : > { %v569_v58 = vpop.permute.xlu1 %568 }
 0x403   : > { %v571_v59 = vsub.f32 %v556_v49, %v569_v58 }
 0x405   : > { %v572_v60 = vmul.f32 1.442695, %v571_v59 }
 0x407   : > { %909 = vpow2.f32 %v572_v60 }
 0x408   : > { %911 = vpow2.f32 %v564_v0 }
 0x411   : > { %v910_v61 = vpop.eup %909 }
 0x412   : > { %v577_v62 = vsel %vm426_vm6, %v910_v61, 0.0  ;;  %v588_v63 = vpack.c.bf16 %v910_v61, %v910_v61  ;;  %v912_v1 = vpop.eup %911 }
 0x413   : > { %578 = vadd.xlane.f32.xlu1 %v577_v62  ;;  %v576_v3 = vmul.f32 %v912_v1, %v575_v2 }
 0x414   : > { %866 = vmatmul.mubr.msk.bf16.vlgmr.msra.gmra.mrb[4].mxu0 %vm426_vm6, %v588_v63 }
 0x424   : > { %585 = vperm.xlu1 %902, %v912_v1  }
 0x4a0   : > { %v579_v4 = vpop.xlane.xlu1 %578 }
 0x4a1   : > { %v580_v5 = vadd.f32 %v579_v4, %v576_v3 }
 0x4a3   : > { %581 = vst.msk [vmem:[#allocation3 + $0x8] sm:$0xff] %vm345_vm2, %v580_v5 }
 0x4a4   : > { %v586_v14 = vpop.permute.xlu1 %585 }
 0x4a5   : > { %v638_v16 = vsel %vm377_vm1, %v454_v12, %v586_v14 }
 0x4a6   : > { %v645_v17 = vmul.f32 0.0, %v638_v16 }
 0x4aa   : > { %v659_v6 = vld [vmem:[#allocation3 + $0x8] sm:$0xff] }
 0x4ab   : > { %913 = vrcp.f32 %v659_v6 }
 0x4b5   : > { %v914_v7 = vpop.eup %913 }
 0x4b6   : > { %663 = vperm.xlu0 %901, %v914_v7  }
 0x4e7   : > { %v632_v8 = vpop.f32.mrb[4].mxu0 }
 0x4e8   : > { %640 = vrot.lane.b32.xlu0 %v632_v8, %s943_s24  ;;  %v867_v9 = vpop.f32.mrb[5].mxu0 }
 0x4e9   : > { %v635_v10 = vpop.f32.mrb[6].mxu0 }
 0x4ea   : > { %v868_v11 = vpop.f32.mrb[7].mxu0 }
 0x535   : > { %v664_v15 = vpop.permute.xlu0 %663 }
 0x536   : > { %v667_v21 = vsel %vm377_vm1, %v656_v13, %v664_v15 }
 0x55a   : > { %v641_v18 = vpop.permute.xlu0 %640 }
 0x55b   : > { %v643_v19 = vsel %vm377_vm1, %v498_v44, %v641_v18 }
 0x55c   : > { %v646_v20 = vadd.f32 %v645_v17, %v643_v19 }
 0x55e   : > { %v669_v22 = vmul.f32 %v667_v21, %v646_v20 }
 0x560   : > { %670 = vst [vmem:[%s339_s5] sm:$0xff] %v669_v22 }
 0x561 PF: > { %s13_s14 = sadd.s32 1, %s937_s14   ;;  %s1065_s12 = smov %s933_s13 }
 0x562   : > { %p10_p5 = scmp.ge.s32.totalorder %s13_s14, 4   ;;  %s1066_s13 = smov %s1068_s15 }
 0x564   :  { %12 = sbr.rel (!%p10_p5) target bundleno = 2 (0x2), region = 83 }

// kernel: whisper_forward.67
= control target key start
LH: loop header
LB: loop body
LE: loop exit
PB: predicated region body
PF: predicated region fallthrough
CT: control target
= control target key end

     0   :  { %s927_s12 = smov 0   ;;  %s929_s13 = smov 0   ;;  %s1017_s0 = inlined_call_operand.vmem [shape: f32[2,8,128], index: 0, kind: input, shape index: {}]   ;;  %s1018_s1 = inlined_call_operand.vmem [shape: f32[2,8,256], index: 1, kind: input, shape index: {}, may-alias: {1,2}]   ;;  %s1019_s2 = inlined_call_operand.vmem [shape: f32[2,8,256], index: 2, kind: input, shape index: {}, may-alias: {1,2}]   ;;  %s1020_s3 = inlined_call_operand.vmem [shape: f32[2,8,128], index: 3, kind: output, shape index: {}]  }
   0x1   :  { %s931_s14 = smov 0  }
   0x2 LB: > { %s39_s15 = sadd.s32 1, %s896_s13  ;;  %p786_p0 = scmp.ge.s32.totalorder %s900_s14, 1  ;;  %s900_s14 = sphi %s931_s14, %s13_s14   ;;  %s896_s13 = sphi %s929_s13, %s1022_s13   ;;  %s892_s12 = sphi %s927_s12, %s1021_s12  }
   0x3   : > { %p41_p1 = scmp.ge.s32.totalorder %s39_s15, 2  ;;  %p222_p2 = scmp.lt.s32.totalorder %s900_s14, 3 }
   0x5   : > { %s1024_s15 = smov (%p41_p1, %s39_s15), 0  ;;  %p223_p3 = pnand %p786_p0, %p222_p2 }
   0x6   : > { %p281_p4 = scmp.lt.s32.totalorder (!%p223_p3), %s892_s12, 1  ;;  %v902_v0 = vmov (!%p223_p3), 0.0   ;;  %vm903_vm0 = vmmov (!%p223_p3), 0   ;;  %vm349_vm1 = vcmask (!%p223_p3), 523264   ;;  %vm332_vm2 = vcmask (!%p223_p3), 7168   ;;  %s906_s24 = smov (!%p223_p3), 64  }
   0x7   : > { %226 = sbr.rel (%p223_p3) target bundleno = 1373 (0x55d), region = 32  ;;  %811 = vmatprep.subr.bf16.mxu0 (!%p223_p3), %v902_v0  ;;  %813 = vmatprep.mubr.msk.bf16.mxu0 (!%p223_p3), %vm903_vm0, %v902_v0  ;;  %v904_v6 = vmov (!%p223_p3), -inf   ;;  %335 = vst.msk [vmem:[#allocation3] sm:$0xff] (!%p223_p3), %vm332_vm2, %v902_v0  ;;  %336 = vst.msk [vmem:[#allocation3 + $0x8] sm:$0xff] (!%p223_p3), %vm332_vm2, %v902_v0  ;;  %vm397_vm3 = vcmask (!%p223_p3), 64512   ;;  %v905_v12 = vmov (!%p223_p3), 0  }
   0x8   : > { %817 = vmatprep.subr.bf16.mxu1 (!%p223_p3), %v902_v0  ;;  %819 = vmatprep.mubr.msk.bf16.mxu1 (!%p223_p3), %vm903_vm0, %v902_v0  ;;  %333 = vst.msk [vmem:[#allocation2] sm:$0xff] (!%p223_p3), %vm332_vm2, %v904_v6  ;;  %334 = vst.msk [vmem:[#allocation2 + $0x8] sm:$0xff] (!%p223_p3), %vm332_vm2, %v904_v6  ;;  %vm431_vm4 = vcmask (!%p223_p3), 1043456  }
   0x9   : > { %864 = vset.pattern.permute.xlu0 (!%p223_p3), %v905_v12  ;;  %865 = vset.pattern.permute.xlu1 (!%p223_p3), %v905_v12 }
   0xe   : > { %s1026_s12 = smov (!%p281_p4, %s892_s12), 1  ;;  %v413_v33 = vld [vmem:[#allocation3] sm:$0xff]  ;;  %v545_v60 = vld [vmem:[#allocation3 + $0x8] sm:$0xff] }
   0xf   : > { %s787_s16 = sshll.u32 %s1026_s12, 3  ;;  %s799_s17 = sshll.u32 %s1026_s12, 4  ;;  %v396_v13 = vld [vmem:[#allocation2] sm:$0xff]  ;;  %v528_v48 = vld [vmem:[#allocation2 + $0x8] sm:$0xff] }
  0x10   : > { %s302_s20 = scalar_lea.vmem %s1018_s1, %s799_s17  ;;  %s290_s23 = scalar_lea.vmem %s1017_s0, %s787_s16 }
  0x11   : > { %v345_v1 = vld [vmem:[%s302_s20] sm:$0xff]  ;;  %s801_s25 = sadd.s32 8, %s799_s17  ;;  %s326_s4 = scalar_lea.vmem %s1020_s3, %s787_s16 }
  0x12   : > { %v346_v2 = vpack.c.bf16 %v345_v1, %v345_v1  ;;  %v343_v4 = vld [vmem:[%s290_s23] sm:$0xff]  ;;  %s315_s28 = scalar_lea.vmem %s1019_s2, %s801_s25 }
  0x13   : > { %v344_v5 = vpack.c.bf16 %v343_v4, %v343_v4  ;;  %v347_v15 = vld [vmem:[%s315_s28] sm:$0xff] }
  0x14   : > { %v354_v3 = vsel %vm349_vm1, %v346_v2, 0  ;;  %479 = vrot.lane.b32.xlu1 %v346_v2, %s906_s24  ;;  %v348_v18 = vpack.c.bf16 %v347_v15, %v347_v15 }
  0x15   : > { %812 = vmatpush3.bf16.xpose.msra.mxu0 %v354_v3 }
  0x16   : > { %829 = vmatprep.subr.bf16.mxu0 %v902_v0  ;;  %v433_v19 = vsel %vm431_vm4, %v348_v18, 0 }
  0x17   : > { %818 = vmatpush3.bf16.msra.mxu1 %v433_v19 }
  0x18   : > { %476 = vrot.lane.b32.xlu1 %v344_v5, %s906_s24  ;;  %823 = vmatprep.subr.bf16.mxu1 %v902_v0 }
  0x1c   : > { %814 = vmatmul.mubr.msk.bf16.vlgmr.msra.gmra.mrb[0].mxu0 %vm349_vm1, %v344_v5 }
  0x1d   : > { %831 = vmatprep.mubr.msk.bf16.mxu0 %vm903_vm0, %v902_v0 }
  0x86   : > { %v480_v25 = vpop.permute.xlu1 %479 }
  0x87   : > { %v485_v27 = vsel %vm349_vm1, %v480_v25, 0 }
  0x8a   : > { %v477_v30 = vpop.permute.xlu1 %476 }
  0xef   : > { %v390_v7 = vpop.f32.mrb[0].mxu0 }
  0xf0   : > { %v815_v8 = vpop.f32.mrb[1].mxu0  ;;  %v398_v9 = vsel %vm397_vm3, %v390_v7, -inf }
  0xf1   : > { %399 = vmax.xlane.f32.xlu0 %v398_v9  ;;  %v393_v10 = vpop.f32.mrb[2].mxu0 }
  0xf2   : > { %v816_v11 = vpop.f32.mrb[3].mxu0 }
 0x17e   : > { %v400_v14 = vpop.xlane.xlu0 %399 }
 0x17f   : > { %v401_v16 = vmax.f32 %v396_v13, %v400_v14 }
 0x181   : > { %v402_v17 = vsub.f32 %v396_v13, %v401_v16  ;;  %421 = vst.msk [vmem:[#allocation2] sm:$0xff] %vm332_vm2, %v401_v16  ;;  %407 = vperm.xlu0 %864, %v401_v16  }
 0x183   : > { %v403_v31 = vmul.f32 1.442695, %v402_v17 }
 0x185   : > { %560 = vrot.lane.b32.xlu0 %v348_v18, %s906_s24 }
 0x200   : > { %v408_v20 = vpop.permute.xlu0 %407 }
 0x201   : > { %v410_v21 = vsub.f32 %v390_v7, %v408_v20 }
 0x203   : > { %v411_v22 = vmul.f32 1.442695, %v410_v21 }
 0x204   : > { %v561_v23 = vpop.permute.xlu0 %560 }
 0x205   : > { %866 = vpow2.f32 %v411_v22  ;;  %v566_v24 = vsel %vm431_vm4, %v561_v23, 0 }
 0x206   : > { %830 = vmatpush3.bf16.msra.mxu0 %v566_v24  ;;  %868 = vpow2.f32 %v403_v31 }
 0x20f   : > { %v867_v26 = vpop.eup %866 }
 0x210   : > { %v415_v28 = vsel %vm397_vm3, %v867_v26, 0.0  ;;  %v427_v29 = vpack.c.bf16 %v867_v26, %v867_v26  ;;  %v869_v32 = vpop.eup %868 }
 0x211   : > { %416 = vadd.xlane.f32.xlu0 %v415_v28  ;;  %v414_v34 = vmul.f32 %v869_v32, %v413_v33 }
 0x212   : > { %820 = vmatmul.mubr.msk.bf16.vlgmr.msra.gmra.mrb[0].mxu1 %vm397_vm3, %v427_v29 }
 0x213   : > { %824 = vmatpush3.bf16.xpose.msra.mxu1 %v485_v27  ;;  %825 = vmatprep.mubr.msk.bf16.mxu1 %vm903_vm0, %v902_v0 }
 0x21a   : > { %826 = vmatmul.mubr.msk.bf16.vlgmr.msra.gmra.mrb[4].mxu1 %vm349_vm1, %v477_v30 }
 0x227   : > { %424 = vperm.xlu0 %864, %v869_v32  }
 0x29e   : > { %v417_v35 = vpop.xlane.xlu0 %416 }
 0x29f   : > { %v418_v36 = vadd.f32 %v417_v35, %v414_v34 }
 0x2a1   : > { %420 = vst.msk [vmem:[#allocation3] sm:$0xff] %vm332_vm2, %v418_v36 }
 0x2a6   : > { %v425_v6 = vpop.permute.xlu0 %424 }
 0x2a8   : > { %v621_v37 = vld [vmem:[#allocation3] sm:$0xff] }
 0x2a9   : > { %870 = vrcp.f32 %v621_v37 }
 0x2b3   : > { %v871_v38 = vpop.eup %870 }
 0x2b4   : > { %625 = vperm.xlu0 %864, %v871_v38  }
 0x2e5   : > { %v469_v39 = vpop.f32.mrb[0].mxu1 }
 0x2e6   : > { %v821_v40 = vpop.f32.mrb[1].mxu1 }
 0x2e7   : > { %v472_v41 = vpop.f32.mrb[2].mxu1 }
 0x2e8   : > { %v822_v42 = vpop.f32.mrb[3].mxu1 }
 0x2ed   : > { %v521_v43 = vpop.f32.mrb[4].mxu1 }
 0x2ee   : > { %v827_v44 = vpop.f32.mrb[5].mxu1  ;;  %v529_v45 = vsel %vm397_vm3, %v521_v43, -inf }
 0x2ef   : > { %530 = vmax.xlane.f32.xlu1 %v529_v45  ;;  %v524_v46 = vpop.f32.mrb[6].mxu1 }
 0x2f0   : > { %v828_v47 = vpop.f32.mrb[7].mxu1 }
 0x333   : > { %v626_v7 = vpop.permute.xlu0 %625 }
 0x37c   : > { %v531_v49 = vpop.xlane.xlu1 %530 }
 0x37d   : > { %v532_v50 = vmax.f32 %v528_v48, %v531_v49 }
 0x37f   : > { %v533_v51 = vsub.f32 %v528_v48, %v532_v50  ;;  %552 = vst.msk [vmem:[#allocation2 + $0x8] sm:$0xff] %vm332_vm2, %v532_v50  ;;  %538 = vperm.xlu1 %865, %v532_v50  }
 0x381   : > { %v534_v58 = vmul.f32 1.442695, %v533_v51 }
 0x3fe   : > { %v539_v52 = vpop.permute.xlu1 %538 }
 0x3ff   : > { %v541_v53 = vsub.f32 %v521_v43, %v539_v52 }
 0x401   : > { %v542_v54 = vmul.f32 1.442695, %v541_v53 }
 0x403   : > { %872 = vpow2.f32 %v542_v54 }
 0x404   : > { %874 = vpow2.f32 %v534_v58 }
 0x40d   : > { %v873_v55 = vpop.eup %872 }
 0x40e   : > { %v547_v56 = vsel %vm397_vm3, %v873_v55, 0.0  ;;  %v558_v57 = vpack.c.bf16 %v873_v55, %v873_v55  ;;  %v875_v59 = vpop.eup %874 }
 0x40f   : > { %548 = vadd.xlane.f32.xlu1 %v547_v56  ;;  %v546_v61 = vmul.f32 %v875_v59, %v545_v60 }
 0x410   : > { %832 = vmatmul.mubr.msk.bf16.vlgmr.msra.gmra.mrb[4].mxu0 %vm397_vm3, %v558_v57 }
 0x420   : > { %555 = vperm.xlu1 %865, %v875_v59  }
 0x49c   : > { %v549_v62 = vpop.xlane.xlu1 %548 }
 0x49d   : > { %v550_v63 = vadd.f32 %v549_v62, %v546_v61 }
 0x49f   : > { %551 = vst.msk [vmem:[#allocation3 + $0x8] sm:$0xff] %vm332_vm2, %v550_v63 }
 0x4a0   : > { %v556_v8 = vpop.permute.xlu1 %555 }
 0x4a1   : > { %v608_v10 = vsel %vm349_vm1, %v425_v6, %v556_v8 }
 0x4a2   : > { %v615_v11 = vmul.f32 0.0, %v608_v10 }
 0x4a6   : > { %v629_v0 = vld [vmem:[#allocation3 + $0x8] sm:$0xff] }
 0x4a7   : > { %876 = vrcp.f32 %v629_v0 }
 0x4b1   : > { %v877_v1 = vpop.eup %876 }
 0x4b2   : > { %633 = vperm.xlu0 %864, %v877_v1  }
 0x4e3   : > { %v602_v2 = vpop.f32.mrb[4].mxu0 }
 0x4e4   : > { %610 = vrot.lane.b32.xlu0 %v602_v2, %s906_s24  ;;  %v833_v3 = vpop.f32.mrb[5].mxu0 }
 0x4e5   : > { %v605_v4 = vpop.f32.mrb[6].mxu0 }
 0x4e6   : > { %v834_v5 = vpop.f32.mrb[7].mxu0 }
 0x531   : > { %v634_v9 = vpop.permute.xlu0 %633 }
 0x532   : > { %v637_v15 = vsel %vm349_vm1, %v626_v7, %v634_v9 }
 0x556   : > { %v611_v12 = vpop.permute.xlu0 %610 }
 0x557   : > { %v613_v13 = vsel %vm349_vm1, %v469_v39, %v611_v12 }
 0x558   : > { %v616_v14 = vadd.f32 %v615_v11, %v613_v13 }
 0x55a   : > { %v639_v16 = vmul.f32 %v637_v15, %v616_v14 }
 0x55c   : > { %640 = vst [vmem:[%s326_s4] sm:$0xff] %v639_v16 }
 0x55d PF: > { %s13_s14 = sadd.s32 1, %s900_s14   ;;  %s1021_s12 = smov %s896_s13 }
 0x55e   : > { %p10_p5 = scmp.ge.s32.totalorder %s13_s14, 4   ;;  %s1022_s13 = smov %s1024_s15 }
 0x560   :  { %12 = sbr.rel (!%p10_p5) target bundleno = 2 (0x2), region = 83 }

</bundles_post_ra>
